<compile_context>
chip_gen: v7x
topology: tpu7x:2x2x1
jax: 0.10.0
libtpu: 0.0.40
codegen_flags: <defaults>
</compile_context>

<pallas_src>
import functools
import math

import jax
import jax.numpy as jnp
from jax.experimental import pallas as pl
from jax.experimental.pallas import tpu as pltpu

# ----------------------- config (matches __C fields) -----------------------
HIDDEN   = 32          # __C.HIDDEN_SIZE
DG       = 16          # __C.DG
FF_SIZE  = 64          # __C.FF_SIZE (standard MCAN FFN hidden)
HEADS    = 4           # __C.MULTI_HEAD
DHEAD    = HIDDEN // HEADS   # __C.HIDDEN_SIZE_HEAD
LAYERS   = 2           # __C.LAYER
BATCH    = 2
SEQ_X    = 8
SEQ_Y    = 8
SEQ      = SEQ_X + SEQ_Y
EPS_LN   = 1e-6
GATE_PAD = 8           # pad the 2-wide gate output to 8 lanes
PROJ_W   = 3 * HIDDEN + 2 * DG   # 128: fused [v | k | q | gq | gk] projection width


# ------------------------------ LayerNorm helpers ---------------------------
def _ln_ref(x, a, b, n):
    # MCAN-style LayerNorm: a * (x - mean) / (std + eps) + b, std with ddof=1
    mean = jnp.mean(x, axis=-1, keepdims=True)
    var = jnp.sum((x - mean) ** 2, axis=-1, keepdims=True) / (n - 1)
    return a * (x - mean) / (jnp.sqrt(var) + EPS_LN) + b


def _ln_kernel(x, a, b, n):
    # Same math, but the divide goes to the EUP via approximate reciprocal.
    mean = jnp.mean(x, axis=-1, keepdims=True)
    d = x - mean
    var = jnp.sum(d * d, axis=-1, keepdims=True) * (1.0 / (n - 1))
    inv = pl.reciprocal(jnp.sqrt(var) + EPS_LN, approx=True)
    return a * d * inv + b


# ------------------------------ kernel ------------------------------------
def fu_kernel(z_ref, bias_ref,
              wproj_ref, bproj_ref, wg_ref, bg_ref,
              w1_ref, b1_ref, w2_ref, b2_ref, lnp_ref,
              out_ref):
    z = z_ref[0]          # (R, HIDDEN) f32, R = rows in this grid step (batch-fused or not)
    bias = bias_ref[0]    # (R, R) f32 additive key bias: 0 or -1e9 (padding + cross-batch)

    for l in range(LAYERS):            # static unroll; z stays in VMEM/vregs
        lnp = lnp_ref[l]               # (4, HIDDEN): [l0a, l0b, l1a, l1b]

        # ---- fused projection: one (R,32)@(32,128) MXU push --------------------
        # columns: [ v | k | q*1/sqrt(d) | gq | gk ]   (gate projections folded in)
        proj = jnp.dot(z.astype(jnp.bfloat16), wproj_ref[l],
                       preferred_element_type=jnp.float32) + bproj_ref[l]   # (R, 128)
        v  = proj[:, 0 * HIDDEN:1 * HIDDEN]
        k  = proj[:, 1 * HIDDEN:2 * HIDDEN]
        q  = proj[:, 2 * HIDDEN:3 * HIDDEN]                 # pre-scaled by 1/sqrt(DHEAD)
        gq = proj[:, 3 * HIDDEN:3 * HIDDEN + DG]
        gk = proj[:, 3 * HIDDEN + DG:3 * HIDDEN + 2 * DG]

        # ---- gating mask over k / q ---------------------------------------------
        gate = jax.nn.sigmoid(
            jnp.dot((gq * gk).astype(jnp.bfloat16), wg_ref[l],
                    preferred_element_type=jnp.float32) + bg_ref[l])        # (R, 8) padded
        k_m = gate[:, 0:1] * k        # column 0  -> mask for k
        q_m = gate[:, 1:2] * q        # column 1 (== original [..., -1]) -> mask for q

        # ---- multi-head attention, heads batched (slice+stack: clean lowering) ---
        qh = jnp.stack([q_m[:, h * DHEAD:(h + 1) * DHEAD] for h in range(HEADS)], axis=0)
        kh = jnp.stack([k_m[:, h * DHEAD:(h + 1) * DHEAD] for h in range(HEADS)], axis=0)
        vh = jnp.stack([v[:, h * DHEAD:(h + 1) * DHEAD] for h in range(HEADS)], axis=0)
        sc = jnp.einsum('hqd,hkd->hqk',
                        qh.astype(jnp.bfloat16), kh.astype(jnp.bfloat16),
                        preferred_element_type=jnp.float32)                 # (H, R, R)
        sc = sc + bias                 # broadcasts over heads; kills padded & cross-batch keys
        m = jnp.max(sc, axis=-1, keepdims=True)
        p = jnp.exp(sc - m)
        p = p * pl.reciprocal(jnp.sum(p, axis=-1, keepdims=True), approx=True)
        # TODO(synk): attention-map dropout skipped (eval-mode identity)
        att = jnp.einsum('hqk,hkd->hqd',
                         p.astype(jnp.bfloat16), vh.astype(jnp.bfloat16),
                         preferred_element_type=jnp.float32)                # (H, R, DHEAD)
        att = jnp.concatenate([att[h] for h in range(HEADS)], axis=-1)      # (R, HIDDEN)

        # ---- residual + LayerNorm 0 ----------------------------------------------
        z1 = _ln_kernel(z + att, lnp[0:1], lnp[1:2], HIDDEN)

        # ---- FFN (Linear -> ReLU -> Linear) ---------------------------------------
        h1 = jax.nn.relu(jnp.dot(z1.astype(jnp.bfloat16), w1_ref[l],
                                 preferred_element_type=jnp.float32) + b1_ref[l])
        ff = jnp.dot(h1.astype(jnp.bfloat16), w2_ref[l],
                     preferred_element_type=jnp.float32) + b2_ref[l]

        # ---- residual + LayerNorm 1 ----------------------------------------------
        z = _ln_kernel(z1 + ff, lnp[2:3], lnp[3:4], HIDDEN)

    out_ref[0] = z.astype(out_ref.dtype)


# --------------------------- pallas wrapper --------------------------------
_PACKED_NAMES = ("wproj", "bproj", "wg", "bg", "w1", "b1", "w2", "b2", "lnp")


def _full_spec(shape):
    nd = len(shape)
    return pl.BlockSpec(shape, lambda i, _nd=nd: (0,) * _nd)


def pack_params(all_params):
    """One-time packing (run at init, NOT per forward call):
    stack layers, fold gate projections + 1/sqrt(d) into one 128-lane fused weight."""
    def stack(name):
        return jnp.stack([p[name] for p in all_params], axis=0)

    scale = 1.0 / math.sqrt(DHEAD)
    wv, wk, wq = stack("wv"), stack("wk"), stack("wq")        # (L, H, H)
    bv, bk, bq = stack("bv"), stack("bk"), stack("bq")        # (L, 1, H)
    wgq, wgk = stack("wgq"), stack("wgk")                     # (L, H, DG)
    bgq, bgk = stack("bgq"), stack("bgk")                     # (L, 1, DG)

    # gq = z@(wq@wgq) + (bq@wgq + bgq) ; gk analogous.  Fold in f32, then cast to bf16.
    wproj = jnp.concatenate(
        [wv, wk, wq * scale,
         jnp.einsum('lij,ljk->lik', wq, wgq),
         jnp.einsum('lij,ljk->lik', wk, wgk)], axis=-1)       # (L, H, 128)
    bproj = jnp.concatenate(
        [bv, bk, bq * scale,
         jnp.einsum('lij,ljk->lik', bq, wgq) + bgq,
         jnp.einsum('lij,ljk->lik', bk, wgk) + bgk], axis=-1)  # (L, 1, 128)

    wg = jnp.pad(stack("wg"), ((0, 0), (0, 0), (0, GATE_PAD - 2)))  # (L, DG, 8)
    bg = jnp.pad(stack("bg"), ((0, 0), (0, 0), (0, GATE_PAD - 2)))  # (L, 1, 8)
    lnp = jnp.concatenate([stack("l0a"), stack("l0b"),
                           stack("l1a"), stack("l1b")], axis=1)      # (L, 4, H)

    bf16 = lambda a: a.astype(jnp.bfloat16)
    return {
        "wproj": bf16(wproj), "bproj": bproj.astype(jnp.float32),
        "wg": bf16(wg), "bg": bg,
        "w1": bf16(stack("w1")), "b1": stack("b1"),
        "w2": bf16(stack("w2")), "b2": stack("b2"),
        "lnp": lnp,
    }


def _pick_batch_per_group(batch):
    """v7x has 2 TensorCores -> keep one batch element per ("parallel") grid step.
    Single-TC chips (v5e/v6e) -> fuse the whole batch into one grid step."""
    kind = jax.devices()[0].device_kind.lower()
    if "v7" in kind:
        return 1
    return batch


@functools.partial(jax.jit, static_argnames=("bpg",))
def fu_forward(x, y, x_mask, y_mask, packed, *, bpg=BATCH):
    """FU.forward, jitted end-to-end: concat + mask prep fuse with the pallas_call.
    x_mask / y_mask are accepted but unused (matches the PyTorch module)."""
    del x_mask, y_mask
    z = jnp.concatenate([x, y], axis=1).astype(jnp.float32)    # (B, SEQ, HIDDEN)
    B = z.shape[0]
    G = B // bpg                      # grid steps
    R = bpg * SEQ                     # rows handled per grid step (batch fused into sublanes)
    z2 = z.reshape(G, R, HIDDEN)

    # Additive key bias: -1e9 for padded keys and (when batch-fused) cross-batch keys.
    key_pad = (jnp.sum(jnp.abs(z2), axis=-1) == 0)             # (G, R)
    bid = jnp.arange(R) // SEQ                                 # row -> batch element id
    cross = bid[:, None] != bid[None, :]                       # (R, R)
    bias = jnp.where(cross[None, :, :] | key_pad[:, None, :], -1e9, 0.0).astype(jnp.float32)

    weights = [packed[n] for n in _PACKED_NAMES]
    in_specs = [
        pl.BlockSpec((1, R, HIDDEN), lambda i: (i, 0, 0)),     # z rows for this step
        pl.BlockSpec((1, R, R), lambda i: (i, 0, 0)),          # additive key bias
    ] + [_full_spec(tuple(w.shape)) for w in weights]

    out = pl.pallas_call(
        fu_kernel,
        out_shape=jax.ShapeDtypeStruct((G, R, HIDDEN), jnp.float32),
        grid=(G,),
        in_specs=in_specs,
        out_specs=pl.BlockSpec((1, R, HIDDEN), lambda i: (i, 0, 0)),
        compiler_params=pltpu.CompilerParams(
            dimension_semantics=("parallel",)),
    )(z2, bias, *weights)
    return out.reshape(B, SEQ, HIDDEN)


# ------------------------- pure-JAX reference -------------------------------
def _fu_reference(x, y, all_params):
    z = jnp.concatenate([x, y], axis=1)
    key_mask = (jnp.sum(jnp.abs(z), axis=-1) == 0)[:, None, None, :]  # (B,1,1,SEQ)
    B = z.shape[0]
    for p in all_params:
        v = z @ p["wv"] + p["bv"]
        k = z @ p["wk"] + p["bk"]
        q = z @ p["wq"] + p["bq"]
        g = jax.nn.sigmoid(((q @ p["wgq"] + p["bgq"]) * (k @ p["wgk"] + p["bgk"]))
                           @ p["wg"] + p["bg"])
        k_m = g[..., 0:1] * k
        q_m = g[..., 1:2] * q
        split = lambda t: t.reshape(B, SEQ, HEADS, DHEAD).transpose(0, 2, 1, 3)
        qh, kh, vh = split(q_m), split(k_m), split(v)
        sc = qh @ kh.transpose(0, 1, 3, 2) / math.sqrt(DHEAD)
        sc = jnp.where(key_mask, -1e9, sc)
        att = (jax.nn.softmax(sc, axis=-1) @ vh).transpose(0, 2, 1, 3).reshape(B, SEQ, HIDDEN)
        z1 = _ln_ref(z + att, p["l0a"], p["l0b"], HIDDEN)
        ff = jax.nn.relu(z1 @ p["w1"] + p["b1"]) @ p["w2"] + p["b2"]
        z = _ln_ref(z1 + ff, p["l1a"], p["l1b"], HIDDEN)
    return z


# ------------------------- deterministic params -----------------------------
def init_layer_params(key):
    ks = jax.random.split(key, 10)
    s = 0.02

    def lin(k, fan_in, fan_out):
        return s * jax.random.normal(k, (fan_in, fan_out), jnp.float32)

    return {
        "wv": lin(ks[0], HIDDEN, HIDDEN), "bv": jnp.zeros((1, HIDDEN), jnp.float32),
        "wk": lin(ks[1], HIDDEN, HIDDEN), "bk": jnp.zeros((1, HIDDEN), jnp.float32),
        "wq": lin(ks[2], HIDDEN, HIDDEN), "bq": jnp.zeros((1, HIDDEN), jnp.float32),
        "wgq": lin(ks[3], HIDDEN, DG),    "bgq": jnp.zeros((1, DG), jnp.float32),
        "wgk": lin(ks[4], HIDDEN, DG),    "bgk": jnp.zeros((1, DG), jnp.float32),
        "wg": lin(ks[5], DG, 2),          "bg": jnp.zeros((1, 2), jnp.float32),
        "l0a": jnp.ones((1, HIDDEN), jnp.float32),
        "l0b": jnp.zeros((1, HIDDEN), jnp.float32),
        "w1": lin(ks[6], HIDDEN, FF_SIZE), "b1": jnp.zeros((1, FF_SIZE), jnp.float32),
        "w2": lin(ks[7], FF_SIZE, HIDDEN), "b2": jnp.zeros((1, HIDDEN), jnp.float32),
        "l1a": jnp.ones((1, HIDDEN), jnp.float32),
        "l1b": jnp.zeros((1, HIDDEN), jnp.float32),
    }


if __name__ == "__main__":
    root = jax.random.PRNGKey(0)
    k_x, k_y, k_p = jax.random.split(root, 3)

    x = jax.random.normal(k_x, (BATCH, SEQ_X, HIDDEN), jnp.float32)
    y = jax.random.normal(k_y, (BATCH, SEQ_Y, HIDDEN), jnp.float32)
    # zero-pad the last two y tokens so the (sum |z| == 0) padding mask is exercised
    y = y.at[:, -2:, :].set(0.0)

    # x_mask / y_mask exist in the torch signature but are unused by FU.forward
    x_mask = jnp.zeros((BATCH, 1, 1, SEQ_X), jnp.bool_)
    y_mask = jnp.zeros((BATCH, 1, 1, SEQ_Y), jnp.bool_)

    layer_keys = jax.random.split(k_p, LAYERS)
    params = [init_layer_params(k) for k in layer_keys]

    # One-time init work (hoisted out of the per-call path per the perf review).
    packed = pack_params(params)
    bpg = _pick_batch_per_group(BATCH)

    out = fu_forward(x, y, x_mask, y_mask, packed, bpg=bpg)
    out = jax.block_until_ready(out)
    assert out.shape == (BATCH, SEQ, HIDDEN) and bool(jnp.all(jnp.isfinite(out)))

    ref = jax.block_until_ready(_fu_reference(x, y, params))
    # bf16 matmul operands + approx reciprocals -> generous tolerance vs f32 reference
    assert bool(jnp.allclose(out, ref, atol=5e-2, rtol=5e-2)), \
        f"max diff {float(jnp.max(jnp.abs(out - ref)))}"

    print("KERNEL_OK")
</pallas_src>

<mosaic_0001>
module attributes {stable_mosaic.version = 11 : i64} {
  func.func @fu_kernel(%arg0: i32, %arg1: memref<1x32x32xf32, #tpu.memory_space<vmem>>, %arg2: memref<1x32x32xf32, #tpu.memory_space<vmem>>, %arg3: memref<2x32x128xbf16, #tpu.memory_space<vmem>>, %arg4: memref<2x1x128xf32, #tpu.memory_space<vmem>>, %arg5: memref<2x16x8xbf16, #tpu.memory_space<vmem>>, %arg6: memref<2x1x8xf32, #tpu.memory_space<vmem>>, %arg7: memref<2x32x64xbf16, #tpu.memory_space<vmem>>, %arg8: memref<2x1x64xf32, #tpu.memory_space<vmem>>, %arg9: memref<2x64x32xbf16, #tpu.memory_space<vmem>>, %arg10: memref<2x1x32xf32, #tpu.memory_space<vmem>>, %arg11: memref<2x4x32xf32, #tpu.memory_space<vmem>>, %arg12: memref<1x32x32xf32, #tpu.memory_space<vmem>>) attributes {dimension_semantics = [#tpu.dimension_semantics<parallel>], iteration_bounds = array<i64: 1>, scalar_prefetch = 0 : i64, scratch_operands = 0 : i64, tpu.core_type = #tpu.core_type<tc>, window_params = [{transform_indices = @transform_0, window_bounds = array<i64: 1, 32, 32>}, {transform_indices = @transform_1, window_bounds = array<i64: 1, 32, 32>}, {pipeline_mode = #tpu.pipeline_mode<synchronous>, transform_indices = @transform_2, window_bounds = array<i64: 2, 32, 128>}, {pipeline_mode = #tpu.pipeline_mode<synchronous>, transform_indices = @transform_3, window_bounds = array<i64: 2, 1, 128>}, {pipeline_mode = #tpu.pipeline_mode<synchronous>, transform_indices = @transform_4, window_bounds = array<i64: 2, 16, 8>}, {pipeline_mode = #tpu.pipeline_mode<synchronous>, transform_indices = @transform_5, window_bounds = array<i64: 2, 1, 8>}, {pipeline_mode = #tpu.pipeline_mode<synchronous>, transform_indices = @transform_6, window_bounds = array<i64: 2, 32, 64>}, {pipeline_mode = #tpu.pipeline_mode<synchronous>, transform_indices = @transform_7, window_bounds = array<i64: 2, 1, 64>}, {pipeline_mode = #tpu.pipeline_mode<synchronous>, transform_indices = @transform_8, window_bounds = array<i64: 2, 64, 32>}, {pipeline_mode = #tpu.pipeline_mode<synchronous>, transform_indices = @transform_9, window_bounds = array<i64: 2, 1, 32>}, {pipeline_mode = #tpu.pipeline_mode<synchronous>, transform_indices = @transform_10, window_bounds = array<i64: 2, 4, 32>}, {transform_indices = @transform_11, window_bounds = array<i64: 1, 32, 32>}]} {
    %c0 = arith.constant 0 : index
    %c0_0 = arith.constant 0 : index
    %c0_1 = arith.constant 0 : index
    %0 = vector.load %arg1[%c0, %c0_0, %c0_1] : memref<1x32x32xf32, #tpu.memory_space<vmem>>, vector<1x32x32xf32>
    %1 = vector.shape_cast %0 : vector<1x32x32xf32> to vector<32x32xf32>
    %c0_2 = arith.constant 0 : index
    %c0_3 = arith.constant 0 : index
    %c0_4 = arith.constant 0 : index
    %2 = vector.load %arg2[%c0_2, %c0_3, %c0_4] : memref<1x32x32xf32, #tpu.memory_space<vmem>>, vector<1x32x32xf32>
    %3 = vector.shape_cast %2 : vector<1x32x32xf32> to vector<32x32xf32>
    %c0_5 = arith.constant 0 : index
    %c0_6 = arith.constant 0 : index
    %c0_7 = arith.constant 0 : index
    %4 = vector.load %arg11[%c0_5, %c0_6, %c0_7] : memref<2x4x32xf32, #tpu.memory_space<vmem>>, vector<1x4x32xf32>
    %5 = vector.shape_cast %4 : vector<1x4x32xf32> to vector<4x32xf32>
    %6 = arith.truncf %1 : vector<32x32xf32> to vector<32x32xbf16>
    %c0_8 = arith.constant 0 : index
    %c0_9 = arith.constant 0 : index
    %c0_10 = arith.constant 0 : index
    %7 = vector.load %arg3[%c0_8, %c0_9, %c0_10] : memref<2x32x128xbf16, #tpu.memory_space<vmem>>, vector<1x32x128xbf16>
    %8 = vector.shape_cast %7 : vector<1x32x128xbf16> to vector<32x128xbf16>
    %cst = arith.constant dense<0.000000e+00> : vector<32x128xf32>
    %9 = tpu.matmul %6, %8, %cst {dimension_numbers = #tpu.dot_dimension_numbers<[1], [0], [0], [1], [0, 0, 1, 1], [], []>} : vector<32x32xbf16>, vector<32x128xbf16>, vector<32x128xf32> -> vector<32x128xf32>
    %c0_11 = arith.constant 0 : index
    %c0_12 = arith.constant 0 : index
    %c0_13 = arith.constant 0 : index
    %10 = vector.load %arg4[%c0_11, %c0_12, %c0_13] : memref<2x1x128xf32, #tpu.memory_space<vmem>>, vector<1x1x128xf32>
    %11 = vector.shape_cast %10 : vector<1x1x128xf32> to vector<1x128xf32>
    %12 = vector.broadcast %11 : vector<1x128xf32> to vector<32x128xf32>
    %13 = arith.addf %9, %12 : vector<32x128xf32>
    %14 = vector.extract_strided_slice %13 {offsets = [0, 0], sizes = [32, 32], strides = [1, 1]} : vector<32x128xf32> to vector<32x32xf32>
    %15 = vector.extract_strided_slice %13 {offsets = [0, 32], sizes = [32, 32], strides = [1, 1]} : vector<32x128xf32> to vector<32x32xf32>
    %16 = vector.extract_strided_slice %13 {offsets = [0, 64], sizes = [32, 32], strides = [1, 1]} : vector<32x128xf32> to vector<32x32xf32>
    %17 = vector.extract_strided_slice %13 {offsets = [0, 96], sizes = [32, 16], strides = [1, 1]} : vector<32x128xf32> to vector<32x16xf32>
    %18 = vector.extract_strided_slice %13 {offsets = [0, 112], sizes = [32, 16], strides = [1, 1]} : vector<32x128xf32> to vector<32x16xf32>
    %19 = arith.mulf %17, %18 : vector<32x16xf32>
    %20 = arith.truncf %19 : vector<32x16xf32> to vector<32x16xbf16>
    %c0_14 = arith.constant 0 : index
    %c0_15 = arith.constant 0 : index
    %c0_16 = arith.constant 0 : index
    %21 = vector.load %arg5[%c0_14, %c0_15, %c0_16] : memref<2x16x8xbf16, #tpu.memory_space<vmem>>, vector<1x16x8xbf16>
    %22 = vector.shape_cast %21 : vector<1x16x8xbf16> to vector<16x8xbf16>
    %cst_17 = arith.constant dense<0.000000e+00> : vector<32x8xf32>
    %23 = tpu.matmul %20, %22, %cst_17 {dimension_numbers = #tpu.dot_dimension_numbers<[1], [0], [0], [1], [0, 0, 1, 1], [], []>} : vector<32x16xbf16>, vector<16x8xbf16>, vector<32x8xf32> -> vector<32x8xf32>
    %c0_18 = arith.constant 0 : index
    %c0_19 = arith.constant 0 : index
    %c0_20 = arith.constant 0 : index
    %24 = vector.load %arg6[%c0_18, %c0_19, %c0_20] : memref<2x1x8xf32, #tpu.memory_space<vmem>>, vector<1x1x8xf32>
    %25 = vector.shape_cast %24 : vector<1x1x8xf32> to vector<1x8xf32>
    %26 = vector.broadcast %25 : vector<1x8xf32> to vector<32x8xf32>
    %27 = arith.addf %23, %26 : vector<32x8xf32>
    %28 = arith.negf %27 : vector<32x8xf32>
    %29 = math.exp %28 : vector<32x8xf32>
    %cst_21 = arith.constant 1.000000e+00 : f32
    %30 = vector.broadcast %cst_21 : f32 to vector<32x8xf32>
    %31 = arith.addf %30, %29 : vector<32x8xf32>
    %32 = arith.divf %30, %31 : vector<32x8xf32>
    %33 = vector.extract_strided_slice %32 {offsets = [0, 0], sizes = [32, 1], strides = [1, 1]} : vector<32x8xf32> to vector<32x1xf32>
    %34 = vector.broadcast %33 : vector<32x1xf32> to vector<32x32xf32>
    %35 = arith.mulf %34, %15 : vector<32x32xf32>
    %36 = vector.extract_strided_slice %32 {offsets = [0, 1], sizes = [32, 1], strides = [1, 1]} : vector<32x8xf32> to vector<32x1xf32>
    %37 = vector.broadcast %36 : vector<32x1xf32> to vector<32x32xf32>
    %38 = arith.mulf %37, %16 : vector<32x32xf32>
    %39 = vector.extract_strided_slice %38 {offsets = [0, 0], sizes = [32, 8], strides = [1, 1]} : vector<32x32xf32> to vector<32x8xf32>
    %40 = vector.extract_strided_slice %38 {offsets = [0, 8], sizes = [32, 8], strides = [1, 1]} : vector<32x32xf32> to vector<32x8xf32>
    %41 = vector.extract_strided_slice %38 {offsets = [0, 16], sizes = [32, 8], strides = [1, 1]} : vector<32x32xf32> to vector<32x8xf32>
    %42 = vector.extract_strided_slice %38 {offsets = [0, 24], sizes = [32, 8], strides = [1, 1]} : vector<32x32xf32> to vector<32x8xf32>
    %43 = vector.shape_cast %39 : vector<32x8xf32> to vector<1x32x8xf32>
    %44 = vector.shape_cast %40 : vector<32x8xf32> to vector<1x32x8xf32>
    %45 = vector.shape_cast %41 : vector<32x8xf32> to vector<1x32x8xf32>
    %46 = vector.shape_cast %42 : vector<32x8xf32> to vector<1x32x8xf32>
    %47 = tpu.concatenate %43, %44, %45, %46 in 0 : vector<1x32x8xf32>, vector<1x32x8xf32>, vector<1x32x8xf32>, vector<1x32x8xf32> -> vector<4x32x8xf32>
    %48 = vector.extract_strided_slice %35 {offsets = [0, 0], sizes = [32, 8], strides = [1, 1]} : vector<32x32xf32> to vector<32x8xf32>
    %49 = vector.extract_strided_slice %35 {offsets = [0, 8], sizes = [32, 8], strides = [1, 1]} : vector<32x32xf32> to vector<32x8xf32>
    %50 = vector.extract_strided_slice %35 {offsets = [0, 16], sizes = [32, 8], strides = [1, 1]} : vector<32x32xf32> to vector<32x8xf32>
    %51 = vector.extract_strided_slice %35 {offsets = [0, 24], sizes = [32, 8], strides = [1, 1]} : vector<32x32xf32> to vector<32x8xf32>
    %52 = vector.shape_cast %48 : vector<32x8xf32> to vector<1x32x8xf32>
    %53 = vector.shape_cast %49 : vector<32x8xf32> to vector<1x32x8xf32>
    %54 = vector.shape_cast %50 : vector<32x8xf32> to vector<1x32x8xf32>
    %55 = vector.shape_cast %51 : vector<32x8xf32> to vector<1x32x8xf32>
    %56 = tpu.concatenate %52, %53, %54, %55 in 0 : vector<1x32x8xf32>, vector<1x32x8xf32>, vector<1x32x8xf32>, vector<1x32x8xf32> -> vector<4x32x8xf32>
    %57 = vector.extract_strided_slice %14 {offsets = [0, 0], sizes = [32, 8], strides = [1, 1]} : vector<32x32xf32> to vector<32x8xf32>
    %58 = vector.extract_strided_slice %14 {offsets = [0, 8], sizes = [32, 8], strides = [1, 1]} : vector<32x32xf32> to vector<32x8xf32>
    %59 = vector.extract_strided_slice %14 {offsets = [0, 16], sizes = [32, 8], strides = [1, 1]} : vector<32x32xf32> to vector<32x8xf32>
    %60 = vector.extract_strided_slice %14 {offsets = [0, 24], sizes = [32, 8], strides = [1, 1]} : vector<32x32xf32> to vector<32x8xf32>
    %61 = vector.shape_cast %57 : vector<32x8xf32> to vector<1x32x8xf32>
    %62 = vector.shape_cast %58 : vector<32x8xf32> to vector<1x32x8xf32>
    %63 = vector.shape_cast %59 : vector<32x8xf32> to vector<1x32x8xf32>
    %64 = vector.shape_cast %60 : vector<32x8xf32> to vector<1x32x8xf32>
    %65 = tpu.concatenate %61, %62, %63, %64 in 0 : vector<1x32x8xf32>, vector<1x32x8xf32>, vector<1x32x8xf32>, vector<1x32x8xf32> -> vector<4x32x8xf32>
    %66 = arith.truncf %47 : vector<4x32x8xf32> to vector<4x32x8xbf16>
    %67 = arith.truncf %56 : vector<4x32x8xf32> to vector<4x32x8xbf16>
    "tpu.trace_start"() <{level = 10 : i32, message = "hqd,hkd->hqk"}> : () -> ()
    %cst_22 = arith.constant dense<0.000000e+00> : vector<4x32x32xf32>
    %68 = tpu.matmul %66, %67, %cst_22 {dimension_numbers = #tpu.dot_dimension_numbers<[2], [2], [1], [1], [0, 0, 0, 1, 1, 1], [0], [0]>} : vector<4x32x8xbf16>, vector<4x32x8xbf16>, vector<4x32x32xf32> -> vector<4x32x32xf32>
    "tpu.trace_stop"() : () -> ()
    %69 = vector.shape_cast %3 : vector<32x32xf32> to vector<1x32x32xf32>
    %70 = vector.broadcast %69 : vector<1x32x32xf32> to vector<4x32x32xf32>
    %71 = arith.addf %68, %70 : vector<4x32x32xf32>
    %cst_23 = arith.constant dense<0xFF800000> : vector<4x32xf32>
    %72 = vector.multi_reduction <maximumf>, %71, %cst_23 [2] : vector<4x32x32xf32> to vector<4x32xf32>
    %73 = vector.shape_cast %72 : vector<4x32xf32> to vector<4x32x1xf32>
    %74 = vector.broadcast %73 : vector<4x32x1xf32> to vector<4x32x32xf32>
    %75 = arith.subf %71, %74 : vector<4x32x32xf32>
    %76 = math.exp %75 : vector<4x32x32xf32>
    %cst_24 = arith.constant dense<0.000000e+00> : vector<4x32xf32>
    %77 = vector.multi_reduction <add>, %76, %cst_24 [2] : vector<4x32x32xf32> to vector<4x32xf32>
    %78 = vector.shape_cast %77 : vector<4x32xf32> to vector<4x32x1xf32>
    %79 = tpu.reciprocal %78 {approx = true} : vector<4x32x1xf32> -> vector<4x32x1xf32>
    %80 = vector.broadcast %79 : vector<4x32x1xf32> to vector<4x32x32xf32>
    %81 = arith.mulf %76, %80 : vector<4x32x32xf32>
    %82 = arith.truncf %81 : vector<4x32x32xf32> to vector<4x32x32xbf16>
    %83 = arith.truncf %65 : vector<4x32x8xf32> to vector<4x32x8xbf16>
    "tpu.trace_start"() <{level = 10 : i32, message = "hqk,hkd->hqd"}> : () -> ()
    %cst_25 = arith.constant dense<0.000000e+00> : vector<4x32x8xf32>
    %84 = tpu.matmul %82, %83, %cst_25 {dimension_numbers = #tpu.dot_dimension_numbers<[2], [1], [1], [2], [0, 0, 0, 1, 1, 2], [0], [0]>} : vector<4x32x32xbf16>, vector<4x32x8xbf16>, vector<4x32x8xf32> -> vector<4x32x8xf32>
    "tpu.trace_stop"() : () -> ()
    %85 = vector.extract_strided_slice %84 {offsets = [0, 0, 0], sizes = [1, 32, 8], strides = [1, 1, 1]} : vector<4x32x8xf32> to vector<1x32x8xf32>
    %86 = vector.shape_cast %85 : vector<1x32x8xf32> to vector<32x8xf32>
    %87 = vector.extract_strided_slice %84 {offsets = [1, 0, 0], sizes = [1, 32, 8], strides = [1, 1, 1]} : vector<4x32x8xf32> to vector<1x32x8xf32>
    %88 = vector.shape_cast %87 : vector<1x32x8xf32> to vector<32x8xf32>
    %89 = vector.extract_strided_slice %84 {offsets = [2, 0, 0], sizes = [1, 32, 8], strides = [1, 1, 1]} : vector<4x32x8xf32> to vector<1x32x8xf32>
    %90 = vector.shape_cast %89 : vector<1x32x8xf32> to vector<32x8xf32>
    %91 = vector.extract_strided_slice %84 {offsets = [3, 0, 0], sizes = [1, 32, 8], strides = [1, 1, 1]} : vector<4x32x8xf32> to vector<1x32x8xf32>
    %92 = vector.shape_cast %91 : vector<1x32x8xf32> to vector<32x8xf32>
    %93 = tpu.concatenate %86, %88, %90, %92 in 1 : vector<32x8xf32>, vector<32x8xf32>, vector<32x8xf32>, vector<32x8xf32> -> vector<32x32xf32>
    %94 = arith.addf %1, %93 : vector<32x32xf32>
    %95 = vector.extract_strided_slice %5 {offsets = [0, 0], sizes = [1, 32], strides = [1, 1]} : vector<4x32xf32> to vector<1x32xf32>
    %96 = vector.extract_strided_slice %5 {offsets = [1, 0], sizes = [1, 32], strides = [1, 1]} : vector<4x32xf32> to vector<1x32xf32>
    %cst_26 = arith.constant dense<0.000000e+00> : vector<32xf32>
    %97 = vector.multi_reduction <add>, %94, %cst_26 [1] : vector<32x32xf32> to vector<32xf32>
    %98 = vector.shape_cast %97 : vector<32xf32> to vector<32x1xf32>
    %cst_27 = arith.constant 3.200000e+01 : f32
    %99 = vector.broadcast %cst_27 : f32 to vector<32x1xf32>
    %100 = arith.divf %98, %99 : vector<32x1xf32>
    %101 = vector.broadcast %100 : vector<32x1xf32> to vector<32x32xf32>
    %102 = arith.subf %94, %101 : vector<32x32xf32>
    %103 = arith.mulf %102, %102 : vector<32x32xf32>
    %cst_28 = arith.constant dense<0.000000e+00> : vector<32xf32>
    %104 = vector.multi_reduction <add>, %103, %cst_28 [1] : vector<32x32xf32> to vector<32xf32>
    %105 = vector.shape_cast %104 : vector<32xf32> to vector<32x1xf32>
    %cst_29 = arith.constant 0.0322580636 : f32
    %106 = vector.broadcast %cst_29 : f32 to vector<32x1xf32>
    %107 = arith.mulf %105, %106 : vector<32x1xf32>
    %108 = math.sqrt %107 : vector<32x1xf32>
    %cst_30 = arith.constant 9.99999997E-7 : f32
    %109 = vector.broadcast %cst_30 : f32 to vector<32x1xf32>
    %110 = arith.addf %108, %109 : vector<32x1xf32>
    %111 = tpu.reciprocal %110 {approx = true} : vector<32x1xf32> -> vector<32x1xf32>
    %112 = vector.broadcast %95 : vector<1x32xf32> to vector<32x32xf32>
    %113 = arith.mulf %112, %102 : vector<32x32xf32>
    %114 = vector.broadcast %111 : vector<32x1xf32> to vector<32x32xf32>
    %115 = arith.mulf %113, %114 : vector<32x32xf32>
    %116 = vector.broadcast %96 : vector<1x32xf32> to vector<32x32xf32>
    %117 = arith.addf %115, %116 : vector<32x32xf32>
    %118 = arith.truncf %117 : vector<32x32xf32> to vector<32x32xbf16>
    %c0_31 = arith.constant 0 : index
    %c0_32 = arith.constant 0 : index
    %c0_33 = arith.constant 0 : index
    %119 = vector.load %arg7[%c0_31, %c0_32, %c0_33] : memref<2x32x64xbf16, #tpu.memory_space<vmem>>, vector<1x32x64xbf16>
    %120 = vector.shape_cast %119 : vector<1x32x64xbf16> to vector<32x64xbf16>
    %cst_34 = arith.constant dense<0.000000e+00> : vector<32x64xf32>
    %121 = tpu.matmul %118, %120, %cst_34 {dimension_numbers = #tpu.dot_dimension_numbers<[1], [0], [0], [1], [0, 0, 1, 1], [], []>} : vector<32x32xbf16>, vector<32x64xbf16>, vector<32x64xf32> -> vector<32x64xf32>
    %c0_35 = arith.constant 0 : index
    %c0_36 = arith.constant 0 : index
    %c0_37 = arith.constant 0 : index
    %122 = vector.load %arg8[%c0_35, %c0_36, %c0_37] : memref<2x1x64xf32, #tpu.memory_space<vmem>>, vector<1x1x64xf32>
    %123 = vector.shape_cast %122 : vector<1x1x64xf32> to vector<1x64xf32>
    %124 = vector.broadcast %123 : vector<1x64xf32> to vector<32x64xf32>
    %125 = arith.addf %121, %124 : vector<32x64xf32>
    %cst_38 = arith.constant 0.000000e+00 : f32
    %126 = vector.broadcast %cst_38 : f32 to vector<32x64xf32>
    %127 = arith.maximumf %125, %126 : vector<32x64xf32>
    %128 = arith.truncf %127 : vector<32x64xf32> to vector<32x64xbf16>
    %c0_39 = arith.constant 0 : index
    %c0_40 = arith.constant 0 : index
    %c0_41 = arith.constant 0 : index
    %129 = vector.load %arg9[%c0_39, %c0_40, %c0_41] : memref<2x64x32xbf16, #tpu.memory_space<vmem>>, vector<1x64x32xbf16>
    %130 = vector.shape_cast %129 : vector<1x64x32xbf16> to vector<64x32xbf16>
    %cst_42 = arith.constant dense<0.000000e+00> : vector<32x32xf32>
    %131 = tpu.matmul %128, %130, %cst_42 {dimension_numbers = #tpu.dot_dimension_numbers<[1], [0], [0], [1], [0, 0, 1, 1], [], []>} : vector<32x64xbf16>, vector<64x32xbf16>, vector<32x32xf32> -> vector<32x32xf32>
    %c0_43 = arith.constant 0 : index
    %c0_44 = arith.constant 0 : index
    %c0_45 = arith.constant 0 : index
    %132 = vector.load %arg10[%c0_43, %c0_44, %c0_45] : memref<2x1x32xf32, #tpu.memory_space<vmem>>, vector<1x1x32xf32>
    %133 = vector.shape_cast %132 : vector<1x1x32xf32> to vector<1x32xf32>
    %134 = vector.broadcast %133 : vector<1x32xf32> to vector<32x32xf32>
    %135 = arith.addf %131, %134 : vector<32x32xf32>
    %136 = arith.addf %117, %135 : vector<32x32xf32>
    %137 = vector.extract_strided_slice %5 {offsets = [2, 0], sizes = [1, 32], strides = [1, 1]} : vector<4x32xf32> to vector<1x32xf32>
    %138 = vector.extract_strided_slice %5 {offsets = [3, 0], sizes = [1, 32], strides = [1, 1]} : vector<4x32xf32> to vector<1x32xf32>
    %cst_46 = arith.constant dense<0.000000e+00> : vector<32xf32>
    %139 = vector.multi_reduction <add>, %136, %cst_46 [1] : vector<32x32xf32> to vector<32xf32>
    %140 = vector.shape_cast %139 : vector<32xf32> to vector<32x1xf32>
    %cst_47 = arith.constant 3.200000e+01 : f32
    %141 = vector.broadcast %cst_47 : f32 to vector<32x1xf32>
    %142 = arith.divf %140, %141 : vector<32x1xf32>
    %143 = vector.broadcast %142 : vector<32x1xf32> to vector<32x32xf32>
    %144 = arith.subf %136, %143 : vector<32x32xf32>
    %145 = arith.mulf %144, %144 : vector<32x32xf32>
    %cst_48 = arith.constant dense<0.000000e+00> : vector<32xf32>
    %146 = vector.multi_reduction <add>, %145, %cst_48 [1] : vector<32x32xf32> to vector<32xf32>
    %147 = vector.shape_cast %146 : vector<32xf32> to vector<32x1xf32>
    %cst_49 = arith.constant 0.0322580636 : f32
    %148 = vector.broadcast %cst_49 : f32 to vector<32x1xf32>
    %149 = arith.mulf %147, %148 : vector<32x1xf32>
    %150 = math.sqrt %149 : vector<32x1xf32>
    %cst_50 = arith.constant 9.99999997E-7 : f32
    %151 = vector.broadcast %cst_50 : f32 to vector<32x1xf32>
    %152 = arith.addf %150, %151 : vector<32x1xf32>
    %153 = tpu.reciprocal %152 {approx = true} : vector<32x1xf32> -> vector<32x1xf32>
    %154 = vector.broadcast %137 : vector<1x32xf32> to vector<32x32xf32>
    %155 = arith.mulf %154, %144 : vector<32x32xf32>
    %156 = vector.broadcast %153 : vector<32x1xf32> to vector<32x32xf32>
    %157 = arith.mulf %155, %156 : vector<32x32xf32>
    %158 = vector.broadcast %138 : vector<1x32xf32> to vector<32x32xf32>
    %159 = arith.addf %157, %158 : vector<32x32xf32>
    %c1 = arith.constant 1 : index
    %c0_51 = arith.constant 0 : index
    %c0_52 = arith.constant 0 : index
    %160 = vector.load %arg11[%c1, %c0_51, %c0_52] : memref<2x4x32xf32, #tpu.memory_space<vmem>>, vector<1x4x32xf32>
    %161 = vector.shape_cast %160 : vector<1x4x32xf32> to vector<4x32xf32>
    %162 = arith.truncf %159 : vector<32x32xf32> to vector<32x32xbf16>
    %c1_53 = arith.constant 1 : index
    %c0_54 = arith.constant 0 : index
    %c0_55 = arith.constant 0 : index
    %163 = vector.load %arg3[%c1_53, %c0_54, %c0_55] : memref<2x32x128xbf16, #tpu.memory_space<vmem>>, vector<1x32x128xbf16>
    %164 = vector.shape_cast %163 : vector<1x32x128xbf16> to vector<32x128xbf16>
    %cst_56 = arith.constant dense<0.000000e+00> : vector<32x128xf32>
    %165 = tpu.matmul %162, %164, %cst_56 {dimension_numbers = #tpu.dot_dimension_numbers<[1], [0], [0], [1], [0, 0, 1, 1], [], []>} : vector<32x32xbf16>, vector<32x128xbf16>, vector<32x128xf32> -> vector<32x128xf32>
    %c1_57 = arith.constant 1 : index
    %c0_58 = arith.constant 0 : index
    %c0_59 = arith.constant 0 : index
    %166 = vector.load %arg4[%c1_57, %c0_58, %c0_59] : memref<2x1x128xf32, #tpu.memory_space<vmem>>, vector<1x1x128xf32>
    %167 = vector.shape_cast %166 : vector<1x1x128xf32> to vector<1x128xf32>
    %168 = vector.broadcast %167 : vector<1x128xf32> to vector<32x128xf32>
    %169 = arith.addf %165, %168 : vector<32x128xf32>
    %170 = vector.extract_strided_slice %169 {offsets = [0, 0], sizes = [32, 32], strides = [1, 1]} : vector<32x128xf32> to vector<32x32xf32>
    %171 = vector.extract_strided_slice %169 {offsets = [0, 32], sizes = [32, 32], strides = [1, 1]} : vector<32x128xf32> to vector<32x32xf32>
    %172 = vector.extract_strided_slice %169 {offsets = [0, 64], sizes = [32, 32], strides = [1, 1]} : vector<32x128xf32> to vector<32x32xf32>
    %173 = vector.extract_strided_slice %169 {offsets = [0, 96], sizes = [32, 16], strides = [1, 1]} : vector<32x128xf32> to vector<32x16xf32>
    %174 = vector.extract_strided_slice %169 {offsets = [0, 112], sizes = [32, 16], strides = [1, 1]} : vector<32x128xf32> to vector<32x16xf32>
    %175 = arith.mulf %173, %174 : vector<32x16xf32>
    %176 = arith.truncf %175 : vector<32x16xf32> to vector<32x16xbf16>
    %c1_60 = arith.constant 1 : index
    %c0_61 = arith.constant 0 : index
    %c0_62 = arith.constant 0 : index
    %177 = vector.load %arg5[%c1_60, %c0_61, %c0_62] : memref<2x16x8xbf16, #tpu.memory_space<vmem>>, vector<1x16x8xbf16>
    %178 = vector.shape_cast %177 : vector<1x16x8xbf16> to vector<16x8xbf16>
    %cst_63 = arith.constant dense<0.000000e+00> : vector<32x8xf32>
    %179 = tpu.matmul %176, %178, %cst_63 {dimension_numbers = #tpu.dot_dimension_numbers<[1], [0], [0], [1], [0, 0, 1, 1], [], []>} : vector<32x16xbf16>, vector<16x8xbf16>, vector<32x8xf32> -> vector<32x8xf32>
    %c1_64 = arith.constant 1 : index
    %c0_65 = arith.constant 0 : index
    %c0_66 = arith.constant 0 : index
    %180 = vector.load %arg6[%c1_64, %c0_65, %c0_66] : memref<2x1x8xf32, #tpu.memory_space<vmem>>, vector<1x1x8xf32>
    %181 = vector.shape_cast %180 : vector<1x1x8xf32> to vector<1x8xf32>
    %182 = vector.broadcast %181 : vector<1x8xf32> to vector<32x8xf32>
    %183 = arith.addf %179, %182 : vector<32x8xf32>
    %184 = arith.negf %183 : vector<32x8xf32>
    %185 = math.exp %184 : vector<32x8xf32>
    %cst_67 = arith.constant 1.000000e+00 : f32
    %186 = vector.broadcast %cst_67 : f32 to vector<32x8xf32>
    %187 = arith.addf %186, %185 : vector<32x8xf32>
    %188 = arith.divf %186, %187 : vector<32x8xf32>
    %189 = vector.extract_strided_slice %188 {offsets = [0, 0], sizes = [32, 1], strides = [1, 1]} : vector<32x8xf32> to vector<32x1xf32>
    %190 = vector.broadcast %189 : vector<32x1xf32> to vector<32x32xf32>
    %191 = arith.mulf %190, %171 : vector<32x32xf32>
    %192 = vector.extract_strided_slice %188 {offsets = [0, 1], sizes = [32, 1], strides = [1, 1]} : vector<32x8xf32> to vector<32x1xf32>
    %193 = vector.broadcast %192 : vector<32x1xf32> to vector<32x32xf32>
    %194 = arith.mulf %193, %172 : vector<32x32xf32>
    %195 = vector.extract_strided_slice %194 {offsets = [0, 0], sizes = [32, 8], strides = [1, 1]} : vector<32x32xf32> to vector<32x8xf32>
    %196 = vector.extract_strided_slice %194 {offsets = [0, 8], sizes = [32, 8], strides = [1, 1]} : vector<32x32xf32> to vector<32x8xf32>
    %197 = vector.extract_strided_slice %194 {offsets = [0, 16], sizes = [32, 8], strides = [1, 1]} : vector<32x32xf32> to vector<32x8xf32>
    %198 = vector.extract_strided_slice %194 {offsets = [0, 24], sizes = [32, 8], strides = [1, 1]} : vector<32x32xf32> to vector<32x8xf32>
    %199 = vector.shape_cast %195 : vector<32x8xf32> to vector<1x32x8xf32>
    %200 = vector.shape_cast %196 : vector<32x8xf32> to vector<1x32x8xf32>
    %201 = vector.shape_cast %197 : vector<32x8xf32> to vector<1x32x8xf32>
    %202 = vector.shape_cast %198 : vector<32x8xf32> to vector<1x32x8xf32>
    %203 = tpu.concatenate %199, %200, %201, %202 in 0 : vector<1x32x8xf32>, vector<1x32x8xf32>, vector<1x32x8xf32>, vector<1x32x8xf32> -> vector<4x32x8xf32>
    %204 = vector.extract_strided_slice %191 {offsets = [0, 0], sizes = [32, 8], strides = [1, 1]} : vector<32x32xf32> to vector<32x8xf32>
    %205 = vector.extract_strided_slice %191 {offsets = [0, 8], sizes = [32, 8], strides = [1, 1]} : vector<32x32xf32> to vector<32x8xf32>
    %206 = vector.extract_strided_slice %191 {offsets = [0, 16], sizes = [32, 8], strides = [1, 1]} : vector<32x32xf32> to vector<32x8xf32>
    %207 = vector.extract_strided_slice %191 {offsets = [0, 24], sizes = [32, 8], strides = [1, 1]} : vector<32x32xf32> to vector<32x8xf32>
    %208 = vector.shape_cast %204 : vector<32x8xf32> to vector<1x32x8xf32>
    %209 = vector.shape_cast %205 : vector<32x8xf32> to vector<1x32x8xf32>
    %210 = vector.shape_cast %206 : vector<32x8xf32> to vector<1x32x8xf32>
    %211 = vector.shape_cast %207 : vector<32x8xf32> to vector<1x32x8xf32>
    %212 = tpu.concatenate %208, %209, %210, %211 in 0 : vector<1x32x8xf32>, vector<1x32x8xf32>, vector<1x32x8xf32>, vector<1x32x8xf32> -> vector<4x32x8xf32>
    %213 = vector.extract_strided_slice %170 {offsets = [0, 0], sizes = [32, 8], strides = [1, 1]} : vector<32x32xf32> to vector<32x8xf32>
    %214 = vector.extract_strided_slice %170 {offsets = [0, 8], sizes = [32, 8], strides = [1, 1]} : vector<32x32xf32> to vector<32x8xf32>
    %215 = vector.extract_strided_slice %170 {offsets = [0, 16], sizes = [32, 8], strides = [1, 1]} : vector<32x32xf32> to vector<32x8xf32>
    %216 = vector.extract_strided_slice %170 {offsets = [0, 24], sizes = [32, 8], strides = [1, 1]} : vector<32x32xf32> to vector<32x8xf32>
    %217 = vector.shape_cast %213 : vector<32x8xf32> to vector<1x32x8xf32>
    %218 = vector.shape_cast %214 : vector<32x8xf32> to vector<1x32x8xf32>
    %219 = vector.shape_cast %215 : vector<32x8xf32> to vector<1x32x8xf32>
    %220 = vector.shape_cast %216 : vector<32x8xf32> to vector<1x32x8xf32>
    %221 = tpu.concatenate %217, %218, %219, %220 in 0 : vector<1x32x8xf32>, vector<1x32x8xf32>, vector<1x32x8xf32>, vector<1x32x8xf32> -> vector<4x32x8xf32>
    %222 = arith.truncf %203 : vector<4x32x8xf32> to vector<4x32x8xbf16>
    %223 = arith.truncf %212 : vector<4x32x8xf32> to vector<4x32x8xbf16>
    "tpu.trace_start"() <{level = 10 : i32, message = "hqd,hkd->hqk"}> : () -> ()
    %cst_68 = arith.constant dense<0.000000e+00> : vector<4x32x32xf32>
    %224 = tpu.matmul %222, %223, %cst_68 {dimension_numbers = #tpu.dot_dimension_numbers<[2], [2], [1], [1], [0, 0, 0, 1, 1, 1], [0], [0]>} : vector<4x32x8xbf16>, vector<4x32x8xbf16>, vector<4x32x32xf32> -> vector<4x32x32xf32>
    "tpu.trace_stop"() : () -> ()
    %225 = vector.shape_cast %3 : vector<32x32xf32> to vector<1x32x32xf32>
    %226 = vector.broadcast %225 : vector<1x32x32xf32> to vector<4x32x32xf32>
    %227 = arith.addf %224, %226 : vector<4x32x32xf32>
    %cst_69 = arith.constant dense<0xFF800000> : vector<4x32xf32>
    %228 = vector.multi_reduction <maximumf>, %227, %cst_69 [2] : vector<4x32x32xf32> to vector<4x32xf32>
    %229 = vector.shape_cast %228 : vector<4x32xf32> to vector<4x32x1xf32>
    %230 = vector.broadcast %229 : vector<4x32x1xf32> to vector<4x32x32xf32>
    %231 = arith.subf %227, %230 : vector<4x32x32xf32>
    %232 = math.exp %231 : vector<4x32x32xf32>
    %cst_70 = arith.constant dense<0.000000e+00> : vector<4x32xf32>
    %233 = vector.multi_reduction <add>, %232, %cst_70 [2] : vector<4x32x32xf32> to vector<4x32xf32>
    %234 = vector.shape_cast %233 : vector<4x32xf32> to vector<4x32x1xf32>
    %235 = tpu.reciprocal %234 {approx = true} : vector<4x32x1xf32> -> vector<4x32x1xf32>
    %236 = vector.broadcast %235 : vector<4x32x1xf32> to vector<4x32x32xf32>
    %237 = arith.mulf %232, %236 : vector<4x32x32xf32>
    %238 = arith.truncf %237 : vector<4x32x32xf32> to vector<4x32x32xbf16>
    %239 = arith.truncf %221 : vector<4x32x8xf32> to vector<4x32x8xbf16>
    "tpu.trace_start"() <{level = 10 : i32, message = "hqk,hkd->hqd"}> : () -> ()
    %cst_71 = arith.constant dense<0.000000e+00> : vector<4x32x8xf32>
    %240 = tpu.matmul %238, %239, %cst_71 {dimension_numbers = #tpu.dot_dimension_numbers<[2], [1], [1], [2], [0, 0, 0, 1, 1, 2], [0], [0]>} : vector<4x32x32xbf16>, vector<4x32x8xbf16>, vector<4x32x8xf32> -> vector<4x32x8xf32>
    "tpu.trace_stop"() : () -> ()
    %241 = vector.extract_strided_slice %240 {offsets = [0, 0, 0], sizes = [1, 32, 8], strides = [1, 1, 1]} : vector<4x32x8xf32> to vector<1x32x8xf32>
    %242 = vector.shape_cast %241 : vector<1x32x8xf32> to vector<32x8xf32>
    %243 = vector.extract_strided_slice %240 {offsets = [1, 0, 0], sizes = [1, 32, 8], strides = [1, 1, 1]} : vector<4x32x8xf32> to vector<1x32x8xf32>
    %244 = vector.shape_cast %243 : vector<1x32x8xf32> to vector<32x8xf32>
    %245 = vector.extract_strided_slice %240 {offsets = [2, 0, 0], sizes = [1, 32, 8], strides = [1, 1, 1]} : vector<4x32x8xf32> to vector<1x32x8xf32>
    %246 = vector.shape_cast %245 : vector<1x32x8xf32> to vector<32x8xf32>
    %247 = vector.extract_strided_slice %240 {offsets = [3, 0, 0], sizes = [1, 32, 8], strides = [1, 1, 1]} : vector<4x32x8xf32> to vector<1x32x8xf32>
    %248 = vector.shape_cast %247 : vector<1x32x8xf32> to vector<32x8xf32>
    %249 = tpu.concatenate %242, %244, %246, %248 in 1 : vector<32x8xf32>, vector<32x8xf32>, vector<32x8xf32>, vector<32x8xf32> -> vector<32x32xf32>
    %250 = arith.addf %159, %249 : vector<32x32xf32>
    %251 = vector.extract_strided_slice %161 {offsets = [0, 0], sizes = [1, 32], strides = [1, 1]} : vector<4x32xf32> to vector<1x32xf32>
    %252 = vector.extract_strided_slice %161 {offsets = [1, 0], sizes = [1, 32], strides = [1, 1]} : vector<4x32xf32> to vector<1x32xf32>
    %cst_72 = arith.constant dense<0.000000e+00> : vector<32xf32>
    %253 = vector.multi_reduction <add>, %250, %cst_72 [1] : vector<32x32xf32> to vector<32xf32>
    %254 = vector.shape_cast %253 : vector<32xf32> to vector<32x1xf32>
    %cst_73 = arith.constant 3.200000e+01 : f32
    %255 = vector.broadcast %cst_73 : f32 to vector<32x1xf32>
    %256 = arith.divf %254, %255 : vector<32x1xf32>
    %257 = vector.broadcast %256 : vector<32x1xf32> to vector<32x32xf32>
    %258 = arith.subf %250, %257 : vector<32x32xf32>
    %259 = arith.mulf %258, %258 : vector<32x32xf32>
    %cst_74 = arith.constant dense<0.000000e+00> : vector<32xf32>
    %260 = vector.multi_reduction <add>, %259, %cst_74 [1] : vector<32x32xf32> to vector<32xf32>
    %261 = vector.shape_cast %260 : vector<32xf32> to vector<32x1xf32>
    %cst_75 = arith.constant 0.0322580636 : f32
    %262 = vector.broadcast %cst_75 : f32 to vector<32x1xf32>
    %263 = arith.mulf %261, %262 : vector<32x1xf32>
    %264 = math.sqrt %263 : vector<32x1xf32>
    %cst_76 = arith.constant 9.99999997E-7 : f32
    %265 = vector.broadcast %cst_76 : f32 to vector<32x1xf32>
    %266 = arith.addf %264, %265 : vector<32x1xf32>
    %267 = tpu.reciprocal %266 {approx = true} : vector<32x1xf32> -> vector<32x1xf32>
    %268 = vector.broadcast %251 : vector<1x32xf32> to vector<32x32xf32>
    %269 = arith.mulf %268, %258 : vector<32x32xf32>
    %270 = vector.broadcast %267 : vector<32x1xf32> to vector<32x32xf32>
    %271 = arith.mulf %269, %270 : vector<32x32xf32>
    %272 = vector.broadcast %252 : vector<1x32xf32> to vector<32x32xf32>
    %273 = arith.addf %271, %272 : vector<32x32xf32>
    %274 = arith.truncf %273 : vector<32x32xf32> to vector<32x32xbf16>
    %c1_77 = arith.constant 1 : index
    %c0_78 = arith.constant 0 : index
    %c0_79 = arith.constant 0 : index
    %275 = vector.load %arg7[%c1_77, %c0_78, %c0_79] : memref<2x32x64xbf16, #tpu.memory_space<vmem>>, vector<1x32x64xbf16>
    %276 = vector.shape_cast %275 : vector<1x32x64xbf16> to vector<32x64xbf16>
    %cst_80 = arith.constant dense<0.000000e+00> : vector<32x64xf32>
    %277 = tpu.matmul %274, %276, %cst_80 {dimension_numbers = #tpu.dot_dimension_numbers<[1], [0], [0], [1], [0, 0, 1, 1], [], []>} : vector<32x32xbf16>, vector<32x64xbf16>, vector<32x64xf32> -> vector<32x64xf32>
    %c1_81 = arith.constant 1 : index
    %c0_82 = arith.constant 0 : index
    %c0_83 = arith.constant 0 : index
    %278 = vector.load %arg8[%c1_81, %c0_82, %c0_83] : memref<2x1x64xf32, #tpu.memory_space<vmem>>, vector<1x1x64xf32>
    %279 = vector.shape_cast %278 : vector<1x1x64xf32> to vector<1x64xf32>
    %280 = vector.broadcast %279 : vector<1x64xf32> to vector<32x64xf32>
    %281 = arith.addf %277, %280 : vector<32x64xf32>
    %cst_84 = arith.constant 0.000000e+00 : f32
    %282 = vector.broadcast %cst_84 : f32 to vector<32x64xf32>
    %283 = arith.maximumf %281, %282 : vector<32x64xf32>
    %284 = arith.truncf %283 : vector<32x64xf32> to vector<32x64xbf16>
    %c1_85 = arith.constant 1 : index
    %c0_86 = arith.constant 0 : index
    %c0_87 = arith.constant 0 : index
    %285 = vector.load %arg9[%c1_85, %c0_86, %c0_87] : memref<2x64x32xbf16, #tpu.memory_space<vmem>>, vector<1x64x32xbf16>
    %286 = vector.shape_cast %285 : vector<1x64x32xbf16> to vector<64x32xbf16>
    %cst_88 = arith.constant dense<0.000000e+00> : vector<32x32xf32>
    %287 = tpu.matmul %284, %286, %cst_88 {dimension_numbers = #tpu.dot_dimension_numbers<[1], [0], [0], [1], [0, 0, 1, 1], [], []>} : vector<32x64xbf16>, vector<64x32xbf16>, vector<32x32xf32> -> vector<32x32xf32>
    %c1_89 = arith.constant 1 : index
    %c0_90 = arith.constant 0 : index
    %c0_91 = arith.constant 0 : index
    %288 = vector.load %arg10[%c1_89, %c0_90, %c0_91] : memref<2x1x32xf32, #tpu.memory_space<vmem>>, vector<1x1x32xf32>
    %289 = vector.shape_cast %288 : vector<1x1x32xf32> to vector<1x32xf32>
    %290 = vector.broadcast %289 : vector<1x32xf32> to vector<32x32xf32>
    %291 = arith.addf %287, %290 : vector<32x32xf32>
    %292 = arith.addf %273, %291 : vector<32x32xf32>
    %293 = vector.extract_strided_slice %161 {offsets = [2, 0], sizes = [1, 32], strides = [1, 1]} : vector<4x32xf32> to vector<1x32xf32>
    %294 = vector.extract_strided_slice %161 {offsets = [3, 0], sizes = [1, 32], strides = [1, 1]} : vector<4x32xf32> to vector<1x32xf32>
    %cst_92 = arith.constant dense<0.000000e+00> : vector<32xf32>
    %295 = vector.multi_reduction <add>, %292, %cst_92 [1] : vector<32x32xf32> to vector<32xf32>
    %296 = vector.shape_cast %295 : vector<32xf32> to vector<32x1xf32>
    %cst_93 = arith.constant 3.200000e+01 : f32
    %297 = vector.broadcast %cst_93 : f32 to vector<32x1xf32>
    %298 = arith.divf %296, %297 : vector<32x1xf32>
    %299 = vector.broadcast %298 : vector<32x1xf32> to vector<32x32xf32>
    %300 = arith.subf %292, %299 : vector<32x32xf32>
    %301 = arith.mulf %300, %300 : vector<32x32xf32>
    %cst_94 = arith.constant dense<0.000000e+00> : vector<32xf32>
    %302 = vector.multi_reduction <add>, %301, %cst_94 [1] : vector<32x32xf32> to vector<32xf32>
    %303 = vector.shape_cast %302 : vector<32xf32> to vector<32x1xf32>
    %cst_95 = arith.constant 0.0322580636 : f32
    %304 = vector.broadcast %cst_95 : f32 to vector<32x1xf32>
    %305 = arith.mulf %303, %304 : vector<32x1xf32>
    %306 = math.sqrt %305 : vector<32x1xf32>
    %cst_96 = arith.constant 9.99999997E-7 : f32
    %307 = vector.broadcast %cst_96 : f32 to vector<32x1xf32>
    %308 = arith.addf %306, %307 : vector<32x1xf32>
    %309 = tpu.reciprocal %308 {approx = true} : vector<32x1xf32> -> vector<32x1xf32>
    %310 = vector.broadcast %293 : vector<1x32xf32> to vector<32x32xf32>
    %311 = arith.mulf %310, %300 : vector<32x32xf32>
    %312 = vector.broadcast %309 : vector<32x1xf32> to vector<32x32xf32>
    %313 = arith.mulf %311, %312 : vector<32x32xf32>
    %314 = vector.broadcast %294 : vector<1x32xf32> to vector<32x32xf32>
    %315 = arith.addf %313, %314 : vector<32x32xf32>
    %c0_97 = arith.constant 0 : index
    %c0_98 = arith.constant 0 : index
    %c0_99 = arith.constant 0 : index
    %316 = vector.load %arg12[%c0_97, %c0_98, %c0_99] : memref<1x32x32xf32, #tpu.memory_space<vmem>>, vector<1x32x32xf32>
    %317 = vector.shape_cast %316 : vector<1x32x32xf32> to vector<32x32xf32>
    %318 = vector.shape_cast %315 : vector<32x32xf32> to vector<1x32x32xf32>
    tpu.vector_store %arg12[%c0_97, %c0_98, %c0_99], %318 {strides = array<i32>} : memref<1x32x32xf32, #tpu.memory_space<vmem>>, vector<1x32x32xf32>,
    return
  }
  func.func @transform_0(%arg0: i32) -> (i32, i32, i32) {
    %c0_i32 = arith.constant 0 : i32
    %c0_i32_0 = arith.constant 0 : i32
    %c0_i32_1 = arith.constant 0 : i32
    return %arg0, %c0_i32, %c0_i32_0 : i32, i32, i32
  }
  func.func @transform_1(%arg0: i32) -> (i32, i32, i32) {
    %c0_i32 = arith.constant 0 : i32
    %c0_i32_0 = arith.constant 0 : i32
    %c0_i32_1 = arith.constant 0 : i32
    return %arg0, %c0_i32, %c0_i32_0 : i32, i32, i32
  }
  func.func @transform_2(%arg0: i32) -> (i32, i32, i32) {
    %c0_i32 = arith.constant 0 : i32
    %c0_i32_0 = arith.constant 0 : i32
    %c0_i32_1 = arith.constant 0 : i32
    %c0_i32_2 = arith.constant 0 : i32
    return %c0_i32, %c0_i32_0, %c0_i32_1 : i32, i32, i32
  }
  func.func @transform_3(%arg0: i32) -> (i32, i32, i32) {
    %c0_i32 = arith.constant 0 : i32
    %c0_i32_0 = arith.constant 0 : i32
    %c0_i32_1 = arith.constant 0 : i32
    %c0_i32_2 = arith.constant 0 : i32
    return %c0_i32, %c0_i32_0, %c0_i32_1 : i32, i32, i32
  }
  func.func @transform_4(%arg0: i32) -> (i32, i32, i32) {
    %c0_i32 = arith.constant 0 : i32
    %c0_i32_0 = arith.constant 0 : i32
    %c0_i32_1 = arith.constant 0 : i32
    %c0_i32_2 = arith.constant 0 : i32
    return %c0_i32, %c0_i32_0, %c0_i32_1 : i32, i32, i32
  }
  func.func @transform_5(%arg0: i32) -> (i32, i32, i32) {
    %c0_i32 = arith.constant 0 : i32
    %c0_i32_0 = arith.constant 0 : i32
    %c0_i32_1 = arith.constant 0 : i32
    %c0_i32_2 = arith.constant 0 : i32
    return %c0_i32, %c0_i32_0, %c0_i32_1 : i32, i32, i32
  }
  func.func @transform_6(%arg0: i32) -> (i32, i32, i32) {
    %c0_i32 = arith.constant 0 : i32
    %c0_i32_0 = arith.constant 0 : i32
    %c0_i32_1 = arith.constant 0 : i32
    %c0_i32_2 = arith.constant 0 : i32
    return %c0_i32, %c0_i32_0, %c0_i32_1 : i32, i32, i32
  }
  func.func @transform_7(%arg0: i32) -> (i32, i32, i32) {
    %c0_i32 = arith.constant 0 : i32
    %c0_i32_0 = arith.constant 0 : i32
    %c0_i32_1 = arith.constant 0 : i32
    %c0_i32_2 = arith.constant 0 : i32
    return %c0_i32, %c0_i32_0, %c0_i32_1 : i32, i32, i32
  }
  func.func @transform_8(%arg0: i32) -> (i32, i32, i32) {
    %c0_i32 = arith.constant 0 : i32
    %c0_i32_0 = arith.constant 0 : i32
    %c0_i32_1 = arith.constant 0 : i32
    %c0_i32_2 = arith.constant 0 : i32
    return %c0_i32, %c0_i32_0, %c0_i32_1 : i32, i32, i32
  }
  func.func @transform_9(%arg0: i32) -> (i32, i32, i32) {
    %c0_i32 = arith.constant 0 : i32
    %c0_i32_0 = arith.constant 0 : i32
    %c0_i32_1 = arith.constant 0 : i32
    %c0_i32_2 = arith.constant 0 : i32
    return %c0_i32, %c0_i32_0, %c0_i32_1 : i32, i32, i32
  }
  func.func @transform_10(%arg0: i32) -> (i32, i32, i32) {
    %c0_i32 = arith.constant 0 : i32
    %c0_i32_0 = arith.constant 0 : i32
    %c0_i32_1 = arith.constant 0 : i32
    %c0_i32_2 = arith.constant 0 : i32
    return %c0_i32, %c0_i32_0, %c0_i32_1 : i32, i32, i32
  }
  func.func @transform_11(%arg0: i32) -> (i32, i32, i32) {
    %c0_i32 = arith.constant 0 : i32
    %c0_i32_0 = arith.constant 0 : i32
    %c0_i32_1 = arith.constant 0 : i32
    return %arg0, %c0_i32, %c0_i32_0 : i32, i32, i32
  }
}

</mosaic_0001>

<bundles_post_ra>
// kernel: fu_forward.1
= control target key start
LH: loop header
LB: loop body
LE: loop exit
PB: predicated region body
PF: predicated region fallthrough
CT: control target
= control target key end

     0   :  { %vm74_vm0 = vcmask 261120   ;;  %s4999_s0 = inlined_call_operand.vmem [shape: f32[1,32,32], index: 0, kind: input, shape index: {}]   ;;  %s5000_s1 = inlined_call_operand.vmem [shape: f32[1,32,32], index: 1, kind: input, shape index: {}]   ;;  %s5001_s2 = inlined_call_operand.vmem [shape: bf16[2,32,128], index: 2, kind: input, shape index: {}]   ;;  %s5002_s3 = inlined_call_operand.vmem [shape: f32[2,1,128], index: 3, kind: input, shape index: {}]   ;;  %s5003_s4 = inlined_call_operand.vmem [shape: bf16[2,16,8], index: 4, kind: input, shape index: {}]   ;;  %s5004_s5 = inlined_call_operand.vmem [shape: f32[2,1,8], index: 5, kind: input, shape index: {}]   ;;  %s5005_s6 = inlined_call_operand.vmem [shape: bf16[2,32,64], index: 6, kind: input, shape index: {}]   ;;  %s5006_s7 = inlined_call_operand.vmem [shape: f32[2,1,64], index: 7, kind: input, shape index: {}]   ;;  %s5007_s8 = inlined_call_operand.vmem [shape: bf16[2,64,32], index: 8, kind: input, shape index: {}]   ;;  %s5008_s9 = inlined_call_operand.vmem [shape: f32[2,1,32], index: 9, kind: input, shape index: {}]   ;;  %s5009_s10 = inlined_call_operand.vmem [shape: f32[2,4,32], index: 10, kind: input, shape index: {}]   ;;  %s5010_s11 = inlined_call_operand.hbm [shape: f32[1,32,32], index: 11, kind: output, shape index: {}]  }
   0x1   :  { %v3701_v0 = vld [vmem:[%s5001_s2] sm:$0xff]   ;;  %v3702_v1 = vld [vmem:[%s5001_s2 + $0x8] sm:$0xff]   ;;  %v42_v4 = vld [vmem:[%s4999_s0 + $0x10] sm:$0xff] }
   0x2   :  { %3308 = vmatprep.subr.bf16.mxu0 %v3701_v0  ;;  %v40_v2 = vld [vmem:[%s4999_s0] sm:$0xff]  ;;  %v41_v3 = vld [vmem:[%s4999_s0 + $0x8] sm:$0xff]  ;;  %v43_v6 = vld [vmem:[%s4999_s0 + $0x18] sm:$0xff] }
   0x3   :  { %3309 = vmatpush3.bf16.msra.mxu0 %v3701_v0  ;;  %v49_v5 = vpack.c.bf16 %v41_v3, %v40_v2  ;;  %v50_v7 = vpack.c.bf16 %v43_v6, %v42_v4 }
   0x4   :  { %3310 = vmatprep.subr.bf16.mxu0 %v3702_v1 }
   0x5   :  { %3312 = vmatprep.mubr.msk.bf16.mxu0 %vm74_vm0, %v49_v5 }
   0x7   :  { %3311 = vmatpush3.bf16.msra.mxu0 %v3702_v1 }
   0xa   :  { %3313 = vmatmul.mubr.msk.bf16.vlgmr.msra.gmra.mrb[0].mxu0 %vm74_vm0, %v50_v7 }
   0xb   :  { %16 = vsyncpa [#allocation3], 0  ;;  %v3105_v8 = vld [vmem:[%s5002_s3] ss:$0 sm:$0xff]  ;;  %s3975_s14 = smov 112   ;;  %s3976_s15 = smov 32  }
   0xc   :  { %v3703_v9 = vld [vmem:[%s5003_s4] sm:$0xff]   ;;  %vm173_vm1 = vcmask 130048   ;;  %v3977_v30 = vmov 0   ;;  %v3978_v56 = vmov 1   ;;  %s3979_s18 = smov 120   ;;  %s3980_s19 = smov 104  }
   0xd   :  { %3316 = vmatprep.subr.bf16.mxu0 %v3703_v9  ;;  %3533 = vset.pattern.permute.xlu0 %v3977_v30  ;;  %v3110_v31 = vld [vmem:[%s5004_s5] ss:$0 sm:$0xff]  ;;  %s3981_s20 = smov 96   ;;  %s3982_s21 = smov 64   ;;  %vm429_vm2 = vcmask 64512   ;;  %vm1178_vm3 = vcmask 195584  }
   0xe   :  { %3317 = vmatpush3.bf16.msra.mxu0 %v3703_v9  ;;  %3534 = vset.pattern.permute.xlu1 %v3977_v30  ;;  %s3983_s30 = smov 8   ;;  %s3984_s12 = smov 16   ;;  %vm1409_vm12 = vcmask 523264  }
   0xf   :  { %s3985_s13 = smov 24  }
  0xdd   :  { %v3314_v10 = vpop.f32.mrb[0].mxu0 }
  0xde   :  { %v4074_v11 = vadd.f32 %v3314_v10, %v3105_v8  ;;  %v115_v12 = vpop.f32.mrb[1].mxu0 }
  0xdf   :  { %v4076_v13 = vadd.f32 %v3105_v8, %v115_v12  ;;  %v3315_v14 = vpop.f32.mrb[2].mxu0 }
  0xe0   :  { %138 = vrot.lane.b32.xlu1 %v4074_v11, %s3975_s14  ;;  %v118_v15 = vpop.f32.mrb[3].mxu0  ;;  %v4082_v16 = vadd.f32 %v3315_v14, %v3105_v8 }
  0xe1   :  { %134 = vrot.lane.b32.xlu0 %v4076_v13, %s3975_s14  ;;  %v4084_v17 = vadd.f32 %v3105_v8, %v118_v15 }
  0xe4   :  { %140 = vrot.lane.b32.xlu1 %v4082_v16, %s3975_s14 }
  0xe5   :  { %136 = vrot.lane.b32.xlu0 %v4084_v17, %s3975_s14 }
 0x152   :  { %v4090_v18 = vpop.permute.xlu1 %138 }
 0x153   :  { %v4092_v19 = vpop.permute.xlu0 %134  ;;  %v148_v21 = vmul.f32 %v4090_v18, %v4074_v11 }
 0x154   :  { %v146_v24 = vmul.f32 %v4092_v19, %v4076_v13 }
 0x156   :  { %v4094_v20 = vpop.permute.xlu1 %140 }
 0x157   :  { %v149_v22 = vmul.f32 %v4094_v20, %v4082_v16  ;;  %v4100_v23 = vpop.permute.xlu0 %136 }
 0x158   :  { %v147_v25 = vmul.f32 %v4100_v23, %v4084_v17 }
 0x159   :  { %v151_v26 = vpack.c.bf16 %v149_v22, %v148_v21 }
 0x15a   :  { %v150_v27 = vpack.c.bf16 %v147_v25, %v146_v24 }
 0x15b   :  { %165 = vrot.lane.b32.xlu1 %v151_v26, %s3976_s15 }
 0x15c   :  { %163 = vrot.lane.b32.xlu0 %v150_v27, %s3976_s15 }
 0x1cd   :  { %v166_v29 = vpop.permute.xlu1 %165 }
 0x1ce   :  { %v164_v28 = vpop.permute.xlu0 %163 }
 0x1cf   :  { %3318 = vmatprep.mubr.msk.bf16.mxu0 %vm173_vm1, %v164_v28 }
 0x1d0   :  { %3319 = vmatmul.mubr.msk.bf16.vlgmr.msra.gmra.mrb[4].mxu0 %vm173_vm1, %v166_v29 }
 0x2a3   :  { %v3320_v32 = vpop.f32.mrb[4].mxu0 }
 0x2a4   :  { %v223_v33 = vadd.f32 %v3320_v32, %v3110_v31  ;;  %v214_v34 = vpop.f32.mrb[5].mxu0 }
 0x2a5   :  { %v215_v35 = vadd.f32 %v3110_v31, %v214_v34  ;;  %v3321_v36 = vpop.f32.mrb[6].mxu0 }
 0x2a6   :  { %v3116_v37 = vmul.f32 -1.442695, %v223_v33  ;;  %v226_v38 = vadd.f32 %v3321_v36, %v3110_v31  ;;  %v217_v39 = vpop.f32.mrb[7].mxu0 }
 0x2a7   :  { %v3114_v40 = vmul.f32 -1.442695, %v215_v35  ;;  %v218_v41 = vadd.f32 %v3110_v31, %v217_v39 }
 0x2a8   :  { %3719 = vpow2.f32 %v3116_v37  ;;  %v3117_v42 = vmul.f32 -1.442695, %v226_v38 }
 0x2a9   :  { %3721 = vpow2.f32 %v3114_v40  ;;  %v3115_v43 = vmul.f32 -1.442695, %v218_v41 }
 0x2aa   :  { %3723 = vpow2.f32 %v3117_v42 }
 0x2ab   :  { %3725 = vpow2.f32 %v3115_v43 }
 0x2b2   :  { %v3720_v44 = vpop.eup %3719 }
 0x2b3   :  { %v3722_v45 = vpop.eup %3721  ;;  %v243_v51 = vadd.f32 1.0, %v3720_v44 }
 0x2b4   :  { %v3724_v46 = vpop.eup %3723  ;;  %v241_v47 = vadd.f32 1.0, %v3722_v45 }
 0x2b5   :  { %v3726_v48 = vpop.eup %3725  ;;  %v244_v49 = vadd.f32 1.0, %v3724_v46 }
 0x2b6   :  { %3727 = vrcp.f32 %v241_v47  ;;  %v242_v50 = vadd.f32 1.0, %v3726_v48 }
 0x2b8   :  { %3729 = vrcp.f32 %v242_v50 }
 0x2b9   :  { %3731 = vrcp.f32 %v244_v49 }
 0x2ba   :  { %3733 = vrcp.f32 %v243_v51 }
 0x2c0   :  { %v3728_v52 = vpop.eup %3727 }
 0x2c1   :  { %255 = vperm.xlu0 %3533, %v3728_v52  }
 0x2c2   :  { %v3730_v53 = vpop.eup %3729 }
 0x2c3   :  { %260 = vperm.xlu1 %3534, %v3730_v53   ;;  %v3732_v54 = vpop.eup %3731 }
 0x2c4   :  { %v3734_v55 = vpop.eup %3733 }
 0x2c5   :  { %270 = vperm.xlu0 %3533, %v3732_v54  }
 0x2c7   :  { %265 = vperm.xlu1 %3534, %v3734_v55  }
 0x2c9   :  { %3536 = vset.pattern.permute.xlu0 %v3978_v56 }
 0x2ca   :  { %282 = vperm.xlu0 %3536, %v3730_v53  }
 0x2cb   :  { %3535 = vset.pattern.permute.xlu1 %v3978_v56 }
 0x2cc   :  { %278 = vperm.xlu1 %3535, %v3728_v52  }
 0x2ce   :  { %3617 = vset.pattern.permute.xlu0 %v3977_v30 }
 0x2d0   :  { %286 = vperm.xlu1 %3535, %v3734_v55  }
 0x2d4   :  { %290 = vperm.xlu1 %3535, %v3732_v54  }
 0x2d8   :  { %3618 = vset.pattern.permute.xlu1 %v3977_v30 }
 0x340   :  { %v256_v57 = vpop.permute.xlu0 %255 }
 0x341   :  { %v273_v59 = vmul.f32 %v256_v57, %v4076_v13 }
 0x342   :  { %v261_v58 = vpop.permute.xlu1 %260 }
 0x343   :  { %v274_v60 = vmul.f32 %v261_v58, %v4084_v17 }
 0x344   :  { %v271_v61 = vpop.permute.xlu0 %270 }
 0x345   :  { %v3537_v62 = vpack.i.bf16 %v274_v60, %v273_v59  ;;  %v276_v0 = vmul.f32 %v271_v61, %v4082_v16  ;;  %v409_v15 = vpack.c.bf16 %v274_v60, %v273_v59 }
 0x346   :  { %v266_v63 = vpop.permute.xlu1 %265 }
 0x347   :  { %v275_v1 = vmul.f32 %v266_v63, %v4074_v11  ;;  %3538 = vrot.lane.b32.xlu0 %v3537_v62, %s3979_s18 }
 0x349   :  { %v283_v2 = vpop.permute.xlu0 %282  ;;  %v3542_v3 = vpack.i.bf16 %v276_v0, %v275_v1  ;;  %v410_v21 = vpack.c.bf16 %v276_v0, %v275_v1 }
 0x34a   :  { %v294_v5 = vmul.f32 %v283_v2, %v4084_v17 }
 0x34b   :  { %v279_v4 = vpop.permute.xlu1 %278  ;;  %3548 = vrot.lane.b32.xlu0 %v3537_v62, %s3975_s14  ;;  %3543 = vrot.lane.b32.xlu1 %v3542_v3, %s3979_s18 }
 0x34c   :  { %v293_v6 = vmul.f32 %v279_v4, %v4076_v13 }
 0x34e   :  { %v3552_v7 = vpack.i.bf16 %v294_v5, %v293_v6  ;;  %v401_v22 = vpack.c.bf16 %v294_v5, %v293_v6 }
 0x34f   :  { %v287_v8 = vpop.permute.xlu1 %286  ;;  %3558 = vrot.lane.b32.xlu0 %v3537_v62, %s3980_s19 }
 0x350   :  { %3553 = vrot.lane.b32.xlu1 %v3552_v7, %s3979_s18  ;;  %v295_v10 = vmul.f32 %v287_v8, %v4074_v11 }
 0x353   :  { %v291_v9 = vpop.permute.xlu1 %290  ;;  %3568 = vrot.lane.b32.xlu0 %v3542_v3, %s3975_s14 }
 0x354   :  { %v296_v12 = vmul.f32 %v291_v9, %v4082_v16 }
 0x356   :  { %v3562_v14 = vpack.i.bf16 %v296_v12, %v295_v10  ;;  %v402_v24 = vpack.c.bf16 %v296_v12, %v295_v10 }
 0x357   :  { %3583 = vrot.lane.b32.xlu0 %v3552_v7, %s3975_s14 }
 0x358   :  { %3563 = vrot.lane.b32.xlu1 %v3562_v14, %s3979_s18 }
 0x35b   :  { %3588 = vrot.lane.b32.xlu0 %v3552_v7, %s3980_s19 }
 0x35c   :  { %3573 = vrot.lane.b32.xlu1 %v3542_v3, %s3980_s19 }
 0x35f   :  { %425 = vrot.lane.b32.xlu0 %v409_v15, %s3981_s20 }
 0x360   :  { %3578 = vrot.lane.b32.xlu1 %v3562_v14, %s3975_s14 }
 0x363   :  { %427 = vrot.lane.b32.xlu0 %v410_v21, %s3981_s20 }
 0x364   :  { %3593 = vrot.lane.b32.xlu1 %v3562_v14, %s3980_s19 }
 0x367   :  { %419 = vrot.lane.b32.xlu0 %v401_v22, %s3982_s21 }
 0x36b   :  { %421 = vrot.lane.b32.xlu0 %v402_v24, %s3982_s21 }
 0x3b9   :  { %v3539_v25 = vpop.permute.xlu0 %3538 }
 0x3ba   :  { %v3541_v26 = vunpack.i.h.bf16 %v3539_v25  ;;  %v3540_v27 = vunpack.i.l.bf16 %v3539_v25 }
 0x3bc   :  { %v411_v28 = vpack.c.bf16 %v3541_v26, %v3540_v27 }
 0x3bd   :  { %v3544_v29 = vpop.permute.xlu1 %3543  ;;  %v3549_v30 = vpop.permute.xlu0 %3548 }
 0x3be   :  { %v3546_v31 = vunpack.i.h.bf16 %v3544_v29  ;;  %v3545_v32 = vunpack.i.l.bf16 %v3544_v29  ;;  %499 = vrot.lane.b32.xlu1 %v411_v28, %s3981_s20  ;;  %v3551_v33 = vunpack.i.h.bf16 %v3549_v30  ;;  %v3550_v34 = vunpack.i.l.bf16 %v3549_v30 }
 0x3c0   :  { %v412_v35 = vpack.c.bf16 %v3546_v31, %v3545_v32  ;;  %v413_v43 = vpack.c.bf16 %v3551_v33, %v3550_v34 }
 0x3c1   :  { %v3559_v36 = vpop.permute.xlu0 %3558 }
 0x3c2   :  { %v3561_v37 = vunpack.i.h.bf16 %v3559_v36  ;;  %v3560_v38 = vunpack.i.l.bf16 %v3559_v36  ;;  %v3554_v39 = vpop.permute.xlu1 %3553  ;;  %501 = vrot.lane.b32.xlu1 %v412_v35, %s3981_s20  ;;  %v894_v36 = vpack.c.bf16 %v4084_v17, %v4076_v13 }
 0x3c3   :  { %v3556_v40 = vunpack.i.h.bf16 %v3554_v39  ;;  %v3555_v41 = vunpack.i.l.bf16 %v3554_v39 }
 0x3c4   :  { %v415_v42 = vpack.c.bf16 %v3561_v37, %v3560_v38 }
 0x3c5   :  { %v3569_v44 = vpop.permute.xlu0 %3568  ;;  %v403_v48 = vpack.c.bf16 %v3556_v40, %v3555_v41 }
 0x3c6   :  { %v3571_v45 = vunpack.i.h.bf16 %v3569_v44  ;;  %v3570_v46 = vunpack.i.l.bf16 %v3569_v44  ;;  %645 = vrot.lane.b32.xlu0 %v415_v42, %s3981_s20  ;;  %572 = vrot.lane.b32.xlu1 %v413_v43, %s3981_s20  ;;  %v895_v42 = vpack.c.bf16 %v4082_v16, %v4074_v11  ;;  %v4180_v43 = vpack.c.bf16 %v4100_v23, %v4092_v19  ;;  %v45_v19 = vld [vmem:[%s5000_s1 + $0x8] sm:$0xff] }
 0x3c8   :  { %v414_v47 = vpack.c.bf16 %v3571_v45, %v3570_v46  ;;  %v46_v45 = vld [vmem:[%s5000_s1 + $0x10] sm:$0xff] }
 0x3c9   :  { %v3584_v49 = vpop.permute.xlu0 %3583 }
 0x3ca   :  { %v3586_v50 = vunpack.i.h.bf16 %v3584_v49  ;;  %v3585_v51 = vunpack.i.l.bf16 %v3584_v49  ;;  %v3564_v52 = vpop.permute.xlu1 %3563  ;;  %574 = vrot.lane.b32.xlu0 %v414_v47, %s3981_s20  ;;  %493 = vrot.lane.b32.xlu1 %v403_v48, %s3982_s21  ;;  %v44_v47 = vld [vmem:[%s5000_s1] sm:$0xff] }
 0x3cb   :  { %v3566_v53 = vunpack.i.h.bf16 %v3564_v52  ;;  %v3565_v54 = vunpack.i.l.bf16 %v3564_v52 }
 0x3cc   :  { %v405_v55 = vpack.c.bf16 %v3586_v50, %v3585_v51 }
 0x3cd   :  { %v3589_v57 = vpop.permute.xlu0 %3588  ;;  %v404_v58 = vpack.c.bf16 %v3566_v53, %v3565_v54  ;;  %v47_v53 = vld [vmem:[%s5000_s1 + $0x18] sm:$0xff] }
 0x3ce   :  { %v3591_v59 = vunpack.i.h.bf16 %v3589_v57  ;;  %v3590_v60 = vunpack.i.l.bf16 %v3589_v57  ;;  %v3574_v61 = vpop.permute.xlu1 %3573  ;;  %566 = vrot.lane.b32.xlu0 %v405_v55, %s3982_s21 }
 0x3cf   :  { %v3576_v62 = vunpack.i.h.bf16 %v3574_v61  ;;  %v3575_v63 = vunpack.i.l.bf16 %v3574_v61  ;;  %495 = vrot.lane.b32.xlu1 %v404_v58, %s3982_s21 }
 0x3d0   :  { %v407_v0 = vpack.c.bf16 %v3591_v59, %v3590_v60 }
 0x3d1   :  { %v426_v1 = vpop.permute.xlu0 %425  ;;  %v416_v2 = vpack.c.bf16 %v3576_v62, %v3575_v63 }
 0x3d2   :  { %v3579_v3 = vpop.permute.xlu1 %3578  ;;  %3504 = vmatprep.subr.msk.bf16.mxu1 %vm429_vm2, %v426_v1  ;;  %639 = vrot.lane.b32.xlu0 %v407_v0, %s3982_s21  ;;  %v437_v4 = vsel %vm429_vm2, %v426_v1, 0 }
 0x3d3   :  { %v3581_v5 = vunpack.i.h.bf16 %v3579_v3  ;;  %v3580_v6 = vunpack.i.l.bf16 %v3579_v3  ;;  %3323 = vmatpush3.bf16.xpose.msra.mxu1 %v437_v4  ;;  %647 = vrot.lane.b32.xlu1 %v416_v2, %s3981_s20 }
 0x3d5   :  { %v428_v7 = vpop.permute.xlu0 %427  ;;  %v406_v8 = vpack.c.bf16 %v3581_v5, %v3580_v6 }
 0x3d6   :  { %v3594_v9 = vpop.permute.xlu1 %3593  ;;  %3505 = vmatprep.subr.msk.bf16.mxu1 %vm429_vm2, %v428_v7  ;;  %v440_v21 = vsel %vm429_vm2, %v428_v7, 0 }
 0x3d7   :  { %v3596_v10 = vunpack.i.h.bf16 %v3594_v9  ;;  %v3595_v12 = vunpack.i.l.bf16 %v3594_v9  ;;  %568 = vrot.lane.b32.xlu1 %v406_v8, %s3982_s21 }
 0x3d9   :  { %v420_v14 = vpop.permute.xlu0 %419  ;;  %v408_v15 = vpack.c.bf16 %v3596_v10, %v3595_v12 }
 0x3da   :  { %3326 = vmatprep.mubr.msk.bf16.mxu1 %vm429_vm2, %v420_v14 }
 0x3db   :  { %3325 = vmatpush3.bf16.xpose.msra.mxu1 %v440_v21  ;;  %641 = vrot.lane.b32.xlu1 %v408_v15, %s3982_s21 }
 0x3dd   :  { %v422_v22 = vpop.permute.xlu0 %421 }
 0x3e2   :  { %3327 = vmatmul.mubr.msk.bf16.vlgmr.msra.gmra.mrb[0].mxu1 %vm429_vm2, %v422_v22 }
 0x430   :  { %v500_v24 = vpop.permute.xlu1 %499 }
 0x431   :  { %3506 = vmatprep.subr.msk.bf16.mxu0 %vm429_vm2, %v500_v24  ;;  %v510_v25 = vsel %vm429_vm2, %v500_v24, 0 }
 0x432   :  { %3331 = vmatpush3.bf16.xpose.msra.mxu0 %v510_v25 }
 0x434   :  { %v502_v26 = vpop.permute.xlu1 %501 }
 0x435   :  { %3507 = vmatprep.subr.msk.bf16.mxu0 %vm429_vm2, %v502_v26  ;;  %v513_v29 = vsel %vm429_vm2, %v502_v26, 0 }
 0x438   :  { %v646_v27 = vpop.permute.xlu0 %645  ;;  %v573_v28 = vpop.permute.xlu1 %572 }
 0x439   :  { %3508 = vmatprep.subr.msk.bf16.mxu1 %vm429_vm2, %v573_v28  ;;  %v583_v30 = vsel %vm429_vm2, %v573_v28, 0  ;;  %v656_v37 = vsel %vm429_vm2, %v646_v27, 0 }
 0x43a   :  { %3333 = vmatpush3.bf16.xpose.msra.mxu0 %v513_v29  ;;  %3339 = vmatpush3.bf16.xpose.msra.mxu1 %v583_v30 }
 0x43b   :  { %3510 = vmatprep.subr.msk.bf16.mxu0 %vm429_vm2, %v646_v27 }
 0x43c   :  { %v575_v31 = vpop.permute.xlu0 %574  ;;  %v494_v32 = vpop.permute.xlu1 %493 }
 0x43d   :  { %3334 = vmatprep.mubr.msk.bf16.mxu0 %vm429_vm2, %v494_v32  ;;  %3509 = vmatprep.subr.msk.bf16.mxu1 %vm429_vm2, %v575_v31  ;;  %v586_v35 = vsel %vm429_vm2, %v575_v31, 0 }
 0x440   :  { %v567_v33 = vpop.permute.xlu0 %566 }
 0x441   :  { %3342 = vmatprep.mubr.msk.bf16.mxu1 %vm429_vm2, %v567_v33  ;;  %v496_v34 = vpop.permute.xlu1 %495 }
 0x442   :  { %3335 = vmatmul.mubr.msk.bf16.vlgmr.msra.gmra.mrb[8].mxu0 %vm429_vm2, %v496_v34  ;;  %3341 = vmatpush3.bf16.xpose.msra.mxu1 %v586_v35 }
 0x443   :  { %3347 = vmatpush3.bf16.xpose.msra.mxu0 %v656_v37  ;;  %3354 = vmatprep.subr.bf16.mxu1 %v894_v36 }
 0x444   :  { %v640_v38 = vpop.permute.xlu0 %639 }
 0x445   :  { %3350 = vmatprep.mubr.msk.bf16.mxu0 %vm429_vm2, %v640_v38  ;;  %v648_v39 = vpop.permute.xlu1 %647 }
 0x446   :  { %3511 = vmatprep.subr.msk.bf16.mxu0 %vm429_vm2, %v648_v39  ;;  %v659_v41 = vsel %vm429_vm2, %v648_v39, 0 }
 0x449   :  { %v569_v40 = vpop.permute.xlu1 %568 }
 0x44a   :  { %3343 = vmatmul.mubr.msk.bf16.vlgmr.msra.gmra.mrb[4].mxu1 %vm429_vm2, %v569_v40  ;;  %v4262_v40 = vpack.i.bf16 %v4084_v17, %v4076_v13 }
 0x44b   :  { %3349 = vmatpush3.bf16.xpose.msra.mxu0 %v659_v41  ;;  %3355 = vmatpush3.bf16.msra.mxu1 %v894_v36 }
 0x44c   :  { %3356 = vmatprep.subr.bf16.mxu1 %v895_v42 }
 0x44d   :  { %v642_v44 = vpop.permute.xlu1 %641 }
 0x44f   :  { %3357 = vmatpush3.bf16.msra.mxu1 %v895_v42 }
 0x450   :  { %3370 = vmatprep.subr.bf16.mxu1 %v4180_v43 }
 0x452   :  { %3351 = vmatmul.mubr.msk.bf16.vlgmr.msra.gmra.mrb[12].mxu0 %vm429_vm2, %v642_v44 }
 0x4b5   :  { %v3328_v46 = vpop.f32.mrb[0].mxu1 }
 0x4b6   :  { %v4190_v48 = vadd.f32 %v3328_v46, %v46_v45  ;;  %v476_v49 = vpop.f32.mrb[1].mxu1 }
 0x4b7   :  { %v3329_v23 = vpop.f32.mrb[2].mxu1  ;;  %v4195_v50 = vadd.f32 %v476_v49, %v44_v47 }
 0x4b8   :  { %v479_v51 = vpop.f32.mrb[3].mxu1  ;;  %v716_v52 = vsel %vm74_vm0, %v4190_v48, -inf  ;;  %v4206_v57 = vadd.f32 %v3329_v23, %v47_v53 }
 0x4b9   :  { %v4202_v54 = vadd.f32 %v479_v51, %v45_v19  ;;  %717 = vmax.xlane.f32.xlu0 %v716_v52  ;;  %v710_v58 = vsel %vm74_vm0, %v4195_v50, -inf }
 0x4ba   :  { %v719_v59 = vsel %vm74_vm0, %v4206_v57, -inf }
 0x4bb   :  { %v713_v55 = vsel %vm74_vm0, %v4202_v54, -inf }
 0x4bc   :  { %714 = vmax.xlane.f32.xlu1 %v713_v55 }
 0x4bd   :  { %711 = vmax.xlane.f32.xlu0 %v710_v58 }
 0x4c1   :  { %720 = vmax.xlane.f32.xlu0 %v719_v59 }
 0x515   :  { %v3336_v60 = vpop.f32.mrb[8].mxu0 }
 0x516   :  { %v4212_v61 = vadd.f32 %v3336_v60, %v46_v45  ;;  %v549_v62 = vpop.f32.mrb[9].mxu0 }
 0x517   :  { %v3337_v63 = vpop.f32.mrb[10].mxu0  ;;  %v4222_v8 = vadd.f32 %v549_v62, %v44_v47 }
 0x518   :  { %v4214_v0 = vadd.f32 %v3337_v63, %v47_v53  ;;  %v552_v1 = vpop.f32.mrb[11].mxu0  ;;  %v728_v2 = vsel %vm74_vm0, %v4212_v61, -inf }
 0x519   :  { %729 = vmax.xlane.f32.xlu1 %v728_v2  ;;  %v4228_v14 = vadd.f32 %v552_v1, %v45_v19  ;;  %v722_v22 = vsel %vm74_vm0, %v4222_v8, -inf }
 0x51a   :  { %v731_v3 = vsel %vm74_vm0, %v4214_v0, -inf }
 0x51b   :  { %732 = vmax.xlane.f32.xlu0 %v731_v3  ;;  %v725_v27 = vsel %vm74_vm0, %v4228_v14, -inf }
 0x51d   :  { %v3344_v4 = vpop.f32.mrb[4].mxu1 }
 0x51e   :  { %v4220_v5 = vadd.f32 %v3344_v4, %v46_v45  ;;  %v622_v6 = vpop.f32.mrb[5].mxu1 }
 0x51f   :  { %v3345_v7 = vpop.f32.mrb[6].mxu1  ;;  %v4232_v21 = vadd.f32 %v622_v6, %v44_v47 }
 0x520   :  { %v4224_v9 = vadd.f32 %v3345_v7, %v47_v53  ;;  %v625_v10 = vpop.f32.mrb[7].mxu1  ;;  %v740_v12 = vsel %vm74_vm0, %v4220_v5, -inf }
 0x521   :  { %741 = vmax.xlane.f32.xlu1 %v740_v12  ;;  %v4236_v25 = vadd.f32 %v625_v10, %v45_v19  ;;  %v734_v31 = vsel %vm74_vm0, %v4232_v21, -inf }
 0x522   :  { %v743_v15 = vsel %vm74_vm0, %v4224_v9, -inf }
 0x523   :  { %744 = vmax.xlane.f32.xlu0 %v743_v15  ;;  %v737_v33 = vsel %vm74_vm0, %v4236_v25, -inf }
 0x525   :  { %v3352_v24 = vpop.f32.mrb[12].mxu0  ;;  %723 = vmax.xlane.f32.xlu1 %v722_v22 }
 0x526   :  { %v695_v26 = vpop.f32.mrb[13].mxu0  ;;  %v4240_v29 = vadd.f32 %v3352_v24, %v46_v45 }
 0x527   :  { %v3353_v28 = vpop.f32.mrb[14].mxu0  ;;  %726 = vmax.xlane.f32.xlu0 %v725_v27  ;;  %v4248_v34 = vadd.f32 %v695_v26, %v44_v47 }
 0x528   :  { %v698_v30 = vpop.f32.mrb[15].mxu0  ;;  %v752_v35 = vsel %vm74_vm0, %v4240_v29, -inf  ;;  %v4252_v36 = vadd.f32 %v3353_v28, %v47_v53 }
 0x529   :  { %735 = vmax.xlane.f32.xlu1 %v734_v31  ;;  %v4244_v32 = vadd.f32 %v698_v30, %v45_v19  ;;  %v746_v38 = vsel %vm74_vm0, %v4248_v34, -inf }
 0x52a   :  { %v755_v39 = vsel %vm74_vm0, %v4252_v36, -inf }
 0x52b   :  { %738 = vmax.xlane.f32.xlu0 %v737_v33  ;;  %v749_v37 = vsel %vm74_vm0, %v4244_v32, -inf }
 0x52d   :  { %753 = vmax.xlane.f32.xlu1 %v752_v35 }
 0x52f   :  { %750 = vmax.xlane.f32.xlu0 %v749_v37 }
 0x531   :  { %747 = vmax.xlane.f32.xlu1 %v746_v38 }
 0x533   :  { %756 = vmax.xlane.f32.xlu0 %v755_v39 }
 0x542   :  { %3598 = vrot.lane.b32.xlu1 %v4262_v40, %s3979_s18 }
 0x546   :  { %v718_v41 = vpop.xlane.xlu0 %717 }
 0x547   :  { %v760_v49 = vsub.f32 %v4190_v48, %v718_v41 }
 0x549   :  { %v715_v42 = vpop.xlane.xlu1 %714  ;;  %v778_v51 = vmul.f32 1.442695, %v760_v49 }
 0x54a   :  { %v712_v44 = vpop.xlane.xlu0 %711  ;;  %v759_v45 = vsub.f32 %v4202_v54, %v715_v42 }
 0x54b   :  { %v758_v13 = vsub.f32 %v4195_v50, %v712_v44 }
 0x54c   :  { %v776_v19 = vmul.f32 1.442695, %v759_v45 }
 0x54d   :  { %v774_v17 = vmul.f32 1.442695, %v758_v13 }
 0x54e   :  { %v721_v46 = vpop.xlane.xlu0 %720 }
 0x54f   :  { %v761_v47 = vsub.f32 %v4206_v57, %v721_v46 }
 0x551   :  { %v780_v23 = vmul.f32 1.442695, %v761_v47 }
 0x553   :  { %3735 = vpow2.f32 %v780_v23 }
 0x554   :  { %3737 = vpow2.f32 %v776_v19 }
 0x555   :  { %3739 = vpow2.f32 %v778_v51 }
 0x556   :  { %3741 = vpow2.f32 %v774_v17 }
 0x55d   :  { %v4270_v52 = vpop.eup %3735 }
 0x55e   :  { %v815_v53 = vsel %vm74_vm0, %v4270_v52, 0.0  ;;  %v4274_v54 = vpop.eup %3737 }
 0x55f   :  { %816 = vadd.xlane.f32.xlu0 %v815_v53  ;;  %v4276_v55 = vpop.eup %3739  ;;  %v809_v48 = vsel %vm74_vm0, %v4274_v54, 0.0 }
 0x560   :  { %v812_v50 = vsel %vm74_vm0, %v4276_v55, 0.0  ;;  %v4282_v57 = vpop.eup %3741 }
 0x561   :  { %v806_v58 = vsel %vm74_vm0, %v4282_v57, 0.0 }
 0x563   :  { %810 = vadd.xlane.f32.xlu0 %v809_v48 }
 0x566   :  { %813 = vadd.xlane.f32.xlu1 %v812_v50 }
 0x56a   :  { %807 = vadd.xlane.f32.xlu1 %v806_v58 }
 0x5a6   :  { %v730_v59 = vpop.xlane.xlu1 %729 }
 0x5a7   :  { %v764_v60 = vsub.f32 %v4212_v61, %v730_v59 }
 0x5a8   :  { %v733_v62 = vpop.xlane.xlu0 %732 }
 0x5a9   :  { %v786_v63 = vmul.f32 1.442695, %v764_v60  ;;  %v765_v1 = vsub.f32 %v4214_v0, %v733_v62 }
 0x5ab   :  { %3743 = vpow2.f32 %v786_v63  ;;  %v788_v2 = vmul.f32 1.442695, %v765_v1 }
 0x5ad   :  { %3745 = vpow2.f32 %v788_v2 }
 0x5ae   :  { %v742_v3 = vpop.xlane.xlu1 %741 }
 0x5af   :  { %v768_v4 = vsub.f32 %v4220_v5, %v742_v3 }
 0x5b0   :  { %v745_v6 = vpop.xlane.xlu0 %744 }
 0x5b1   :  { %v794_v7 = vmul.f32 1.442695, %v768_v4  ;;  %v769_v10 = vsub.f32 %v4224_v9, %v745_v6 }
 0x5b2   :  { %v724_v12 = vpop.xlane.xlu1 %723 }
 0x5b3   :  { %3747 = vpow2.f32 %v794_v7  ;;  %v796_v15 = vmul.f32 1.442695, %v769_v10  ;;  %v762_v22 = vsub.f32 %v4222_v8, %v724_v12  ;;  %v3612_v12 = vpack.i.bf16 %v4082_v16, %v4074_v11 }
 0x5b4   :  { %v727_v61 = vpop.xlane.xlu0 %726 }
 0x5b5   :  { %v4291_v24 = vpop.eup %3743  ;;  %3749 = vpow2.f32 %v796_v15  ;;  %v782_v0 = vmul.f32 1.442695, %v762_v22  ;;  %v763_v26 = vsub.f32 %v4228_v14, %v727_v61 }
 0x5b6   :  { %v736_v27 = vpop.xlane.xlu1 %735  ;;  %v824_v5 = vsel %vm74_vm0, %v4291_v24, 0.0 }
 0x5b7   :  { %v4296_v28 = vpop.eup %3745  ;;  %3751 = vpow2.f32 %v782_v0  ;;  %v784_v9 = vmul.f32 1.442695, %v763_v26  ;;  %v766_v30 = vsub.f32 %v4232_v21, %v736_v27  ;;  %825 = vadd.xlane.f32.xlu1 %v824_v5 }
 0x5b8   :  { %v739_v31 = vpop.xlane.xlu0 %738  ;;  %v827_v8 = vsel %vm74_vm0, %v4296_v28, 0.0 }
 0x5b9   :  { %3753 = vpow2.f32 %v784_v9  ;;  %v790_v33 = vmul.f32 1.442695, %v766_v30  ;;  %v767_v35 = vsub.f32 %v4236_v25, %v739_v31  ;;  %828 = vadd.xlane.f32.xlu0 %v827_v8 }
 0x5ba   :  { %v754_v14 = vpop.xlane.xlu1 %753 }
 0x5bb   :  { %3755 = vpow2.f32 %v790_v33  ;;  %v792_v37 = vmul.f32 1.442695, %v767_v35  ;;  %v772_v38 = vsub.f32 %v4240_v29, %v754_v14  ;;  %v899_v33 = vpack.c.bf16 %v4094_v20, %v4090_v18 }
 0x5bc   :  { %v751_v39 = vpop.xlane.xlu0 %750 }
 0x5bd   :  { %v4303_v41 = vpop.eup %3747  ;;  %3757 = vpow2.f32 %v792_v37  ;;  %v802_v21 = vmul.f32 1.442695, %v772_v38  ;;  %v771_v42 = vsub.f32 %v4244_v32, %v751_v39 }
 0x5be   :  { %v748_v44 = vpop.xlane.xlu1 %747  ;;  %v836_v45 = vsel %vm74_vm0, %v4303_v41, 0.0 }
 0x5bf   :  { %v4308_v46 = vpop.eup %3749  ;;  %3759 = vpow2.f32 %v802_v21  ;;  %v770_v25 = vsub.f32 %v4248_v34, %v748_v44  ;;  %837 = vadd.xlane.f32.xlu1 %v836_v45  ;;  %v800_v32 = vmul.f32 1.442695, %v771_v42 }
 0x5c0   :  { %v757_v47 = vpop.xlane.xlu0 %756  ;;  %v839_v29 = vsel %vm74_vm0, %v4308_v46, 0.0 }
 0x5c1   :  { %v4313_v49 = vpop.eup %3751  ;;  %v798_v19 = vmul.f32 1.442695, %v770_v25  ;;  %v773_v23 = vsub.f32 %v4252_v36, %v757_v47  ;;  %840 = vadd.xlane.f32.xlu0 %v839_v29 }
 0x5c2   :  { %v3599_v51 = vpop.permute.xlu1 %3598  ;;  %v818_v13 = vsel %vm74_vm0, %v4313_v49, 0.0 }
 0x5c3   :  { %v4318_v17 = vpop.eup %3753  ;;  %3761 = vpow2.f32 %v798_v19  ;;  %v804_v34 = vmul.f32 1.442695, %v773_v23  ;;  %v3601_v53 = vunpack.i.h.bf16 %v3599_v51  ;;  %v3600_v48 = vunpack.i.l.bf16 %v3599_v51  ;;  %819 = vadd.xlane.f32.xlu1 %v818_v13 }
 0x5c4   :  { %v821_v50 = vsel %vm74_vm0, %v4318_v17, 0.0 }
 0x5c5   :  { %v4322_v58 = vpop.eup %3755  ;;  %3763 = vpow2.f32 %v804_v34  ;;  %822 = vadd.xlane.f32.xlu0 %v821_v50  ;;  %v896_v36 = vpack.c.bf16 %v3601_v53, %v3600_v48 }
 0x5c6   :  { %v830_v59 = vsel %vm74_vm0, %v4322_v58, 0.0  ;;  %3765 = vpow2.f32 %v800_v32 }
 0x5c7   :  { %v4326_v60 = vpop.eup %3757  ;;  %831 = vadd.xlane.f32.xlu1 %v830_v59  ;;  %3362 = vmatprep.subr.bf16.mxu0 %v896_v36 }
 0x5c8   :  { %3363 = vmatpush3.bf16.msra.mxu0 %v896_v36  ;;  %v833_v62 = vsel %vm74_vm0, %v4326_v60, 0.0 }
 0x5c9   :  { %v4330_v63 = vpop.eup %3759  ;;  %834 = vadd.xlane.f32.xlu0 %v833_v62 }
 0x5ca   :  { %v848_v1 = vsel %vm74_vm0, %v4330_v63, 0.0 }
 0x5cb   :  { %849 = vadd.xlane.f32.xlu1 %v848_v1 }
 0x5cd   :  { %v4334_v2 = vpop.eup %3761 }
 0x5ce   :  { %v842_v3 = vsel %vm74_vm0, %v4334_v2, 0.0 }
 0x5cf   :  { %v4338_v4 = vpop.eup %3763  ;;  %843 = vadd.xlane.f32.xlu1 %v842_v3 }
 0x5d0   :  { %v851_v6 = vsel %vm74_vm0, %v4338_v4, 0.0  ;;  %v4342_v7 = vpop.eup %3765 }
 0x5d1   :  { %852 = vadd.xlane.f32.xlu0 %v851_v6  ;;  %v845_v10 = vsel %vm74_vm0, %v4342_v7, 0.0 }
 0x5d5   :  { %846 = vadd.xlane.f32.xlu0 %v845_v10 }
 0x5e0   :  { %3608 = vrot.lane.b32.xlu1 %v4262_v40, %s3980_s19 }
 0x5e4   :  { %3613 = vrot.lane.b32.xlu1 %v3612_v12, %s3980_s19 }
 0x5eb   :  { %3603 = vrot.lane.b32.xlu0 %v3612_v12, %s3979_s18 }
 0x5ec   :  { %v817_v15 = vpop.xlane.xlu0 %816 }
 0x5f0   :  { %v811_v22 = vpop.xlane.xlu0 %810 }
 0x5f3   :  { %v814_v61 = vpop.xlane.xlu1 %813 }
 0x5f4   :  { %3767 = vrcp.f32 %v814_v61 }
 0x5f5   :  { %3769 = vrcp.f32 %v811_v22 }
 0x5f6   :  { %3771 = vrcp.f32 %v817_v15 }
 0x5f7   :  { %v808_v0 = vpop.xlane.xlu1 %807 }
 0x5f8   :  { %3773 = vrcp.f32 %v808_v0 }
 0x5fe   :  { %v3768_v26 = vpop.eup %3767 }
 0x5ff   :  { %v3770_v27 = vpop.eup %3769  ;;  %v872_v40 = vmul.f32 %v3768_v26, %v4276_v55 }
 0x600   :  { %v3772_v5 = vpop.eup %3771  ;;  %v871_v16 = vmul.f32 %v3770_v27, %v4274_v54 }
 0x601   :  { %v873_v30 = vmul.f32 %v3772_v5, %v4270_v52 }
 0x602   :  { %v3774_v9 = vpop.eup %3773 }
 0x603   :  { %v870_v11 = vmul.f32 %v3774_v9, %v4282_v57  ;;  %v887_v8 = vpack.c.bf16 %v873_v30, %v872_v40 }
 0x605   :  { %v886_v31 = vpack.c.bf16 %v871_v16, %v870_v11 }
 0x607   :  { %3358 = vmatprep.mubr.msk.bf16.mxu1 %vm74_vm0, %v886_v31 }
 0x608   :  { %3359 = vmatmul.mubr.msk.bf16.vlgmr.msra.gmra.mrb[8].mxu1 %vm74_vm0, %v887_v8 }
 0x609   :  { %3371 = vmatpush3.bf16.msra.mxu1 %v4180_v43 }
 0x60a   :  { %3372 = vmatprep.subr.bf16.mxu1 %v899_v33 }
 0x60d   :  { %3373 = vmatpush3.bf16.msra.mxu1 %v899_v33 }
 0x644   :  { %v826_v55 = vpop.xlane.xlu1 %825 }
 0x646   :  { %v829_v35 = vpop.xlane.xlu0 %828 }
 0x64c   :  { %v838_v57 = vpop.xlane.xlu1 %837 }
 0x64e   :  { %v841_v14 = vpop.xlane.xlu0 %840 }
 0x650   :  { %v820_v54 = vpop.xlane.xlu1 %819 }
 0x651   :  { %3775 = vrcp.f32 %v820_v54 }
 0x652   :  { %v823_v52 = vpop.xlane.xlu0 %822 }
 0x653   :  { %3777 = vrcp.f32 %v823_v52 }
 0x654   :  { %3779 = vrcp.f32 %v841_v14  ;;  %v832_v37 = vpop.xlane.xlu1 %831 }
 0x655   :  { %3781 = vrcp.f32 %v832_v37 }
 0x656   :  { %3783 = vrcp.f32 %v838_v57  ;;  %v835_v38 = vpop.xlane.xlu0 %834 }
 0x657   :  { %3785 = vrcp.f32 %v835_v38 }
 0x658   :  { %v850_v18 = vpop.xlane.xlu1 %849  ;;  %3787 = vrcp.f32 %v829_v35 }
 0x659   :  { %3789 = vrcp.f32 %v826_v55 }
 0x65b   :  { %v3776_v20 = vpop.eup %3775 }
 0x65c   :  { %v844_v43 = vpop.xlane.xlu1 %843  ;;  %v874_v44 = vmul.f32 %v3776_v20, %v4313_v49 }
 0x65d   :  { %v3778_v39 = vpop.eup %3777  ;;  %3791 = vrcp.f32 %v844_v43 }
 0x65e   :  { %v3780_v21 = vpop.eup %3779  ;;  %v853_v42 = vpop.xlane.xlu0 %852  ;;  %v875_v45 = vmul.f32 %v3778_v39, %v4318_v17 }
 0x65f   :  { %v3782_v25 = vpop.eup %3781  ;;  %v881_v23 = vmul.f32 %v3780_v21, %v4308_v46 }
 0x660   :  { %v3784_v47 = vpop.eup %3783  ;;  %v888_v29 = vpack.c.bf16 %v875_v45, %v874_v44  ;;  %v3609_v32 = vpop.permute.xlu1 %3608  ;;  %v878_v13 = vmul.f32 %v3782_v25, %v4322_v58 }
 0x661   :  { %v3786_v19 = vpop.eup %3785  ;;  %v880_v53 = vmul.f32 %v3784_v47, %v4303_v41  ;;  %v3611_v46 = vunpack.i.h.bf16 %v3609_v32  ;;  %v3610_v36 = vunpack.i.l.bf16 %v3609_v32 }
 0x662   :  { %v847_v51 = vpop.xlane.xlu0 %846  ;;  %3366 = vmatprep.mubr.msk.bf16.mxu0 %vm74_vm0, %v888_v29  ;;  %v879_v34 = vmul.f32 %v3786_v19, %v4326_v60  ;;  %v3788_v48 = vpop.eup %3787 }
 0x663   :  { %3793 = vrcp.f32 %v847_v51  ;;  %v891_v17 = vpack.c.bf16 %v881_v23, %v880_v53  ;;  %v3790_v58 = vpop.eup %3789  ;;  %v877_v60 = vmul.f32 %v3788_v48, %v4296_v28  ;;  %v900_v15 = vpack.c.bf16 %v3611_v46, %v3610_v36  ;;  %v3943_v51 = vld [vmem:[%s4999_s0] sm:$0xff] }
 0x664   :  { %3795 = vrcp.f32 %v853_v42  ;;  %v890_v49 = vpack.c.bf16 %v879_v34, %v878_v13  ;;  %v3614_v1 = vpop.permute.xlu1 %3613  ;;  %v876_v6 = vmul.f32 %v3790_v58, %v4291_v24 }
 0x665   :  { %3797 = vrcp.f32 %v850_v18  ;;  %v3616_v10 = vunpack.i.h.bf16 %v3614_v1  ;;  %v3615_v12 = vunpack.i.l.bf16 %v3614_v1 }
 0x666   :  { %v3604_v50 = vpop.permute.xlu0 %3603  ;;  %3374 = vmatprep.mubr.msk.bf16.mxu1 %vm74_vm0, %v890_v49  ;;  %v889_v61 = vpack.c.bf16 %v877_v60, %v876_v6  ;;  %v3945_v60 = vld [vmem:[%s4999_s0 + $0x10] sm:$0xff] }
 0x667   :  { %v3606_v59 = vunpack.i.h.bf16 %v3604_v50  ;;  %v3605_v62 = vunpack.i.l.bf16 %v3604_v50  ;;  %3375 = vmatmul.mubr.msk.bf16.vlgmr.msra.gmra.mrb[12].mxu1 %vm74_vm0, %v891_v17  ;;  %v3792_v3 = vpop.eup %3791  ;;  %v901_v28 = vpack.c.bf16 %v3616_v10, %v3615_v12  ;;  %v3944_v50 = vld [vmem:[%s4999_s0 + $0x8] sm:$0xff]  ;;  %v3946_v10 = vld [vmem:[%s4999_s0 + $0x18] sm:$0xff] }
 0x668   :  { %v882_v26 = vmul.f32 %v3792_v3, %v4334_v2 }
 0x669   :  { %v897_v41 = vpack.c.bf16 %v3606_v59, %v3605_v62 }
 0x66b   :  { %3364 = vmatprep.subr.bf16.mxu0 %v897_v41 }
 0x66c   :  { %3365 = vmatpush3.bf16.msra.mxu0 %v897_v41 }
 0x66d   :  { %v3794_v22 = vpop.eup %3793  ;;  %3378 = vmatprep.subr.bf16.mxu0 %v900_v15 }
 0x66e   :  { %v3796_v0 = vpop.eup %3795  ;;  %v883_v27 = vmul.f32 %v3794_v22, %v4342_v7 }
 0x66f   :  { %3367 = vmatmul.mubr.msk.bf16.vlgmr.msra.gmra.mrb[16].mxu0 %vm74_vm0, %v889_v61  ;;  %v3798_v5 = vpop.eup %3797  ;;  %v885_v24 = vmul.f32 %v3796_v0, %v4338_v4 }
 0x670   :  { %3379 = vmatpush3.bf16.msra.mxu0 %v900_v15  ;;  %v892_v9 = vpack.c.bf16 %v883_v27, %v882_v26  ;;  %v884_v40 = vmul.f32 %v3798_v5, %v4330_v63 }
 0x671   :  { %3380 = vmatprep.subr.bf16.mxu0 %v901_v28 }
 0x672   :  { %3382 = vmatprep.mubr.msk.bf16.mxu0 %vm74_vm0, %v892_v9  ;;  %v893_v11 = vpack.c.bf16 %v885_v24, %v884_v40 }
 0x674   :  { %3381 = vmatpush3.bf16.msra.mxu0 %v901_v28 }
 0x677   :  { %3383 = vmatmul.mubr.msk.bf16.vlgmr.msra.gmra.mrb[20].mxu0 %vm74_vm0, %v893_v11 }
 0x6db   :  { %v3360_v2 = vpop.f32.mrb[8].mxu1 }
 0x6dc   :  { %v942_v16 = vpop.f32.mrb[9].mxu1 }
 0x6dd   :  { %v3361_v7 = vpop.f32.mrb[10].mxu1 }
 0x6de   :  { %v945_v30 = vpop.f32.mrb[11].mxu1 }
 0x73a   :  { %v3376_v31 = vpop.f32.mrb[12].mxu1 }
 0x73b   :  { %v1052_v8 = vpop.f32.mrb[13].mxu1 }
 0x73c   :  { %v3377_v33 = vpop.f32.mrb[14].mxu1 }
 0x73d   :  { %v1055_v55 = vpop.f32.mrb[15].mxu1 }
 0x742   :  { %v3368_v35 = vpop.f32.mrb[16].mxu0 }
 0x743   :  { %1130 = vrot.lane.b32.xlu0 %v3368_v35, %s3983_s30  ;;  %v997_v4 = vpop.f32.mrb[17].mxu0 }
 0x744   :  { %v3369_v57 = vpop.f32.mrb[18].mxu0 }
 0x745   :  { %1132 = vrot.lane.b32.xlu1 %v3369_v57, %s3983_s30  ;;  %v1000_v63 = vpop.f32.mrb[19].mxu0  ;;  %v3705_v57 = vld [vmem:[%s5005_s6 + $0x8] sm:$0xff]  }
 0x747   :  { %1146 = vrot.lane.b32.xlu0 %v3376_v31, %s3984_s12 }
 0x749   :  { %1148 = vrot.lane.b32.xlu1 %v3377_v33, %s3984_s12 }
 0x74a   :  { %v3384_v14 = vpop.f32.mrb[20].mxu0 }
 0x74b   :  { %v1107_v54 = vpop.f32.mrb[21].mxu0  ;;  %1126 = vrot.lane.b32.xlu0 %v997_v4, %s3983_s30  ;;  %v3704_v4 = vld [vmem:[%s5005_s6] sm:$0xff]  }
 0x74c   :  { %v3385_v52 = vpop.f32.mrb[22].mxu0  ;;  %3386 = vmatprep.subr.bf16.mxu1 %v3704_v4 }
 0x74d   :  { %v1110_v37 = vpop.f32.mrb[23].mxu0  ;;  %1128 = vrot.lane.b32.xlu1 %v1000_v63, %s3983_s30  ;;  %3387 = vmatpush3.bf16.msra.mxu1 %v3704_v4  ;;  %v3706_v63 = vld [vmem:[%s5007_s8] sm:$0xff]   ;;  %v3708_v4 = vld [vmem:[%s5007_s8 + $0x10] sm:$0xff]  }
 0x74e   :  { %3388 = vmatprep.subr.bf16.mxu1 %v3705_v57  ;;  %3394 = vmatprep.subr.bf16.mxu0 %v3706_v63 }
 0x74f   :  { %1142 = vrot.lane.b32.xlu0 %v1052_v8, %s3984_s12  ;;  %3395 = vmatpush3.bf16.msra.mxu0 %v3706_v63 }
 0x751   :  { %1144 = vrot.lane.b32.xlu1 %v1055_v55, %s3984_s12  ;;  %3389 = vmatpush3.bf16.msra.mxu1 %v3705_v57 }
 0x753   :  { %1158 = vrot.lane.b32.xlu0 %v1107_v54, %s3985_s13 }
 0x755   :  { %1160 = vrot.lane.b32.xlu1 %v1110_v37, %s3985_s13 }
 0x757   :  { %1162 = vrot.lane.b32.xlu0 %v3384_v14, %s3985_s13  ;;  %v3707_v14 = vld [vmem:[%s5007_s8 + $0x8] sm:$0xff]  }
 0x758   :  { %3396 = vmatprep.subr.bf16.mxu0 %v3707_v14 }
 0x759   :  { %1164 = vrot.lane.b32.xlu1 %v3385_v52, %s3985_s13  ;;  %3397 = vmatpush3.bf16.msra.mxu0 %v3707_v14 }
 0x75a   :  { %3398 = vmatprep.subr.bf16.mxu0 %v3708_v4 }
 0x75d   :  { %3399 = vmatpush3.bf16.msra.mxu0 %v3708_v4 }
 0x7b5   :  { %v1131_v38 = vpop.permute.xlu0 %1130 }
 0x7b6   :  { %v1172_v34 = vsel %vm429_vm2, %v3360_v2, %v1131_v38 }
 0x7b7   :  { %v1133_v18 = vpop.permute.xlu1 %1132 }
 0x7b8   :  { %v1173_v36 = vsel %vm429_vm2, %v3361_v7, %v1133_v18 }
 0x7b9   :  { %v1147_v20 = vpop.permute.xlu0 %1146 }
 0x7ba   :  { %v1176_v49 = vsel %vm173_vm1, %v1172_v34, %v1147_v20 }
 0x7bb   :  { %v1149_v43 = vpop.permute.xlu1 %1148 }
 0x7bc   :  { %v1177_v62 = vsel %vm173_vm1, %v1173_v36, %v1149_v43 }
 0x7bd   :  { %v1127_v39 = vpop.permute.xlu0 %1126 }
 0x7be   :  { %v1170_v45 = vsel %vm429_vm2, %v942_v16, %v1127_v39 }
 0x7bf   :  { %v1129_v21 = vpop.permute.xlu1 %1128 }
 0x7c0   :  { %v1171_v29 = vsel %vm429_vm2, %v945_v30, %v1129_v21 }
 0x7c1   :  { %v1143_v42 = vpop.permute.xlu0 %1142 }
 0x7c2   :  { %v1174_v25 = vsel %vm173_vm1, %v1170_v45, %v1143_v42  ;;  %v1264_v42 = vlaneseq }
 0x7c3   :  { %v1145_v44 = vpop.permute.xlu1 %1144 }
 0x7c4   :  { %v1175_v23 = vsel %vm173_vm1, %v1171_v29, %v1145_v44 }
 0x7c5   :  { %v1159_v47 = vpop.permute.xlu0 %1158 }
 0x7c6   :  { %v1179_v19 = vsel %vm1178_vm3, %v1174_v25, %v1159_v47 }
 0x7c7   :  { %v1161_v32 = vpop.permute.xlu1 %1160  ;;  %v1183_v13 = vadd.f32 %v3943_v51, %v1179_v19  ;;  %v4451_v19 = vshrl.u32 %v1264_v42, 7 }
 0x7c8   :  { %v1180_v53 = vsel %vm1178_vm3, %v1175_v23, %v1161_v32 }
 0x7c9   :  { %v1163_v17 = vpop.permute.xlu0 %1162  ;;  %v1187_v48 = vsel %vm74_vm0, %v1183_v13, 0.0  ;;  %v1184_v46 = vadd.f32 %v3944_v50, %v1180_v53 }
 0x7ca   :  { %v1181_v59 = vsel %vm1178_vm3, %v1176_v49, %v1163_v17  ;;  %1188 = vadd.xlane.f32.xlu0 %v1187_v48 }
 0x7cb   :  { %v1165_v58 = vpop.permute.xlu1 %1164  ;;  %v1190_v1 = vsel %vm74_vm0, %v1184_v46, 0.0  ;;  %v1185_v41 = vadd.f32 %v3945_v60, %v1181_v59  ;;  %v1266_v59 = vsub.s32 0, %v4451_v19 }
 0x7cc   :  { %v1182_v3 = vsel %vm1178_vm3, %v1177_v62, %v1165_v58  ;;  %1191 = vadd.xlane.f32.xlu1 %v1190_v1  ;;  %v4457_v1 = vld [vmem:[%s5009_s10] sm:$0xf] }
 0x7cd   :  { %v1193_v6 = vsel %vm74_vm0, %v1185_v41, 0.0  ;;  %v1186_v12 = vadd.f32 %v3946_v10, %v1182_v3 }
 0x7ce   :  { %1194 = vadd.xlane.f32.xlu0 %v1193_v6  ;;  %v1267_v6 = vrot.slane %v4457_v1, %v1266_v59 }
 0x7cf   :  { %v1196_v15 = vsel %vm74_vm0, %v1186_v12, 0.0 }
 0x7d2   :  { %1197 = vadd.xlane.f32.xlu0 %v1196_v15 }
 0x857   :  { %v1189_v22 = vpop.xlane.xlu0 %1188 }
 0x858   :  { %v1200_v61 = vmul.f32 0.03125, %v1189_v22 }
 0x859   :  { %v1192_v0 = vpop.xlane.xlu1 %1191 }
 0x85a   :  { %v4419_v26 = vsub.f32 %v1183_v13, %v1200_v61  ;;  %v1201_v27 = vmul.f32 0.03125, %v1192_v0 }
 0x85b   :  { %v1195_v28 = vpop.xlane.xlu0 %1194 }
 0x85c   :  { %v4421_v5 = vsub.f32 %v1184_v46, %v1201_v27  ;;  %v1202_v9 = vmul.f32 0.03125, %v1195_v28  ;;  %v1208_v24 = vmul.f32 %v4419_v26, %v4419_v26  ;;  %v1268_v22 = vmul.f32 %v1267_v6, %v4419_v26 }
 0x85e   :  { %v4425_v40 = vsub.f32 %v1185_v41, %v1202_v9  ;;  %v1212_v11 = vsel %vm74_vm0, %v1208_v24, 0.0  ;;  %v1209_v2 = vmul.f32 %v4421_v5, %v4421_v5  ;;  %v1269_v61 = vmul.f32 %v1267_v6, %v4421_v5 }
 0x85f   :  { %1213 = vadd.xlane.f32.xlu1 %v1212_v11  ;;  %v1198_v16 = vpop.xlane.xlu0 %1197 }
 0x860   :  { %v1203_v7 = vmul.f32 0.03125, %v1198_v16  ;;  %v1215_v30 = vsel %vm74_vm0, %v1209_v2, 0.0  ;;  %v1210_v31 = vmul.f32 %v4425_v40, %v4425_v40  ;;  %v1270_v11 = vmul.f32 %v1267_v6, %v4425_v40  ;;  %v3709_v40 = vld [vmem:[%s5007_s8 + $0x18] sm:$0xff]  }
 0x861   :  { %1216 = vadd.xlane.f32.xlu0 %v1215_v30  ;;  %3400 = vmatprep.subr.bf16.mxu0 %v3709_v40 }
 0x862   :  { %v4433_v8 = vsub.f32 %v1186_v12, %v1203_v7  ;;  %v1218_v33 = vsel %vm74_vm0, %v1210_v31, 0.0  ;;  %v1278_v12 = vsub.s32 1, %v4451_v19  ;;  %3401 = vmatpush3.bf16.msra.mxu0 %v3709_v40 }
 0x863   :  { %1219 = vadd.xlane.f32.xlu1 %v1218_v33 }
 0x864   :  { %v1211_v55 = vmul.f32 %v4433_v8, %v4433_v8  ;;  %v1279_v27 = vrot.slane %v4457_v1, %v1278_v12  ;;  %v1271_v7 = vmul.f32 %v1267_v6, %v4433_v8  ;;  %v3134_v8 = vld [vmem:[%s5006_s7] ss:$0 sm:$0xff] }
 0x866   :  { %v1221_v35 = vsel %vm74_vm0, %v1211_v55, 0.0 }
 0x867   :  { %1222 = vadd.xlane.f32.xlu0 %v1221_v35 }
 0x8ec   :  { %v1214_v54 = vpop.xlane.xlu1 %1213 }
 0x8ed   :  { %v1224_v52 = vmul.f32 0.032258064, %v1214_v54 }
 0x8ee   :  { %v1217_v37 = vpop.xlane.xlu0 %1216 }
 0x8ef   :  { %3799 = vrsqrt.f32 %v1224_v52  ;;  %v1225_v38 = vmul.f32 0.032258064, %v1217_v37  ;;  %vm1230_vm4 = vcmp.eq.f32.partialorder %v1224_v52, inf  ;;  %v1233_v45 = vand.u32 2147483648, %v1224_v52 }
 0x8f0   :  { %v1220_v18 = vpop.xlane.xlu1 %1219  ;;  %vm1232_vm5 = vcmp.eq.f32.partialorder %v1224_v52, 0.0 }
 0x8f1   :  { %v1226_v20 = vmul.f32 0.032258064, %v1220_v18  ;;  %3801 = vrsqrt.f32 %v1225_v38  ;;  %vm1237_vm6 = vcmp.eq.f32.partialorder %v1225_v38, inf  ;;  %v1240_v13 = vand.u32 2147483648, %v1225_v38 }
 0x8f2   :  { %vm1239_vm7 = vcmp.eq.f32.partialorder %v1225_v38, 0.0 }
 0x8f3   :  { %3803 = vrsqrt.f32 %v1226_v20  ;;  %vm1244_vm8 = vcmp.eq.f32.partialorder %v1226_v20, inf  ;;  %v1247_v49 = vand.u32 2147483648, %v1226_v20  ;;  %vm1246_vm9 = vcmp.eq.f32.partialorder %v1226_v20, 0.0 }
 0x8f4   :  { %v1223_v43 = vpop.xlane.xlu0 %1222 }
 0x8f5   :  { %v1227_v39 = vmul.f32 0.032258064, %v1223_v43 }
 0x8f7   :  { %3805 = vrsqrt.f32 %v1227_v39  ;;  %vm1251_vm10 = vcmp.eq.f32.partialorder %v1227_v39, inf  ;;  %v1254_v60 = vand.u32 2147483648, %v1227_v39  ;;  %vm1253_vm11 = vcmp.eq.f32.partialorder %v1227_v39, 0.0 }
 0x8f9   :  { %v3800_v21 = vpop.eup %3799 }
 0x8fa   :  { %v1229_v44 = vmul.f32 %v3800_v21, %v1224_v52 }
 0x8fb   :  { %v3802_v25 = vpop.eup %3801 }
 0x8fc   :  { %v1231_v47 = vsel %vm1230_vm4, %v1224_v52, %v1229_v44  ;;  %v1236_v32 = vmul.f32 %v3802_v25, %v1225_v38 }
 0x8fd   :  { %v3804_v29 = vpop.eup %3803  ;;  %v1234_v23 = vsel %vm1232_vm5, %v1233_v45, %v1231_v47  ;;  %v3139_v45 = vld [vmem:[%s5008_s9] ss:$0 sm:$0xff] }
 0x8fe   :  { %v1256_v51 = vadd.f32 1e-06, %v1234_v23  ;;  %v1243_v34 = vmul.f32 %v3804_v29, %v1226_v20  ;;  %v1238_v53 = vsel %vm1237_vm6, %v1225_v38, %v1236_v32 }
 0x8ff   :  { %v1241_v17 = vsel %vm1239_vm7, %v1240_v13, %v1238_v53 }
 0x900   :  { %v1245_v48 = vsel %vm1244_vm8, %v1226_v20, %v1243_v34  ;;  %3807 = vrcp.f32 %v1256_v51  ;;  %v1257_v46 = vadd.f32 1e-06, %v1241_v17 }
 0x901   :  { %v3806_v50 = vpop.eup %3805  ;;  %v1248_v36 = vsel %vm1246_vm9, %v1247_v49, %v1245_v48 }
 0x902   :  { %v1258_v62 = vadd.f32 1e-06, %v1248_v36  ;;  %v1250_v58 = vmul.f32 %v3806_v50, %v1227_v39  ;;  %3809 = vrcp.f32 %v1257_v46 }
 0x904   :  { %3811 = vrcp.f32 %v1258_v62  ;;  %v1252_v41 = vsel %vm1251_vm10, %v1227_v39, %v1250_v58 }
 0x905   :  { %v1255_v3 = vsel %vm1253_vm11, %v1254_v60, %v1252_v41 }
 0x906   :  { %v1259_v10 = vadd.f32 1e-06, %v1255_v3 }
 0x908   :  { %3813 = vrcp.f32 %v1259_v10 }
 0x90a   :  { %v3808_v15 = vpop.eup %3807 }
 0x90b   :  { %v1272_v0 = vmul.f32 %v3808_v15, %v1268_v22 }
 0x90c   :  { %v3810_v28 = vpop.eup %3809 }
 0x90d   :  { %v1273_v24 = vmul.f32 %v3810_v28, %v1269_v61  ;;  %v1280_v2 = vadd.f32 %v1279_v27, %v1272_v0 }
 0x90e   :  { %v3812_v9 = vpop.eup %3811 }
 0x90f   :  { %v1281_v16 = vadd.f32 %v1279_v27, %v1273_v24  ;;  %v1274_v30 = vmul.f32 %v3812_v9, %v1270_v11 }
 0x911   :  { %v1284_v33 = vpack.c.bf16 %v1281_v16, %v1280_v2  ;;  %v1282_v5 = vadd.f32 %v1279_v27, %v1274_v30 }
 0x912   :  { %v3814_v31 = vpop.eup %3813 }
 0x913   :  { %v1275_v26 = vmul.f32 %v3814_v31, %v1271_v7  ;;  %3390 = vmatprep.mubr.msk.bf16.mxu1 %vm74_vm0, %v1284_v33  ;;  %v3710_v33 = vld [vmem:[%s5001_s2 + $0x10] sm:$0xff]  }
 0x914   :  { %3406 = vmatprep.subr.bf16.mxu1 %v3710_v33 }
 0x915   :  { %v1283_v55 = vadd.f32 %v1279_v27, %v1275_v26  ;;  %v3711_v26 = vld [vmem:[%s5001_s2 + $0x18] sm:$0xff]  }
 0x917   :  { %v1285_v35 = vpack.c.bf16 %v1283_v55, %v1282_v5 }
 0x919   :  { %3391 = vmatmul.mubr.msk.bf16.vlgmr.msra.gmra.mrb[16].mxu1 %vm74_vm0, %v1285_v35 }
 0x91a   :  { %3407 = vmatpush3.bf16.msra.mxu1 %v3710_v33 }
 0x91b   :  { %3408 = vmatprep.subr.bf16.mxu1 %v3711_v26 }
 0x91e   :  { %3409 = vmatpush3.bf16.msra.mxu1 %v3711_v26 }
 0x9ec   :  { %v3392_v57 = vpop.f32.mrb[16].mxu1 }
 0x9ed   :  { %v1358_v63 = vadd.f32 %v3392_v57, %v3134_v8  ;;  %v1349_v14 = vpop.f32.mrb[17].mxu1 }
 0x9ee   :  { %v1350_v54 = vadd.f32 %v3134_v8, %v1349_v14  ;;  %v3393_v52 = vpop.f32.mrb[18].mxu1 }
 0x9ef   :  { %v1361_v37 = vadd.f32 %v3393_v52, %v3134_v8  ;;  %v1352_v38 = vpop.f32.mrb[19].mxu1  ;;  %v1366_v20 = vmax.f32 %v1358_v63, 0.0 }
 0x9f0   :  { %v1353_v18 = vadd.f32 %v3134_v8, %v1352_v38  ;;  %v1364_v39 = vmax.f32 %v1350_v54, 0.0 }
 0x9f1   :  { %v1367_v43 = vmax.f32 %v1361_v37, 0.0 }
 0x9f2   :  { %v1365_v21 = vmax.f32 %v1353_v18, 0.0 }
 0x9f3   :  { %v1369_v42 = vpack.c.bf16 %v1367_v43, %v1366_v20 }
 0x9f4   :  { %v1368_v44 = vpack.c.bf16 %v1365_v21, %v1364_v39 }
 0x9f6   :  { %3402 = vmatprep.mubr.msk.bf16.mxu0 %vm1409_vm12, %v1368_v44 }
 0x9f7   :  { %3403 = vmatmul.mubr.msk.bf16.vlgmr.msra.gmra.mrb[24].mxu0 %vm1409_vm12, %v1369_v42 }
 0xaca   :  { %v3404_v25 = vpop.f32.mrb[24].mxu0 }
 0xacb   :  { %v1450_v47 = vpop.f32.mrb[25].mxu0  ;;  %v1459_v29 = vadd.f32 %v3404_v25, %v3139_v45 }
 0xacc   :  { %v1451_v23 = vadd.f32 %v3139_v45, %v1450_v47  ;;  %v3405_v32 = vpop.f32.mrb[26].mxu0 }
 0xacd   :  { %v1453_v51 = vpop.f32.mrb[27].mxu0  ;;  %v1462_v34 = vadd.f32 %v3405_v32, %v3139_v45  ;;  %v1467_v49 = vadd.f32 %v1459_v29, %v1282_v5 }
 0xace   :  { %v1465_v13 = vadd.f32 %v1451_v23, %v1280_v2  ;;  %v1454_v53 = vadd.f32 %v3139_v45, %v1453_v51 }
 0xacf   :  { %v1468_v50 = vadd.f32 %v1462_v34, %v1283_v55  ;;  %v1475_v36 = vsel %vm74_vm0, %v1467_v49, 0.0 }
 0xad0   :  { %v1466_v17 = vadd.f32 %v1454_v53, %v1281_v16  ;;  %v1469_v48 = vsel %vm74_vm0, %v1465_v13, 0.0 }
 0xad1   :  { %1470 = vadd.xlane.f32.xlu1 %v1469_v48  ;;  %v1478_v62 = vsel %vm74_vm0, %v1468_v50, 0.0 }
 0xad2   :  { %v1472_v46 = vsel %vm74_vm0, %v1466_v17, 0.0 }
 0xad3   :  { %1473 = vadd.xlane.f32.xlu0 %v1472_v46  ;;  %v1559_v46 = vsub.s32 3, %v4451_v19 }
 0xad5   :  { %1476 = vadd.xlane.f32.xlu1 %v1475_v36 }
 0xad7   :  { %1479 = vadd.xlane.f32.xlu0 %v1478_v62 }
 0xb5e   :  { %v1471_v58 = vpop.xlane.xlu1 %1470 }
 0xb5f   :  { %v1481_v60 = vmul.f32 0.03125, %v1471_v58 }
 0xb60   :  { %v1474_v41 = vpop.xlane.xlu0 %1473 }
 0xb61   :  { %v4490_v3 = vsub.f32 %v1465_v13, %v1481_v60  ;;  %v1482_v6 = vmul.f32 0.03125, %v1474_v41  ;;  %v1547_v13 = vsub.s32 2, %v4451_v19  ;;  %v1560_v41 = vrot.slane %v4457_v1, %v1559_v46 }
 0xb62   :  { %v1477_v10 = vpop.xlane.xlu1 %1476 }
 0xb63   :  { %v4492_v15 = vsub.f32 %v1466_v17, %v1482_v6  ;;  %v1483_v22 = vmul.f32 0.03125, %v1477_v10  ;;  %v1489_v61 = vmul.f32 %v4490_v3, %v4490_v3 }
 0xb64   :  { %v1480_v0 = vpop.xlane.xlu0 %1479 }
 0xb65   :  { %v4496_v27 = vsub.f32 %v1467_v49, %v1483_v22  ;;  %v1484_v28 = vmul.f32 0.03125, %v1480_v0  ;;  %v1493_v9 = vsel %vm74_vm0, %v1489_v61, 0.0  ;;  %v1490_v24 = vmul.f32 %v4492_v15, %v4492_v15 }
 0xb66   :  { %1494 = vadd.xlane.f32.xlu1 %v1493_v9 }
 0xb67   :  { %v4501_v11 = vsub.f32 %v1468_v50, %v1484_v28  ;;  %v1491_v2 = vmul.f32 %v4496_v27, %v4496_v27  ;;  %v1496_v16 = vsel %vm74_vm0, %v1490_v24, 0.0  ;;  %v1548_v50 = vrot.slane %v4457_v1, %v1547_v13 }
 0xb68   :  { %1497 = vadd.xlane.f32.xlu0 %v1496_v16 }
 0xb69   :  { %v1499_v7 = vsel %vm74_vm0, %v1491_v2, 0.0  ;;  %v1492_v30 = vmul.f32 %v4501_v11, %v4501_v11  ;;  %v1549_v62 = vmul.f32 %v1548_v50, %v4490_v3  ;;  %v1550_v58 = vmul.f32 %v1548_v50, %v4492_v15 }
 0xb6a   :  { %1500 = vadd.xlane.f32.xlu1 %v1499_v7  ;;  %v1551_v22 = vmul.f32 %v1548_v50, %v4496_v27  ;;  %v1552_v0 = vmul.f32 %v1548_v50, %v4501_v11  ;;  %v3152_v11 = vld [vmem:[%s5002_s3 + $0x1] ss:$0 sm:$0xff] }
 0xb6b   :  { %v1502_v31 = vsel %vm74_vm0, %v1492_v30, 0.0 }
 0xb6c   :  { %1503 = vadd.xlane.f32.xlu0 %v1502_v31 }
 0xbf3   :  { %v1495_v5 = vpop.xlane.xlu1 %1494 }
 0xbf4   :  { %v1505_v55 = vmul.f32 0.032258064, %v1495_v5  ;;  %v3712_v5 = vld [vmem:[%s5003_s4 + $0x8] sm:$0xff]  }
 0xbf5   :  { %v1498_v35 = vpop.xlane.xlu0 %1497  ;;  %3414 = vmatprep.subr.bf16.mxu1 %v3712_v5 }
 0xbf6   :  { %3815 = vrsqrt.f32 %v1505_v55  ;;  %v1506_v4 = vmul.f32 0.032258064, %v1498_v35  ;;  %vm1511_vm13 = vcmp.eq.f32.partialorder %v1505_v55, inf  ;;  %v1514_v52 = vand.u32 2147483648, %v1505_v55 }
 0xbf7   :  { %v1501_v40 = vpop.xlane.xlu1 %1500  ;;  %vm1513_vm14 = vcmp.eq.f32.partialorder %v1505_v55, 0.0 }
 0xbf8   :  { %v1507_v8 = vmul.f32 0.032258064, %v1501_v40  ;;  %3817 = vrsqrt.f32 %v1506_v4  ;;  %vm1518_vm15 = vcmp.eq.f32.partialorder %v1506_v4, inf  ;;  %v1521_v21 = vand.u32 2147483648, %v1506_v4 }
 0xbf9   :  { %v1504_v57 = vpop.xlane.xlu0 %1503  ;;  %vm1520_vm4 = vcmp.eq.f32.partialorder %v1506_v4, 0.0 }
 0xbfa   :  { %3819 = vrsqrt.f32 %v1507_v8  ;;  %v1508_v63 = vmul.f32 0.032258064, %v1504_v57  ;;  %vm1525_vm5 = vcmp.eq.f32.partialorder %v1507_v8, inf  ;;  %v1528_v45 = vand.u32 2147483648, %v1507_v8 }
 0xbfb   :  { %vm1527_vm6 = vcmp.eq.f32.partialorder %v1507_v8, 0.0 }
 0xbfc   :  { %3821 = vrsqrt.f32 %v1508_v63  ;;  %vm1532_vm7 = vcmp.eq.f32.partialorder %v1508_v63, inf  ;;  %v1535_v53 = vand.u32 2147483648, %v1508_v63  ;;  %vm1534_vm8 = vcmp.eq.f32.partialorder %v1508_v63, 0.0 }
 0xc00   :  { %v3816_v14 = vpop.eup %3815 }
 0xc01   :  { %v1510_v54 = vmul.f32 %v3816_v14, %v1505_v55 }
 0xc02   :  { %v3818_v37 = vpop.eup %3817 }
 0xc03   :  { %v1512_v38 = vsel %vm1511_vm13, %v1505_v55, %v1510_v54  ;;  %v1517_v43 = vmul.f32 %v3818_v37, %v1506_v4 }
 0xc04   :  { %v3820_v18 = vpop.eup %3819  ;;  %v1515_v20 = vsel %vm1513_vm14, %v1514_v52, %v1512_v38 }
 0xc05   :  { %v1537_v39 = vadd.f32 1e-06, %v1515_v20  ;;  %v1524_v42 = vmul.f32 %v3820_v18, %v1507_v8  ;;  %v1519_v44 = vsel %vm1518_vm15, %v1506_v4, %v1517_v43 }
 0xc06   :  { %v3822_v25 = vpop.eup %3821  ;;  %v1522_v47 = vsel %vm1520_vm4, %v1521_v21, %v1519_v44 }
 0xc07   :  { %v1526_v29 = vsel %vm1525_vm5, %v1507_v8, %v1524_v42  ;;  %3823 = vrcp.f32 %v1537_v39  ;;  %v1538_v23 = vadd.f32 1e-06, %v1522_v47  ;;  %v1531_v51 = vmul.f32 %v3822_v25, %v1508_v63  ;;  %v3160_v39 = vld [vmem:[%s5004_s5 + $0x1] ss:$0 sm:$0xff] }
 0xc08   :  { %v1529_v32 = vsel %vm1527_vm6, %v1528_v45, %v1526_v29 }
 0xc09   :  { %v1539_v34 = vadd.f32 1e-06, %v1529_v32  ;;  %v1533_v49 = vsel %vm1532_vm7, %v1508_v63, %v1531_v51  ;;  %3825 = vrcp.f32 %v1538_v23 }
 0xc0a   :  { %v1536_v17 = vsel %vm1534_vm8, %v1535_v53, %v1533_v49 }
 0xc0b   :  { %3827 = vrcp.f32 %v1539_v34  ;;  %v1540_v48 = vadd.f32 1e-06, %v1536_v17 }
 0xc0d   :  { %3829 = vrcp.f32 %v1540_v48 }
 0xc11   :  { %v3824_v36 = vpop.eup %3823 }
 0xc12   :  { %v1553_v60 = vmul.f32 %v3824_v36, %v1549_v62 }
 0xc13   :  { %v3826_v6 = vpop.eup %3825 }
 0xc14   :  { %v1554_v61 = vmul.f32 %v3826_v6, %v1550_v58  ;;  %v4528_v28 = vadd.f32 %v1560_v41, %v1553_v60 }
 0xc15   :  { %v3828_v10 = vpop.eup %3827 }
 0xc16   :  { %v4530_v9 = vadd.f32 %v1560_v41, %v1554_v61  ;;  %v1555_v24 = vmul.f32 %v3828_v10, %v1551_v22 }
 0xc17   :  { %v3830_v3 = vpop.eup %3829 }
 0xc18   :  { %v1567_v15 = vpack.c.bf16 %v4530_v9, %v4528_v28  ;;  %v1556_v2 = vmul.f32 %v3830_v3, %v1552_v0  ;;  %v4535_v1 = vadd.f32 %v1560_v41, %v1555_v24 }
 0xc1a   :  { %3410 = vmatprep.mubr.msk.bf16.mxu1 %vm74_vm0, %v1567_v15  ;;  %v4537_v16 = vadd.f32 %v1560_v41, %v1556_v2 }
 0xc1c   :  { %v1568_v27 = vpack.c.bf16 %v4537_v16, %v4535_v1 }
 0xc1e   :  { %3411 = vmatmul.mubr.msk.bf16.vlgmr.msra.gmra.mrb[20].mxu1 %vm74_vm0, %v1568_v27 }
 0xc1f   :  { %3415 = vmatpush3.bf16.msra.mxu1 %v3712_v5 }
 0xcf1   :  { %v3412_v7 = vpop.f32.mrb[20].mxu1 }
 0xcf2   :  { %v1634_v30 = vpop.f32.mrb[21].mxu1  ;;  %v4554_v35 = vadd.f32 %v3412_v7, %v3152_v11 }
 0xcf3   :  { %v4545_v31 = vadd.f32 %v3152_v11, %v1634_v30  ;;  %v3413_v33 = vpop.f32.mrb[22].mxu1 }
 0xcf4   :  { %v1637_v26 = vpop.f32.mrb[23].mxu1  ;;  %v4560_v4 = vadd.f32 %v3413_v33, %v3152_v11 }
 0xcf5   :  { %v4550_v55 = vadd.f32 %v3152_v11, %v1637_v26  ;;  %1653 = vrot.lane.b32.xlu1 %v4545_v31, %s3975_s14 }
 0xcf7   :  { %1655 = vrot.lane.b32.xlu0 %v4550_v55, %s3975_s14 }
 0xcf9   :  { %1657 = vrot.lane.b32.xlu1 %v4554_v35, %s3975_s14 }
 0xcfd   :  { %1659 = vrot.lane.b32.xlu1 %v4560_v4, %s3975_s14 }
 0xd67   :  { %v4564_v40 = vpop.permute.xlu1 %1653 }
 0xd68   :  { %v1665_v57 = vmul.f32 %v4564_v40, %v4545_v31 }
 0xd69   :  { %v4566_v8 = vpop.permute.xlu0 %1655 }
 0xd6a   :  { %v1666_v63 = vmul.f32 %v4566_v8, %v4550_v55 }
 0xd6b   :  { %v4572_v14 = vpop.permute.xlu1 %1657 }
 0xd6c   :  { %v1669_v54 = vpack.c.bf16 %v1666_v63, %v1665_v57  ;;  %v1667_v37 = vmul.f32 %v4572_v14, %v4554_v35 }
 0xd6e   :  { %1684 = vrot.lane.b32.xlu0 %v1669_v54, %s3976_s15 }
 0xd6f   :  { %v4575_v52 = vpop.permute.xlu1 %1659 }
 0xd70   :  { %v1668_v38 = vmul.f32 %v4575_v52, %v4560_v4 }
 0xd72   :  { %v1670_v18 = vpack.c.bf16 %v1668_v38, %v1667_v37 }
 0xd74   :  { %1686 = vrot.lane.b32.xlu1 %v1670_v18, %s3976_s15 }
 0xde0   :  { %v1685_v20 = vpop.permute.xlu0 %1684 }
 0xde1   :  { %3416 = vmatprep.mubr.msk.bf16.mxu1 %vm173_vm1, %v1685_v20 }
 0xde6   :  { %v1687_v43 = vpop.permute.xlu1 %1686 }
 0xde7   :  { %3417 = vmatmul.mubr.msk.bf16.vlgmr.msra.gmra.mrb[24].mxu1 %vm173_vm1, %v1687_v43 }
 0xeba   :  { %v3418_v21 = vpop.f32.mrb[24].mxu1 }
 0xebb   :  { %v1743_v42 = vadd.f32 %v3418_v21, %v3160_v39  ;;  %v1734_v44 = vpop.f32.mrb[25].mxu1 }
 0xebc   :  { %v1735_v45 = vadd.f32 %v3160_v39, %v1734_v44  ;;  %v3419_v25 = vpop.f32.mrb[26].mxu1 }
 0xebd   :  { %v3166_v47 = vmul.f32 -1.442695, %v1743_v42  ;;  %v1746_v29 = vadd.f32 %v3419_v25, %v3160_v39  ;;  %v1737_v23 = vpop.f32.mrb[27].mxu1 }
 0xebe   :  { %v3164_v32 = vmul.f32 -1.442695, %v1735_v45  ;;  %v1738_v51 = vadd.f32 %v3160_v39, %v1737_v23 }
 0xebf   :  { %3831 = vpow2.f32 %v3166_v47  ;;  %v3167_v34 = vmul.f32 -1.442695, %v1746_v29 }
 0xec0   :  { %3833 = vpow2.f32 %v3164_v32  ;;  %v3165_v53 = vmul.f32 -1.442695, %v1738_v51 }
 0xec1   :  { %3835 = vpow2.f32 %v3167_v34 }
 0xec2   :  { %3837 = vpow2.f32 %v3165_v53 }
 0xec9   :  { %v3832_v49 = vpop.eup %3831 }
 0xeca   :  { %v3834_v17 = vpop.eup %3833  ;;  %v1763_v60 = vadd.f32 1.0, %v3832_v49 }
 0xecb   :  { %v3836_v48 = vpop.eup %3835  ;;  %v1761_v50 = vadd.f32 1.0, %v3834_v17 }
 0xecc   :  { %v3838_v36 = vpop.eup %3837  ;;  %v1764_v62 = vadd.f32 1.0, %v3836_v48 }
 0xecd   :  { %3839 = vrcp.f32 %v1761_v50  ;;  %v1762_v58 = vadd.f32 1.0, %v3838_v36 }
 0xecf   :  { %3841 = vrcp.f32 %v1762_v58 }
 0xed0   :  { %3843 = vrcp.f32 %v1764_v62 }
 0xed1   :  { %3845 = vrcp.f32 %v1763_v60 }
 0xed7   :  { %v3840_v41 = vpop.eup %3839 }
 0xed8   :  { %1775 = vperm.xlu0 %3617, %v3840_v41  }
 0xed9   :  { %v3842_v6 = vpop.eup %3841 }
 0xeda   :  { %1780 = vperm.xlu1 %3618, %v3842_v6   ;;  %v3844_v10 = vpop.eup %3843 }
 0xedb   :  { %v3846_v22 = vpop.eup %3845 }
 0xedc   :  { %1790 = vperm.xlu0 %3617, %v3844_v10  }
 0xede   :  { %1785 = vperm.xlu1 %3618, %v3846_v22  }
 0xee0   :  { %3620 = vset.pattern.permute.xlu0 %v3978_v56 }
 0xee1   :  { %1802 = vperm.xlu0 %3620, %v3842_v6  }
 0xee2   :  { %3619 = vset.pattern.permute.xlu1 %v3978_v56 }
 0xee3   :  { %1798 = vperm.xlu1 %3619, %v3840_v41  }
 0xee7   :  { %1806 = vperm.xlu1 %3619, %v3846_v22  }
 0xeeb   :  { %1810 = vperm.xlu1 %3619, %v3844_v10  }
 0xf57   :  { %v1776_v61 = vpop.permute.xlu0 %1775 }
 0xf58   :  { %v1793_v24 = vmul.f32 %v1776_v61, %v4545_v31 }
 0xf59   :  { %v1781_v0 = vpop.permute.xlu1 %1780 }
 0xf5a   :  { %v1794_v3 = vmul.f32 %v1781_v0, %v4550_v55 }
 0xf5b   :  { %v1791_v15 = vpop.permute.xlu0 %1790 }
 0xf5c   :  { %v3621_v2 = vpack.i.bf16 %v1794_v3, %v1793_v24  ;;  %v1796_v11 = vmul.f32 %v1791_v15, %v4560_v4  ;;  %v1929_v20 = vpack.c.bf16 %v1794_v3, %v1793_v24 }
 0xf5d   :  { %v1786_v27 = vpop.permute.xlu1 %1785 }
 0xf5e   :  { %v1795_v7 = vmul.f32 %v1786_v27, %v4554_v35  ;;  %3622 = vrot.lane.b32.xlu0 %v3621_v2, %s3979_s18 }
 0xf60   :  { %v1803_v30 = vpop.permute.xlu0 %1802  ;;  %v3626_v56 = vpack.i.bf16 %v1796_v11, %v1795_v7  ;;  %v1930_v43 = vpack.c.bf16 %v1796_v11, %v1795_v7 }
 0xf61   :  { %v1814_v26 = vmul.f32 %v1803_v30, %v4550_v55 }
 0xf62   :  { %v1799_v33 = vpop.permute.xlu1 %1798  ;;  %3632 = vrot.lane.b32.xlu0 %v3621_v2, %s3975_s14  ;;  %3627 = vrot.lane.b32.xlu1 %v3626_v56, %s3979_s18 }
 0xf63   :  { %v1813_v5 = vmul.f32 %v1799_v33, %v4545_v31 }
 0xf65   :  { %v3636_v57 = vpack.i.bf16 %v1814_v26, %v1813_v5  ;;  %v1921_v39 = vpack.c.bf16 %v1814_v26, %v1813_v5 }
 0xf66   :  { %v1807_v63 = vpop.permute.xlu1 %1806  ;;  %3642 = vrot.lane.b32.xlu0 %v3621_v2, %s3980_s19 }
 0xf67   :  { %3637 = vrot.lane.b32.xlu1 %v3636_v57, %s3979_s18  ;;  %v1815_v37 = vmul.f32 %v1807_v63, %v4554_v35 }
 0xf6a   :  { %v1811_v54 = vpop.permute.xlu1 %1810  ;;  %3652 = vrot.lane.b32.xlu0 %v3626_v56, %s3975_s14 }
 0xf6b   :  { %v1816_v38 = vmul.f32 %v1811_v54, %v4560_v4 }
 0xf6d   :  { %v3646_v18 = vpack.i.bf16 %v1816_v38, %v1815_v37  ;;  %v1922_v21 = vpack.c.bf16 %v1816_v38, %v1815_v37 }
 0xf6e   :  { %3667 = vrot.lane.b32.xlu0 %v3636_v57, %s3975_s14 }
 0xf6f   :  { %3647 = vrot.lane.b32.xlu1 %v3646_v18, %s3979_s18 }
 0xf72   :  { %3672 = vrot.lane.b32.xlu0 %v3636_v57, %s3980_s19 }
 0xf73   :  { %3657 = vrot.lane.b32.xlu1 %v3626_v56, %s3980_s19 }
 0xf76   :  { %1945 = vrot.lane.b32.xlu0 %v1929_v20, %s3981_s20 }
 0xf77   :  { %3662 = vrot.lane.b32.xlu1 %v3646_v18, %s3975_s14 }
 0xf7a   :  { %1947 = vrot.lane.b32.xlu0 %v1930_v43, %s3981_s20 }
 0xf7b   :  { %3677 = vrot.lane.b32.xlu1 %v3646_v18, %s3980_s19 }
 0xf7e   :  { %1939 = vrot.lane.b32.xlu0 %v1921_v39, %s3982_s21 }
 0xf82   :  { %1941 = vrot.lane.b32.xlu0 %v1922_v21, %s3982_s21 }
 0xfd0   :  { %v3623_v42 = vpop.permute.xlu0 %3622 }
 0xfd1   :  { %v3625_v44 = vunpack.i.h.bf16 %v3623_v42  ;;  %v3624_v45 = vunpack.i.l.bf16 %v3623_v42 }
 0xfd3   :  { %v1931_v25 = vpack.c.bf16 %v3625_v44, %v3624_v45 }
 0xfd4   :  { %v3628_v47 = vpop.permute.xlu1 %3627  ;;  %v3633_v29 = vpop.permute.xlu0 %3632 }
 0xfd5   :  { %v3630_v23 = vunpack.i.h.bf16 %v3628_v47  ;;  %v3629_v32 = vunpack.i.l.bf16 %v3628_v47  ;;  %2018 = vrot.lane.b32.xlu1 %v1931_v25, %s3981_s20  ;;  %v3635_v34 = vunpack.i.h.bf16 %v3633_v29  ;;  %v3634_v53 = vunpack.i.l.bf16 %v3633_v29 }
 0xfd7   :  { %v1932_v51 = vpack.c.bf16 %v3630_v23, %v3629_v32  ;;  %v1933_v36 = vpack.c.bf16 %v3635_v34, %v3634_v53 }
 0xfd8   :  { %v3643_v49 = vpop.permute.xlu0 %3642 }
 0xfd9   :  { %v3645_v17 = vunpack.i.h.bf16 %v3643_v49  ;;  %v3644_v48 = vunpack.i.l.bf16 %v3643_v49  ;;  %v3638_v50 = vpop.permute.xlu1 %3637  ;;  %2020 = vrot.lane.b32.xlu1 %v1932_v51, %s3981_s20 }
 0xfda   :  { %v3640_v58 = vunpack.i.h.bf16 %v3638_v50  ;;  %v3639_v60 = vunpack.i.l.bf16 %v3638_v50 }
 0xfdb   :  { %v1935_v62 = vpack.c.bf16 %v3645_v17, %v3644_v48 }
 0xfdc   :  { %v3653_v41 = vpop.permute.xlu0 %3652  ;;  %v1923_v22 = vpack.c.bf16 %v3640_v58, %v3639_v60 }
 0xfdd   :  { %v3655_v6 = vunpack.i.h.bf16 %v3653_v41  ;;  %v3654_v10 = vunpack.i.l.bf16 %v3653_v41  ;;  %2164 = vrot.lane.b32.xlu0 %v1935_v62, %s3981_s20  ;;  %2091 = vrot.lane.b32.xlu1 %v1933_v36, %s3981_s20  ;;  %v2413_v41 = vpack.c.bf16 %v4550_v55, %v4545_v31 }
 0xfdf   :  { %v1934_v61 = vpack.c.bf16 %v3655_v6, %v3654_v10 }
 0xfe0   :  { %v3668_v0 = vpop.permute.xlu0 %3667 }
 0xfe1   :  { %v3670_v24 = vunpack.i.h.bf16 %v3668_v0  ;;  %v3669_v3 = vunpack.i.l.bf16 %v3668_v0  ;;  %v3648_v15 = vpop.permute.xlu1 %3647  ;;  %2093 = vrot.lane.b32.xlu0 %v1934_v61, %s3981_s20  ;;  %2012 = vrot.lane.b32.xlu1 %v1923_v22, %s3982_s21 }
 0xfe2   :  { %v3650_v2 = vunpack.i.h.bf16 %v3648_v15  ;;  %v3649_v27 = vunpack.i.l.bf16 %v3648_v15 }
 0xfe3   :  { %v1925_v11 = vpack.c.bf16 %v3670_v24, %v3669_v3  ;;  %v2414_v24 = vpack.c.bf16 %v4560_v4, %v4554_v35  ;;  %v4654_v3 = vpack.c.bf16 %v4566_v8, %v4564_v40  ;;  %v3948_v40 = vld [vmem:[%s5000_s1] sm:$0xff] }
 0xfe4   :  { %v1924_v7 = vpack.c.bf16 %v3650_v2, %v3649_v27  ;;  %v3673_v30 = vpop.permute.xlu0 %3672  ;;  %v3947_v27 = vld [vmem:[%s5000_s1 + $0x10] sm:$0xff] }
 0xfe5   :  { %v3675_v56 = vunpack.i.h.bf16 %v3673_v30  ;;  %v3674_v33 = vunpack.i.l.bf16 %v3673_v30  ;;  %v3658_v26 = vpop.permute.xlu1 %3657  ;;  %2085 = vrot.lane.b32.xlu0 %v1925_v11, %s3982_s21 }
 0xfe6   :  { %v3660_v5 = vunpack.i.h.bf16 %v3658_v26  ;;  %v3659_v57 = vunpack.i.l.bf16 %v3658_v26  ;;  %2014 = vrot.lane.b32.xlu1 %v1924_v7, %s3982_s21  ;;  %v3949_v26 = vld [vmem:[%s5000_s1 + $0x8] sm:$0xff] }
 0xfe7   :  { %v1927_v63 = vpack.c.bf16 %v3675_v56, %v3674_v33 }
 0xfe8   :  { %v1936_v54 = vpack.c.bf16 %v3660_v5, %v3659_v57  ;;  %v1946_v37 = vpop.permute.xlu0 %1945 }
 0xfe9   :  { %v1956_v38 = vsel %vm429_vm2, %v1946_v37, 0  ;;  %v3663_v18 = vpop.permute.xlu1 %3662  ;;  %3512 = vmatprep.subr.msk.bf16.mxu0 %vm429_vm2, %v1946_v37  ;;  %2158 = vrot.lane.b32.xlu0 %v1927_v63, %s3982_s21  ;;  %v3950_v63 = vld [vmem:[%s5000_s1 + $0x18] sm:$0xff] }
 0xfea   :  { %v3665_v20 = vunpack.i.h.bf16 %v3663_v18  ;;  %v3664_v43 = vunpack.i.l.bf16 %v3663_v18  ;;  %3421 = vmatpush3.bf16.xpose.msra.mxu0 %v1956_v38  ;;  %2166 = vrot.lane.b32.xlu1 %v1936_v54, %s3981_s20 }
 0xfec   :  { %v1926_v39 = vpack.c.bf16 %v3665_v20, %v3664_v43  ;;  %v1948_v21 = vpop.permute.xlu0 %1947 }
 0xfed   :  { %v3678_v42 = vpop.permute.xlu1 %3677  ;;  %3513 = vmatprep.subr.msk.bf16.mxu0 %vm429_vm2, %v1948_v21  ;;  %v1959_v29 = vsel %vm429_vm2, %v1948_v21, 0 }
 0xfee   :  { %v3680_v44 = vunpack.i.h.bf16 %v3678_v42  ;;  %v3679_v45 = vunpack.i.l.bf16 %v3678_v42  ;;  %2087 = vrot.lane.b32.xlu1 %v1926_v39, %s3982_s21 }
 0xff0   :  { %v1928_v25 = vpack.c.bf16 %v3680_v44, %v3679_v45  ;;  %v1940_v47 = vpop.permute.xlu0 %1939 }
 0xff1   :  { %3424 = vmatprep.mubr.msk.bf16.mxu0 %vm429_vm2, %v1940_v47 }
 0xff2   :  { %3423 = vmatpush3.bf16.xpose.msra.mxu0 %v1959_v29  ;;  %2160 = vrot.lane.b32.xlu1 %v1928_v25, %s3982_s21 }
 0xff4   :  { %v1942_v23 = vpop.permute.xlu0 %1941 }
 0xff9   :  { %3425 = vmatmul.mubr.msk.bf16.vlgmr.msra.gmra.mrb[28].mxu0 %vm429_vm2, %v1942_v23 }
0x1047   :  { %v2019_v32 = vpop.permute.xlu1 %2018 }
0x1048   :  { %v2029_v51 = vsel %vm429_vm2, %v2019_v32, 0  ;;  %3514 = vmatprep.subr.msk.bf16.mxu1 %vm429_vm2, %v2019_v32 }
0x1049   :  { %3429 = vmatpush3.bf16.xpose.msra.mxu1 %v2029_v51 }
0x104b   :  { %v2021_v34 = vpop.permute.xlu1 %2020 }
0x104c   :  { %3515 = vmatprep.subr.msk.bf16.mxu1 %vm429_vm2, %v2021_v34  ;;  %v2032_v17 = vsel %vm429_vm2, %v2021_v34, 0 }
0x104f   :  { %v2165_v53 = vpop.permute.xlu0 %2164  ;;  %v2092_v49 = vpop.permute.xlu1 %2091 }
0x1050   :  { %v2102_v48 = vsel %vm429_vm2, %v2092_v49, 0  ;;  %3516 = vmatprep.subr.msk.bf16.mxu0 %vm429_vm2, %v2092_v49  ;;  %v2175_v6 = vsel %vm429_vm2, %v2165_v53, 0 }
0x1051   :  { %3431 = vmatpush3.bf16.xpose.msra.mxu1 %v2032_v17  ;;  %3437 = vmatpush3.bf16.xpose.msra.mxu0 %v2102_v48 }
0x1052   :  { %3518 = vmatprep.subr.msk.bf16.mxu1 %vm429_vm2, %v2165_v53 }
0x1053   :  { %v2094_v50 = vpop.permute.xlu0 %2093  ;;  %v2013_v36 = vpop.permute.xlu1 %2012 }
0x1054   :  { %3432 = vmatprep.mubr.msk.bf16.mxu1 %vm429_vm2, %v2013_v36  ;;  %3517 = vmatprep.subr.msk.bf16.mxu0 %vm429_vm2, %v2094_v50  ;;  %v2105_v58 = vsel %vm429_vm2, %v2094_v50, 0 }
0x1057   :  { %v2086_v62 = vpop.permute.xlu0 %2085 }
0x1058   :  { %3440 = vmatprep.mubr.msk.bf16.mxu0 %vm429_vm2, %v2086_v62  ;;  %v2015_v60 = vpop.permute.xlu1 %2014 }
0x1059   :  { %3433 = vmatmul.mubr.msk.bf16.vlgmr.msra.gmra.mrb[28].mxu1 %vm429_vm2, %v2015_v60  ;;  %3439 = vmatpush3.bf16.xpose.msra.mxu0 %v2105_v58 }
0x105a   :  { %3445 = vmatpush3.bf16.xpose.msra.mxu1 %v2175_v6  ;;  %3452 = vmatprep.subr.bf16.mxu0 %v2413_v41 }
0x105b   :  { %v2159_v10 = vpop.permute.xlu0 %2158 }
0x105c   :  { %3448 = vmatprep.mubr.msk.bf16.mxu1 %vm429_vm2, %v2159_v10  ;;  %v2167_v22 = vpop.permute.xlu1 %2166 }
0x105d   :  { %3519 = vmatprep.subr.msk.bf16.mxu1 %vm429_vm2, %v2167_v22  ;;  %v2178_v0 = vsel %vm429_vm2, %v2167_v22, 0 }
0x1060   :  { %v2088_v61 = vpop.permute.xlu1 %2087 }
0x1061   :  { %3441 = vmatmul.mubr.msk.bf16.vlgmr.msra.gmra.mrb[32].mxu0 %vm429_vm2, %v2088_v61 }
0x1062   :  { %3447 = vmatpush3.bf16.xpose.msra.mxu1 %v2178_v0  ;;  %3453 = vmatpush3.bf16.msra.mxu0 %v2413_v41 }
0x1063   :  { %3454 = vmatprep.subr.bf16.mxu0 %v2414_v24 }
0x1064   :  { %v2161_v15 = vpop.permute.xlu1 %2160 }
0x1066   :  { %3455 = vmatpush3.bf16.msra.mxu0 %v2414_v24 }
0x1067   :  { %3468 = vmatprep.subr.bf16.mxu0 %v4654_v3 }
0x1069   :  { %3449 = vmatmul.mubr.msk.bf16.vlgmr.msra.gmra.mrb[32].mxu1 %vm429_vm2, %v2161_v15 }
0x10cc   :  { %v3426_v2 = vpop.f32.mrb[28].mxu0 }
0x10cd   :  { %v4661_v11 = vadd.f32 %v3947_v27, %v3426_v2  ;;  %v1995_v7 = vpop.f32.mrb[29].mxu0 }
0x10ce   :  { %v3427_v30 = vpop.f32.mrb[30].mxu0  ;;  %v4666_v8 = vadd.f32 %v3948_v40, %v1995_v7 }
0x10cf   :  { %v1998_v56 = vpop.f32.mrb[31].mxu0  ;;  %v2235_v33 = vsel %vm74_vm0, %v4661_v11, -inf  ;;  %v4680_v54 = vadd.f32 %v3950_v63, %v3427_v30 }
0x10d0   :  { %v4673_v5 = vadd.f32 %v3949_v26, %v1998_v56  ;;  %2236 = vmax.xlane.f32.xlu0 %v2235_v33  ;;  %v2229_v37 = vsel %vm74_vm0, %v4666_v8, -inf }
0x10d1   :  { %v2238_v38 = vsel %vm74_vm0, %v4680_v54, -inf }
0x10d2   :  { %v2232_v57 = vsel %vm74_vm0, %v4673_v5, -inf }
0x10d3   :  { %2233 = vmax.xlane.f32.xlu1 %v2232_v57 }
0x10d4   :  { %2230 = vmax.xlane.f32.xlu0 %v2229_v37 }
0x10d8   :  { %2239 = vmax.xlane.f32.xlu0 %v2238_v38 }
0x112c   :  { %v3434_v18 = vpop.f32.mrb[28].mxu1 }
0x112d   :  { %v4686_v20 = vadd.f32 %v3947_v27, %v3434_v18  ;;  %v2068_v43 = vpop.f32.mrb[29].mxu1 }
0x112e   :  { %v3435_v39 = vpop.f32.mrb[30].mxu1  ;;  %v4696_v32 = vadd.f32 %v3948_v40, %v2068_v43 }
0x112f   :  { %v4688_v21 = vadd.f32 %v3950_v63, %v3435_v39  ;;  %v2071_v42 = vpop.f32.mrb[31].mxu1  ;;  %v2247_v44 = vsel %vm74_vm0, %v4686_v20, -inf }
0x1130   :  { %2248 = vmax.xlane.f32.xlu1 %v2247_v44  ;;  %v4702_v49 = vadd.f32 %v3949_v26, %v2071_v42  ;;  %v2241_v50 = vsel %vm74_vm0, %v4696_v32, -inf }
0x1131   :  { %v2250_v45 = vsel %vm74_vm0, %v4688_v21, -inf }
0x1132   :  { %2251 = vmax.xlane.f32.xlu0 %v2250_v45  ;;  %v2244_v60 = vsel %vm74_vm0, %v4702_v49, -inf }
0x1134   :  { %v3442_v25 = vpop.f32.mrb[32].mxu0 }
0x1135   :  { %v4694_v47 = vadd.f32 %v3947_v27, %v3442_v25  ;;  %v2141_v29 = vpop.f32.mrb[33].mxu0 }
0x1136   :  { %v3443_v23 = vpop.f32.mrb[34].mxu0  ;;  %v4706_v48 = vadd.f32 %v3948_v40, %v2141_v29 }
0x1137   :  { %v4698_v51 = vadd.f32 %v3950_v63, %v3443_v23  ;;  %v2144_v34 = vpop.f32.mrb[35].mxu0  ;;  %v2259_v53 = vsel %vm74_vm0, %v4694_v47, -inf }
0x1138   :  { %2260 = vmax.xlane.f32.xlu1 %v2259_v53  ;;  %v4710_v62 = vadd.f32 %v3949_v26, %v2144_v34  ;;  %v2253_v22 = vsel %vm74_vm0, %v4706_v48, -inf }
0x1139   :  { %v2262_v17 = vsel %vm74_vm0, %v4698_v51, -inf }
0x113a   :  { %2263 = vmax.xlane.f32.xlu0 %v2262_v17  ;;  %v2256_v0 = vsel %vm74_vm0, %v4710_v62, -inf }
0x113c   :  { %v3450_v36 = vpop.f32.mrb[32].mxu1  ;;  %2242 = vmax.xlane.f32.xlu1 %v2241_v50 }
0x113d   :  { %v2214_v58 = vpop.f32.mrb[33].mxu1  ;;  %v4714_v6 = vadd.f32 %v3947_v27, %v3450_v36 }
0x113e   :  { %v3451_v41 = vpop.f32.mrb[34].mxu1  ;;  %2245 = vmax.xlane.f32.xlu0 %v2244_v60  ;;  %v4722_v24 = vadd.f32 %v3948_v40, %v2214_v58  ;;  %v4736_v40 = vpack.i.bf16 %v4550_v55, %v4545_v31 }
0x113f   :  { %v2217_v10 = vpop.f32.mrb[35].mxu1  ;;  %v2271_v15 = vsel %vm74_vm0, %v4714_v6, -inf  ;;  %v4726_v2 = vadd.f32 %v3950_v63, %v3451_v41 }
0x1140   :  { %2254 = vmax.xlane.f32.xlu1 %v2253_v22  ;;  %v4718_v61 = vadd.f32 %v3949_v26, %v2217_v10  ;;  %v2265_v7 = vsel %vm74_vm0, %v4722_v24, -inf }
0x1141   :  { %v2274_v30 = vsel %vm74_vm0, %v4726_v2, -inf }
0x1142   :  { %2257 = vmax.xlane.f32.xlu0 %v2256_v0  ;;  %v2268_v27 = vsel %vm74_vm0, %v4718_v61, -inf }
0x1144   :  { %2272 = vmax.xlane.f32.xlu1 %v2271_v15 }
0x1146   :  { %2269 = vmax.xlane.f32.xlu0 %v2268_v27 }
0x1148   :  { %2266 = vmax.xlane.f32.xlu1 %v2265_v7 }
0x114a   :  { %2275 = vmax.xlane.f32.xlu0 %v2274_v30 }
0x1159   :  { %3682 = vrot.lane.b32.xlu1 %v4736_v40, %s3979_s18 }
0x115d   :  { %v2237_v56 = vpop.xlane.xlu0 %2236 }
0x115e   :  { %v2279_v38 = vsub.f32 %v4661_v11, %v2237_v56 }
0x1160   :  { %v2234_v33 = vpop.xlane.xlu1 %2233  ;;  %v2297_v39 = vmul.f32 1.442695, %v2279_v38 }
0x1161   :  { %v2231_v26 = vpop.xlane.xlu0 %2230  ;;  %v2278_v57 = vsub.f32 %v4673_v5, %v2234_v33 }
0x1162   :  { %v2277_v31 = vsub.f32 %v4666_v8, %v2231_v26 }
0x1163   :  { %v2295_v18 = vmul.f32 1.442695, %v2278_v57 }
0x1164   :  { %v2293_v55 = vmul.f32 1.442695, %v2277_v31 }
0x1165   :  { %v2240_v63 = vpop.xlane.xlu0 %2239 }
0x1166   :  { %v2280_v37 = vsub.f32 %v4680_v54, %v2240_v63 }
0x1168   :  { %v2299_v43 = vmul.f32 1.442695, %v2280_v37 }
0x116a   :  { %3847 = vpow2.f32 %v2299_v43 }
0x116b   :  { %3849 = vpow2.f32 %v2295_v18 }
0x116c   :  { %3851 = vpow2.f32 %v2297_v39 }
0x116d   :  { %3853 = vpow2.f32 %v2293_v55 }
0x1174   :  { %v4744_v42 = vpop.eup %3847 }
0x1175   :  { %v2334_v5 = vsel %vm74_vm0, %v4744_v42, 0.0  ;;  %v4748_v44 = vpop.eup %3849 }
0x1176   :  { %2335 = vadd.xlane.f32.xlu0 %v2334_v5  ;;  %v4750_v54 = vpop.eup %3851  ;;  %v2328_v11 = vsel %vm74_vm0, %v4748_v44, 0.0 }
0x1177   :  { %v2331_v8 = vsel %vm74_vm0, %v4750_v54, 0.0  ;;  %v4756_v45 = vpop.eup %3853 }
0x1178   :  { %v2325_v25 = vsel %vm74_vm0, %v4756_v45, 0.0 }
0x117a   :  { %2329 = vadd.xlane.f32.xlu0 %v2328_v11 }
0x117d   :  { %2332 = vadd.xlane.f32.xlu1 %v2331_v8 }
0x1181   :  { %2326 = vadd.xlane.f32.xlu1 %v2325_v25 }
0x11bd   :  { %v2249_v29 = vpop.xlane.xlu1 %2248 }
0x11be   :  { %v2283_v23 = vsub.f32 %v4686_v20, %v2249_v29 }
0x11bf   :  { %v2252_v34 = vpop.xlane.xlu0 %2251 }
0x11c0   :  { %v2305_v53 = vmul.f32 1.442695, %v2283_v23  ;;  %v2284_v17 = vsub.f32 %v4688_v21, %v2252_v34 }
0x11c2   :  { %3855 = vpow2.f32 %v2305_v53  ;;  %v2307_v50 = vmul.f32 1.442695, %v2284_v17 }
0x11c4   :  { %3857 = vpow2.f32 %v2307_v50 }
0x11c5   :  { %v2261_v36 = vpop.xlane.xlu1 %2260 }
0x11c6   :  { %v2287_v58 = vsub.f32 %v4694_v47, %v2261_v36 }
0x11c7   :  { %v2264_v60 = vpop.xlane.xlu0 %2263 }
0x11c8   :  { %v2313_v41 = vmul.f32 1.442695, %v2287_v58  ;;  %v2288_v10 = vsub.f32 %v4698_v51, %v2264_v60 }
0x11c9   :  { %v2243_v22 = vpop.xlane.xlu1 %2242 }
0x11ca   :  { %3859 = vpow2.f32 %v2313_v41  ;;  %v2315_v0 = vmul.f32 1.442695, %v2288_v10  ;;  %v2281_v15 = vsub.f32 %v4696_v32, %v2243_v22 }
0x11cb   :  { %v2246_v20 = vpop.xlane.xlu0 %2245 }
0x11cc   :  { %v4765_v27 = vpop.eup %3855  ;;  %3861 = vpow2.f32 %v2315_v0  ;;  %v2301_v21 = vmul.f32 1.442695, %v2281_v15  ;;  %v2282_v7 = vsub.f32 %v4702_v49, %v2246_v20 }
0x11cd   :  { %v2255_v30 = vpop.xlane.xlu1 %2254  ;;  %v2343_v47 = vsel %vm74_vm0, %v4765_v27, 0.0 }
0x11ce   :  { %v4770_v56 = vpop.eup %3857  ;;  %3863 = vpow2.f32 %v2301_v21  ;;  %v2303_v51 = vmul.f32 1.442695, %v2282_v7  ;;  %v2285_v33 = vsub.f32 %v4706_v48, %v2255_v30  ;;  %2344 = vadd.xlane.f32.xlu1 %v2343_v47 }
0x11cf   :  { %v2258_v26 = vpop.xlane.xlu0 %2257  ;;  %v2346_v32 = vsel %vm74_vm0, %v4770_v56, 0.0 }
0x11d0   :  { %3865 = vpow2.f32 %v2303_v51  ;;  %v2309_v57 = vmul.f32 1.442695, %v2285_v33  ;;  %v2286_v63 = vsub.f32 %v4710_v62, %v2258_v26  ;;  %2347 = vadd.xlane.f32.xlu0 %v2346_v32  ;;  %v3696_v51 = vpack.i.bf16 %v4560_v4, %v4554_v35 }
0x11d1   :  { %v2273_v49 = vpop.xlane.xlu1 %2272 }
0x11d2   :  { %3867 = vpow2.f32 %v2309_v57  ;;  %v2311_v37 = vmul.f32 1.442695, %v2286_v63  ;;  %v2291_v38 = vsub.f32 %v4714_v6, %v2273_v49 }
0x11d3   :  { %v2270_v18 = vpop.xlane.xlu0 %2269 }
0x11d4   :  { %v4777_v43 = vpop.eup %3859  ;;  %3869 = vpow2.f32 %v2311_v37  ;;  %v2321_v48 = vmul.f32 1.442695, %v2291_v38  ;;  %v2290_v39 = vsub.f32 %v4718_v61, %v2270_v18 }
0x11d5   :  { %v2267_v31 = vpop.xlane.xlu1 %2266  ;;  %v2355_v55 = vsel %vm74_vm0, %v4777_v43, 0.0 }
0x11d6   :  { %v4782_v5 = vpop.eup %3861  ;;  %3871 = vpow2.f32 %v2321_v48  ;;  %v2289_v62 = vsub.f32 %v4722_v24, %v2267_v31  ;;  %2356 = vadd.xlane.f32.xlu1 %v2355_v55  ;;  %v2319_v61 = vmul.f32 1.442695, %v2290_v39  ;;  %v2418_v31 = vpack.c.bf16 %v4575_v52, %v4572_v14 }
0x11d7   :  { %v2276_v11 = vpop.xlane.xlu0 %2275  ;;  %v2358_v6 = vsel %vm74_vm0, %v4782_v5, 0.0 }
0x11d8   :  { %v4787_v8 = vpop.eup %3863  ;;  %v2317_v25 = vmul.f32 1.442695, %v2289_v62  ;;  %v2292_v29 = vsub.f32 %v4726_v2, %v2276_v11  ;;  %2359 = vadd.xlane.f32.xlu0 %v2358_v6 }
0x11d9   :  { %v3683_v23 = vpop.permute.xlu1 %3682  ;;  %v2337_v34 = vsel %vm74_vm0, %v4787_v8, 0.0 }
0x11da   :  { %v4792_v53 = vpop.eup %3865  ;;  %3873 = vpow2.f32 %v2317_v25  ;;  %v2323_v24 = vmul.f32 1.442695, %v2292_v29  ;;  %v3685_v17 = vunpack.i.h.bf16 %v3683_v23  ;;  %v3684_v50 = vunpack.i.l.bf16 %v3683_v23  ;;  %2338 = vadd.xlane.f32.xlu1 %v2337_v34 }
0x11db   :  { %v2340_v36 = vsel %vm74_vm0, %v4792_v53, 0.0 }
0x11dc   :  { %v4796_v58 = vpop.eup %3867  ;;  %3875 = vpow2.f32 %v2323_v24  ;;  %v2415_v2 = vpack.c.bf16 %v3685_v17, %v3684_v50  ;;  %2341 = vadd.xlane.f32.xlu0 %v2340_v36 }
0x11dd   :  { %v2349_v60 = vsel %vm74_vm0, %v4796_v58, 0.0  ;;  %3877 = vpow2.f32 %v2319_v61 }
0x11de   :  { %v4800_v41 = vpop.eup %3869  ;;  %2350 = vadd.xlane.f32.xlu1 %v2349_v60  ;;  %3460 = vmatprep.subr.bf16.mxu1 %v2415_v2 }
0x11df   :  { %3461 = vmatpush3.bf16.msra.mxu1 %v2415_v2  ;;  %v2352_v10 = vsel %vm74_vm0, %v4800_v41, 0.0 }
0x11e0   :  { %v4804_v22 = vpop.eup %3871  ;;  %2353 = vadd.xlane.f32.xlu0 %v2352_v10 }
0x11e1   :  { %v2367_v0 = vsel %vm74_vm0, %v4804_v22, 0.0 }
0x11e2   :  { %2368 = vadd.xlane.f32.xlu1 %v2367_v0 }
0x11e4   :  { %v4808_v15 = vpop.eup %3873 }
0x11e5   :  { %v2361_v20 = vsel %vm74_vm0, %v4808_v15, 0.0 }
0x11e6   :  { %v4812_v21 = vpop.eup %3875  ;;  %2362 = vadd.xlane.f32.xlu1 %v2361_v20 }
0x11e7   :  { %v2370_v7 = vsel %vm74_vm0, %v4812_v21, 0.0  ;;  %v4816_v30 = vpop.eup %3877 }
0x11e8   :  { %2371 = vadd.xlane.f32.xlu0 %v2370_v7  ;;  %v2364_v47 = vsel %vm74_vm0, %v4816_v30, 0.0 }
0x11ec   :  { %2365 = vadd.xlane.f32.xlu0 %v2364_v47 }
0x11f7   :  { %3692 = vrot.lane.b32.xlu1 %v4736_v40, %s3980_s19 }
0x11fb   :  { %3697 = vrot.lane.b32.xlu1 %v3696_v51, %s3980_s19 }
0x1202   :  { %3687 = vrot.lane.b32.xlu0 %v3696_v51, %s3979_s18 }
0x1203   :  { %v2336_v33 = vpop.xlane.xlu0 %2335 }
0x1207   :  { %v2330_v26 = vpop.xlane.xlu0 %2329 }
0x120a   :  { %v2333_v32 = vpop.xlane.xlu1 %2332 }
0x120b   :  { %3879 = vrcp.f32 %v2333_v32 }
0x120c   :  { %3881 = vrcp.f32 %v2330_v26 }
0x120d   :  { %3883 = vrcp.f32 %v2336_v33 }
0x120e   :  { %v2327_v57 = vpop.xlane.xlu1 %2326 }
0x120f   :  { %3885 = vrcp.f32 %v2327_v57 }
0x1215   :  { %v3880_v63 = vpop.eup %3879 }
0x1216   :  { %v3882_v49 = vpop.eup %3881  ;;  %v2391_v40 = vmul.f32 %v3880_v63, %v4750_v54 }
0x1217   :  { %v3884_v37 = vpop.eup %3883  ;;  %v2390_v4 = vmul.f32 %v3882_v49, %v4748_v44 }
0x1218   :  { %v2392_v18 = vmul.f32 %v3884_v37, %v4744_v42 }
0x1219   :  { %v3886_v38 = vpop.eup %3885 }
0x121a   :  { %v2389_v35 = vmul.f32 %v3886_v38, %v4756_v45  ;;  %v2406_v39 = vpack.c.bf16 %v2392_v18, %v2391_v40 }
0x121c   :  { %v2405_v48 = vpack.c.bf16 %v2390_v4, %v2389_v35 }
0x121e   :  { %3456 = vmatprep.mubr.msk.bf16.mxu0 %vm74_vm0, %v2405_v48 }
0x121f   :  { %3457 = vmatmul.mubr.msk.bf16.vlgmr.msra.gmra.mrb[36].mxu0 %vm74_vm0, %v2406_v39 }
0x1220   :  { %3469 = vmatpush3.bf16.msra.mxu0 %v4654_v3 }
0x1221   :  { %3470 = vmatprep.subr.bf16.mxu0 %v2418_v31 }
0x1224   :  { %3471 = vmatpush3.bf16.msra.mxu0 %v2418_v31 }
0x125b   :  { %v2345_v54 = vpop.xlane.xlu1 %2344 }
0x125d   :  { %v2348_v55 = vpop.xlane.xlu0 %2347 }
0x1263   :  { %v2357_v45 = vpop.xlane.xlu1 %2356 }
0x1265   :  { %v2360_v62 = vpop.xlane.xlu0 %2359 }
0x1267   :  { %v2339_v44 = vpop.xlane.xlu1 %2338 }
0x1268   :  { %3887 = vrcp.f32 %v2339_v44 }
0x1269   :  { %v2342_v42 = vpop.xlane.xlu0 %2341 }
0x126a   :  { %3889 = vrcp.f32 %v2342_v42 }
0x126b   :  { %3891 = vrcp.f32 %v2360_v62  ;;  %v2351_v11 = vpop.xlane.xlu1 %2350 }
0x126c   :  { %3893 = vrcp.f32 %v2351_v11 }
0x126d   :  { %3895 = vrcp.f32 %v2357_v45  ;;  %v2354_v6 = vpop.xlane.xlu0 %2353 }
0x126e   :  { %3897 = vrcp.f32 %v2354_v6 }
0x126f   :  { %v2369_v14 = vpop.xlane.xlu1 %2368  ;;  %3899 = vrcp.f32 %v2348_v55 }
0x1270   :  { %3901 = vrcp.f32 %v2345_v54 }
0x1272   :  { %v3888_v52 = vpop.eup %3887 }
0x1273   :  { %v2363_v3 = vpop.xlane.xlu1 %2362  ;;  %v2393_v23 = vmul.f32 %v3888_v52, %v4787_v8 }
0x1274   :  { %v3890_v25 = vpop.eup %3889  ;;  %3903 = vrcp.f32 %v2363_v3 }
0x1275   :  { %v3892_v29 = vpop.eup %3891  ;;  %v2372_v61 = vpop.xlane.xlu0 %2371  ;;  %v2394_v34 = vmul.f32 %v3890_v25, %v4792_v53 }
0x1276   :  { %v3894_v24 = vpop.eup %3893  ;;  %v2400_v2 = vmul.f32 %v3892_v29, %v4782_v5 }
0x1277   :  { %v3896_v17 = vpop.eup %3895  ;;  %v2407_v50 = vpack.c.bf16 %v2394_v34, %v2393_v23  ;;  %v3693_v60 = vpop.permute.xlu1 %3692  ;;  %v2397_v0 = vmul.f32 %v3894_v24, %v4796_v58 }
0x1278   :  { %v3898_v36 = vpop.eup %3897  ;;  %v2399_v7 = vmul.f32 %v3896_v17, %v4777_v43  ;;  %v3695_v5 = vunpack.i.h.bf16 %v3693_v60  ;;  %v3694_v33 = vunpack.i.l.bf16 %v3693_v60 }
0x1279   :  { %v2366_v10 = vpop.xlane.xlu0 %2365  ;;  %3464 = vmatprep.mubr.msk.bf16.mxu1 %vm74_vm0, %v2407_v50  ;;  %v2398_v20 = vmul.f32 %v3898_v36, %v4800_v41  ;;  %v3900_v47 = vpop.eup %3899 }
0x127a   :  { %3905 = vrcp.f32 %v2366_v10  ;;  %v2410_v53 = vpack.c.bf16 %v2400_v2, %v2399_v7  ;;  %v3902_v58 = vpop.eup %3901  ;;  %v2396_v41 = vmul.f32 %v3900_v47, %v4770_v56  ;;  %v2419_v37 = vpack.c.bf16 %v3695_v5, %v3694_v33 }
0x127b   :  { %3907 = vrcp.f32 %v2372_v61  ;;  %v2409_v8 = vpack.c.bf16 %v2398_v20, %v2397_v0  ;;  %v3698_v57 = vpop.permute.xlu1 %3697  ;;  %v2395_v49 = vmul.f32 %v3902_v58, %v4765_v27 }
0x127c   :  { %3909 = vrcp.f32 %v2369_v14  ;;  %v3700_v38 = vunpack.i.h.bf16 %v3698_v57  ;;  %v3699_v40 = vunpack.i.l.bf16 %v3698_v57 }
0x127d   :  { %v3688_v51 = vpop.permute.xlu0 %3687  ;;  %3472 = vmatprep.mubr.msk.bf16.mxu0 %vm74_vm0, %v2409_v8  ;;  %v2408_v4 = vpack.c.bf16 %v2396_v41, %v2395_v49 }
0x127e   :  { %v3690_v26 = vunpack.i.h.bf16 %v3688_v51  ;;  %v3689_v32 = vunpack.i.l.bf16 %v3688_v51  ;;  %3473 = vmatmul.mubr.msk.bf16.vlgmr.msra.gmra.mrb[40].mxu0 %vm74_vm0, %v2410_v53  ;;  %v3904_v63 = vpop.eup %3903  ;;  %v2420_v31 = vpack.c.bf16 %v3700_v38, %v3699_v40 }
0x127f   :  { %v2401_v48 = vmul.f32 %v3904_v63, %v4808_v15 }
0x1280   :  { %v2416_v43 = vpack.c.bf16 %v3690_v26, %v3689_v32 }
0x1282   :  { %3462 = vmatprep.subr.bf16.mxu1 %v2416_v43 }
0x1283   :  { %3463 = vmatpush3.bf16.msra.mxu1 %v2416_v43 }
0x1284   :  { %v3906_v35 = vpop.eup %3905  ;;  %3476 = vmatprep.subr.bf16.mxu1 %v2419_v37 }
0x1285   :  { %v3908_v18 = vpop.eup %3907  ;;  %v2402_v39 = vmul.f32 %v3906_v35, %v4816_v30 }
0x1286   :  { %3465 = vmatmul.mubr.msk.bf16.vlgmr.msra.gmra.mrb[36].mxu1 %vm74_vm0, %v2408_v4  ;;  %v3910_v56 = vpop.eup %3909  ;;  %v2404_v27 = vmul.f32 %v3908_v18, %v4812_v21 }
0x1287   :  { %3477 = vmatpush3.bf16.msra.mxu1 %v2419_v37  ;;  %v2411_v54 = vpack.c.bf16 %v2402_v39, %v2401_v48  ;;  %v2403_v55 = vmul.f32 %v3910_v56, %v4804_v22 }
0x1288   :  { %3478 = vmatprep.subr.bf16.mxu1 %v2420_v31 }
0x1289   :  { %3480 = vmatprep.mubr.msk.bf16.mxu1 %vm74_vm0, %v2411_v54  ;;  %v2412_v45 = vpack.c.bf16 %v2404_v27, %v2403_v55 }
0x128b   :  { %3479 = vmatpush3.bf16.msra.mxu1 %v2420_v31 }
0x128e   :  { %3481 = vmatmul.mubr.msk.bf16.vlgmr.msra.gmra.mrb[40].mxu1 %vm74_vm0, %v2412_v45 }
0x12f2   :  { %v3458_v15 = vpop.f32.mrb[36].mxu0 }
0x12f3   :  { %v2461_v62 = vpop.f32.mrb[37].mxu0 }
0x12f4   :  { %v3459_v30 = vpop.f32.mrb[38].mxu0 }
0x12f5   :  { %v2464_v44 = vpop.f32.mrb[39].mxu0 }
0x1351   :  { %v3474_v42 = vpop.f32.mrb[40].mxu0 }
0x1352   :  { %v2571_v11 = vpop.f32.mrb[41].mxu0 }
0x1353   :  { %v3475_v6 = vpop.f32.mrb[42].mxu0 }
0x1354   :  { %v2574_v14 = vpop.f32.mrb[43].mxu0 }
0x1359   :  { %v3466_v52 = vpop.f32.mrb[36].mxu1 }
0x135a   :  { %2649 = vrot.lane.b32.xlu0 %v3466_v52, %s3983_s30  ;;  %v2516_v21 = vpop.f32.mrb[37].mxu1 }
0x135b   :  { %v3467_v3 = vpop.f32.mrb[38].mxu1 }
0x135c   :  { %2651 = vrot.lane.b32.xlu1 %v3467_v3, %s3983_s30  ;;  %v2519_v22 = vpop.f32.mrb[39].mxu1  ;;  %v3714_v3 = vld [vmem:[%s5005_s6 + $0x18] sm:$0xff]  }
0x135e   :  { %2665 = vrot.lane.b32.xlu0 %v3474_v42, %s3984_s12 }
0x1360   :  { %2667 = vrot.lane.b32.xlu1 %v3475_v6, %s3984_s12 }
0x1361   :  { %v3482_v25 = vpop.f32.mrb[40].mxu1 }
0x1362   :  { %v2626_v29 = vpop.f32.mrb[41].mxu1  ;;  %2645 = vrot.lane.b32.xlu0 %v2516_v21, %s3983_s30  ;;  %v3713_v21 = vld [vmem:[%s5005_s6 + $0x10] sm:$0xff]  }
0x1363   :  { %v3483_v61 = vpop.f32.mrb[42].mxu1  ;;  %3484 = vmatprep.subr.bf16.mxu0 %v3713_v21 }
0x1364   :  { %v2629_v23 = vpop.f32.mrb[43].mxu1  ;;  %2647 = vrot.lane.b32.xlu1 %v2519_v22, %s3983_s30  ;;  %3485 = vmatpush3.bf16.msra.mxu0 %v3713_v21  ;;  %v3715_v22 = vld [vmem:[%s5007_s8 + $0x20] sm:$0xff]  }
0x1365   :  { %3486 = vmatprep.subr.bf16.mxu0 %v3714_v3  ;;  %3492 = vmatprep.subr.bf16.mxu1 %v3715_v22 }
0x1366   :  { %2661 = vrot.lane.b32.xlu0 %v2571_v11, %s3984_s12  ;;  %3493 = vmatpush3.bf16.msra.mxu1 %v3715_v22 }
0x1368   :  { %2663 = vrot.lane.b32.xlu1 %v2574_v14, %s3984_s12  ;;  %3487 = vmatpush3.bf16.msra.mxu0 %v3714_v3 }
0x136a   :  { %2677 = vrot.lane.b32.xlu0 %v2626_v29, %s3985_s13 }
0x136c   :  { %2679 = vrot.lane.b32.xlu1 %v2629_v23, %s3985_s13 }
0x136e   :  { %2681 = vrot.lane.b32.xlu0 %v3482_v25, %s3985_s13  ;;  %v3716_v25 = vld [vmem:[%s5007_s8 + $0x28] sm:$0xff]  }
0x136f   :  { %3494 = vmatprep.subr.bf16.mxu1 %v3716_v25 }
0x1370   :  { %2683 = vrot.lane.b32.xlu1 %v3483_v61, %s3985_s13  ;;  %3495 = vmatpush3.bf16.msra.mxu1 %v3716_v25 }
0x13cc   :  { %v2650_v34 = vpop.permute.xlu0 %2649 }
0x13cd   :  { %v2691_v33 = vsel %vm429_vm2, %v3458_v15, %v2650_v34 }
0x13ce   :  { %v2652_v24 = vpop.permute.xlu1 %2651 }
0x13cf   :  { %v2692_v43 = vsel %vm429_vm2, %v3459_v30, %v2652_v24 }
0x13d0   :  { %v2666_v17 = vpop.permute.xlu0 %2665 }
0x13d1   :  { %v2695_v32 = vsel %vm173_vm1, %v2691_v33, %v2666_v17 }
0x13d2   :  { %v2668_v50 = vpop.permute.xlu1 %2667 }
0x13d3   :  { %v2696_v49 = vsel %vm173_vm1, %v2692_v43, %v2668_v50 }
0x13d4   :  { %v2646_v36 = vpop.permute.xlu0 %2645 }
0x13d5   :  { %v2689_v0 = vsel %vm429_vm2, %v2461_v62, %v2646_v36 }
0x13d6   :  { %v2648_v2 = vpop.permute.xlu1 %2647 }
0x13d7   :  { %v2690_v8 = vsel %vm429_vm2, %v2464_v44, %v2648_v2 }
0x13d8   :  { %v2662_v60 = vpop.permute.xlu0 %2661 }
0x13d9   :  { %v2693_v20 = vsel %vm173_vm1, %v2689_v0, %v2662_v60 }
0x13da   :  { %v2664_v10 = vpop.permute.xlu1 %2663 }
0x13db   :  { %v2694_v47 = vsel %vm173_vm1, %v2690_v8, %v2664_v10 }
0x13dc   :  { %v2678_v7 = vpop.permute.xlu0 %2677 }
0x13dd   :  { %v2697_v53 = vsel %vm1178_vm3, %v2693_v20, %v2678_v7 }
0x13de   :  { %v2701_v51 = vadd.f32 %v2697_v53, %v4528_v28  ;;  %v2680_v5 = vpop.permute.xlu1 %2679 }
0x13df   :  { %v2698_v26 = vsel %vm1178_vm3, %v2694_v47, %v2680_v5 }
0x13e0   :  { %v2702_v58 = vadd.f32 %v2698_v26, %v4530_v9  ;;  %v2682_v57 = vpop.permute.xlu0 %2681  ;;  %v2705_v41 = vsel %vm74_vm0, %v2701_v51, 0.0 }
0x13e1   :  { %v2699_v63 = vsel %vm1178_vm3, %v2695_v32, %v2682_v57  ;;  %2706 = vadd.xlane.f32.xlu0 %v2705_v41 }
0x13e2   :  { %v2703_v28 = vadd.f32 %v2699_v63, %v4535_v1  ;;  %v2684_v37 = vpop.permute.xlu1 %2683  ;;  %v2708_v38 = vsel %vm74_vm0, %v2702_v58, 0.0 }
0x13e3   :  { %v2700_v40 = vsel %vm1178_vm3, %v2696_v49, %v2684_v37  ;;  %2709 = vadd.xlane.f32.xlu1 %v2708_v38 }
0x13e4   :  { %v2704_v9 = vadd.f32 %v2700_v40, %v4537_v16  ;;  %v2711_v35 = vsel %vm74_vm0, %v2703_v28, 0.0 }
0x13e5   :  { %2712 = vadd.xlane.f32.xlu0 %v2711_v35 }
0x13e6   :  { %v2714_v4 = vsel %vm74_vm0, %v2704_v9, 0.0 }
0x13e9   :  { %2715 = vadd.xlane.f32.xlu0 %v2714_v4 }
0x146e   :  { %v2707_v18 = vpop.xlane.xlu0 %2706 }
0x146f   :  { %v2717_v48 = vmul.f32 0.03125, %v2707_v18 }
0x1470   :  { %v2710_v39 = vpop.xlane.xlu1 %2709 }
0x1471   :  { %v4885_v31 = vsub.f32 %v2701_v51, %v2717_v48  ;;  %v2718_v1 = vmul.f32 0.03125, %v2710_v39 }
0x1472   :  { %v2713_v56 = vpop.xlane.xlu0 %2712 }
0x1473   :  { %v4887_v54 = vsub.f32 %v2702_v58, %v2718_v1  ;;  %v2719_v27 = vmul.f32 0.03125, %v2713_v56  ;;  %v2725_v55 = vmul.f32 %v4885_v31, %v4885_v31 }
0x1475   :  { %v4891_v16 = vsub.f32 %v2703_v28, %v2719_v27  ;;  %v2729_v45 = vsel %vm74_vm0, %v2725_v55, 0.0  ;;  %v2726_v15 = vmul.f32 %v4887_v54, %v4887_v54  ;;  %v4920_v28 = vld [vmem:[%s5009_s10 + $0x4] sm:$0xf] }
0x1476   :  { %2730 = vadd.xlane.f32.xlu1 %v2729_v45  ;;  %v2716_v62 = vpop.xlane.xlu0 %2715  ;;  %v2796_v1 = vrot.slane %v4920_v28, %v1278_v12  ;;  %v3717_v12 = vld [vmem:[%s5007_s8 + $0x30] sm:$0xff]  }
0x1477   :  { %v2720_v30 = vmul.f32 0.03125, %v2716_v62  ;;  %v2732_v44 = vsel %vm74_vm0, %v2726_v15, 0.0  ;;  %v2727_v42 = vmul.f32 %v4891_v16, %v4891_v16  ;;  %3496 = vmatprep.subr.bf16.mxu1 %v3717_v12 }
0x1478   :  { %2733 = vadd.xlane.f32.xlu0 %v2732_v44  ;;  %3497 = vmatpush3.bf16.msra.mxu1 %v3717_v12 }
0x1479   :  { %v4899_v11 = vsub.f32 %v2704_v9, %v2720_v30  ;;  %v2735_v6 = vsel %vm74_vm0, %v2727_v42, 0.0  ;;  %v2784_v9 = vrot.slane %v4920_v28, %v1266_v59 }
0x147a   :  { %2736 = vadd.xlane.f32.xlu1 %v2735_v6 }
0x147b   :  { %v2728_v14 = vmul.f32 %v4899_v11, %v4899_v11  ;;  %v2785_v18 = vmul.f32 %v2784_v9, %v4885_v31  ;;  %v2786_v48 = vmul.f32 %v2784_v9, %v4887_v54  ;;  %v2787_v45 = vmul.f32 %v2784_v9, %v4891_v16  ;;  %v3718_v16 = vld [vmem:[%s5007_s8 + $0x38] sm:$0xff]  }
0x147c   :  { %v2788_v59 = vmul.f32 %v2784_v9, %v4899_v11  ;;  %3498 = vmatprep.subr.bf16.mxu1 %v3718_v16  ;;  %v3189_v11 = vld [vmem:[%s5006_s7 + $0x1] ss:$0 sm:$0xff] }
0x147d   :  { %v2738_v52 = vsel %vm74_vm0, %v2728_v14, 0.0  ;;  %3499 = vmatpush3.bf16.msra.mxu1 %v3718_v16 }
0x147e   :  { %2739 = vadd.xlane.f32.xlu0 %v2738_v52 }
0x1503   :  { %v2731_v29 = vpop.xlane.xlu1 %2730 }
0x1504   :  { %v2741_v61 = vmul.f32 0.032258064, %v2731_v29 }
0x1505   :  { %v2734_v23 = vpop.xlane.xlu0 %2733 }
0x1506   :  { %3911 = vrsqrt.f32 %v2741_v61  ;;  %v2742_v34 = vmul.f32 0.032258064, %v2734_v23  ;;  %vm2747_vm1 = vcmp.eq.f32.partialorder %v2741_v61, inf  ;;  %v2750_v10 = vand.u32 2147483648, %v2741_v61 }
0x1507   :  { %v2737_v24 = vpop.xlane.xlu1 %2736  ;;  %vm2749_vm2 = vcmp.eq.f32.partialorder %v2741_v61, 0.0 }
0x1508   :  { %v2743_v17 = vmul.f32 0.032258064, %v2737_v24  ;;  %3913 = vrsqrt.f32 %v2742_v34  ;;  %vm2754_vm3 = vcmp.eq.f32.partialorder %v2742_v34, inf  ;;  %v2757_v51 = vand.u32 2147483648, %v2742_v34 }
0x1509   :  { %vm2756_vm9 = vcmp.eq.f32.partialorder %v2742_v34, 0.0 }
0x150a   :  { %3915 = vrsqrt.f32 %v2743_v17  ;;  %vm2761_vm10 = vcmp.eq.f32.partialorder %v2743_v17, inf  ;;  %v2764_v26 = vand.u32 2147483648, %v2743_v17  ;;  %vm2763_vm11 = vcmp.eq.f32.partialorder %v2743_v17, 0.0 }
0x150b   :  { %v2740_v50 = vpop.xlane.xlu0 %2739 }
0x150c   :  { %v2744_v36 = vmul.f32 0.032258064, %v2740_v50 }
0x150e   :  { %3917 = vrsqrt.f32 %v2744_v36  ;;  %vm2768_vm13 = vcmp.eq.f32.partialorder %v2744_v36, inf  ;;  %v2771_v37 = vand.u32 2147483648, %v2744_v36  ;;  %vm2770_vm14 = vcmp.eq.f32.partialorder %v2744_v36, 0.0 }
0x1510   :  { %v3912_v2 = vpop.eup %3911 }
0x1511   :  { %v2746_v60 = vmul.f32 %v3912_v2, %v2741_v61 }
0x1512   :  { %v3914_v0 = vpop.eup %3913 }
0x1513   :  { %v2748_v20 = vsel %vm2747_vm1, %v2741_v61, %v2746_v60  ;;  %v2753_v53 = vmul.f32 %v3914_v0, %v2742_v34  ;;  %v3203_v60 = vld [vmem:[%s5008_s9 + $0x1] ss:$0 sm:$0xff]  ;;  %s3986_s9 = smov [#allocation2]  }
0x1514   :  { %v3916_v7 = vpop.eup %3915  ;;  %v2751_v8 = vsel %vm2749_vm2, %v2750_v10, %v2748_v20  ;;  %s3094_s3 = sshll.u32 %s3986_s9, 4  ;;  %s3095_s3 = int_to_ptr.vmem [resolvable:$true] %s3094_s3 }
0x1515   :  { %v2773_v47 = vadd.f32 1e-06, %v2751_v8  ;;  %v2760_v5 = vmul.f32 %v3916_v7, %v2743_v17  ;;  %v2755_v33 = vsel %vm2754_vm3, %v2742_v34, %v2753_v53  ;;  %s3951_s4 = scalar_lea.vmem %s3095_s3, 512  ;;  %p3956_p1 = scmp.lt.s32.totalorder %s3095_s3, %s3095_s3 }
0x1516   :  { %v2758_v32 = vsel %vm2756_vm9, %v2757_v51, %v2755_v33  ;;  %p3952_p0 = scmp.ne.s32.totalorder %s3095_s3, %s3951_s4  ;;  %p3957_p2 = scmp.lt.s32.totalorder %s3951_s4, %s3951_s4 }
0x1517   :  { %3919 = vrcp.f32 %v2773_v47  ;;  %v2762_v58 = vsel %vm2761_vm10, %v2743_v17, %v2760_v5  ;;  %v2774_v41 = vadd.f32 1e-06, %v2758_v32 }
0x1518   :  { %v3918_v57 = vpop.eup %3917  ;;  %v2765_v43 = vsel %vm2763_vm11, %v2764_v26, %v2762_v58  ;;  %p3958_p3 = por %p3957_p2, %p3956_p1 }
0x1519   :  { %v2775_v63 = vadd.f32 1e-06, %v2765_v43  ;;  %v2767_v49 = vmul.f32 %v3918_v57, %v2744_v36  ;;  %3921 = vrcp.f32 %v2774_v41 }
0x151a   :  { %p3959_p4 = pnand %p3958_p3, %p3952_p0 }
0x151b   :  { %3923 = vrcp.f32 %v2775_v63  ;;  %v2769_v38 = vsel %vm2768_vm13, %v2744_v36, %v2767_v49 }
0x151c   :  { %v2772_v40 = vsel %vm2770_vm14, %v2771_v37, %v2769_v38 }
0x151d   :  { %v2776_v35 = vadd.f32 1e-06, %v2772_v40 }
0x151f   :  { %3925 = vrcp.f32 %v2776_v35 }
0x1521   :  { %v3920_v4 = vpop.eup %3919 }
0x1522   :  { %v2789_v39 = vmul.f32 %v3920_v4, %v2785_v18 }
0x1523   :  { %v3922_v56 = vpop.eup %3921 }
0x1524   :  { %v2790_v55 = vmul.f32 %v3922_v56, %v2786_v48  ;;  %v2797_v15 = vadd.f32 %v2796_v1, %v2789_v39 }
0x1525   :  { %v3924_v27 = vpop.eup %3923 }
0x1526   :  { %v2798_v62 = vadd.f32 %v2796_v1, %v2790_v55  ;;  %v2791_v30 = vmul.f32 %v3924_v27, %v2787_v45 }
0x1528   :  { %v2801_v42 = vpack.c.bf16 %v2798_v62, %v2797_v15  ;;  %v2799_v54 = vadd.f32 %v2796_v1, %v2791_v30 }
0x1529   :  { %v3926_v44 = vpop.eup %3925 }
0x152a   :  { %v2792_v31 = vmul.f32 %v3926_v44, %v2788_v59  ;;  %3488 = vmatprep.mubr.msk.bf16.mxu0 %vm74_vm0, %v2801_v42 }
0x152c   :  { %v2800_v6 = vadd.f32 %v2796_v1, %v2792_v31 }
0x152e   :  { %v2802_v14 = vpack.c.bf16 %v2800_v6, %v2799_v54 }
0x1530   :  { %3489 = vmatmul.mubr.msk.bf16.vlgmr.msra.gmra.mrb[44].mxu0 %vm74_vm0, %v2802_v14 }
0x1603   :  { %v3490_v52 = vpop.f32.mrb[44].mxu0 }
0x1604   :  { %v2877_v21 = vadd.f32 %v3490_v52, %v3189_v11  ;;  %v2868_v3 = vpop.f32.mrb[45].mxu0 }
0x1605   :  { %v2869_v22 = vadd.f32 %v3189_v11, %v2868_v3  ;;  %v3491_v25 = vpop.f32.mrb[46].mxu0 }
0x1606   :  { %v2880_v29 = vadd.f32 %v3491_v25, %v3189_v11  ;;  %v2871_v61 = vpop.f32.mrb[47].mxu0  ;;  %v2885_v34 = vmax.f32 %v2877_v21, 0.0 }
0x1607   :  { %v2872_v23 = vadd.f32 %v3189_v11, %v2871_v61  ;;  %v2883_v17 = vmax.f32 %v2869_v22, 0.0 }
0x1608   :  { %v2886_v24 = vmax.f32 %v2880_v29, 0.0 }
0x1609   :  { %v2884_v50 = vmax.f32 %v2872_v23, 0.0 }
0x160a   :  { %v2888_v36 = vpack.c.bf16 %v2886_v24, %v2885_v34 }
0x160b   :  { %v2887_v2 = vpack.c.bf16 %v2884_v50, %v2883_v17 }
0x160d   :  { %3500 = vmatprep.mubr.msk.bf16.mxu1 %vm1409_vm12, %v2887_v2 }
0x160e   :  { %3501 = vmatmul.mubr.msk.bf16.vlgmr.msra.gmra.mrb[44].mxu1 %vm1409_vm12, %v2888_v36 }
0x16e1   :  { %v3502_v10 = vpop.f32.mrb[44].mxu1 }
0x16e2   :  { %v2970_v0 = vpop.f32.mrb[45].mxu1  ;;  %v2979_v20 = vadd.f32 %v3502_v10, %v3203_v60 }
0x16e3   :  { %v2971_v7 = vadd.f32 %v3203_v60, %v2970_v0  ;;  %v3503_v8 = vpop.f32.mrb[46].mxu1 }
0x16e4   :  { %v2973_v53 = vpop.f32.mrb[47].mxu1  ;;  %v2982_v51 = vadd.f32 %v3503_v8, %v3203_v60  ;;  %v2987_v33 = vadd.f32 %v2979_v20, %v2799_v54 }
0x16e5   :  { %v2985_v47 = vadd.f32 %v2971_v7, %v2797_v15  ;;  %v2974_v5 = vadd.f32 %v3203_v60, %v2973_v53 }
0x16e6   :  { %v2988_v58 = vadd.f32 %v2982_v51, %v2800_v6  ;;  %v2995_v41 = vsel %vm74_vm0, %v2987_v33, 0.0  ;;  %v3068_v51 = vrot.slane %v4920_v28, %v1547_v13 }
0x16e7   :  { %v2986_v26 = vadd.f32 %v2974_v5, %v2798_v62  ;;  %v2989_v32 = vsel %vm74_vm0, %v2985_v47, 0.0 }
0x16e8   :  { %2990 = vadd.xlane.f32.xlu1 %v2989_v32  ;;  %v2998_v43 = vsel %vm74_vm0, %v2988_v58, 0.0 }
0x16e9   :  { %v2992_v57 = vsel %vm74_vm0, %v2986_v26, 0.0 }
0x16ea   :  { %2993 = vadd.xlane.f32.xlu0 %v2992_v57 }
0x16ec   :  { %2996 = vadd.xlane.f32.xlu1 %v2995_v41 }
0x16ee   :  { %2999 = vadd.xlane.f32.xlu0 %v2998_v43 }
0x1775   :  { %v2991_v63 = vpop.xlane.xlu1 %2990 }
0x1776   :  { %v3001_v49 = vmul.f32 0.03125, %v2991_v63 }
0x1777   :  { %v2994_v37 = vpop.xlane.xlu0 %2993 }
0x1778   :  { %v4952_v38 = vsub.f32 %v2985_v47, %v3001_v49  ;;  %v3002_v40 = vmul.f32 0.03125, %v2994_v37 }
0x1779   :  { %v2997_v9 = vpop.xlane.xlu1 %2996 }
0x177a   :  { %v4954_v35 = vsub.f32 %v2986_v26, %v3002_v40  ;;  %v3003_v4 = vmul.f32 0.03125, %v2997_v9  ;;  %v3009_v18 = vmul.f32 %v4952_v38, %v4952_v38  ;;  %v3069_v26 = vmul.f32 %v3068_v51, %v4952_v38 }
0x177b   :  { %v3000_v48 = vpop.xlane.xlu0 %2999 }
0x177c   :  { %v4958_v39 = vsub.f32 %v2987_v33, %v3003_v4  ;;  %v3004_v1 = vmul.f32 0.03125, %v3000_v48  ;;  %v3013_v56 = vsel %vm74_vm0, %v3009_v18, 0.0  ;;  %v3010_v27 = vmul.f32 %v4954_v35, %v4954_v35 }
0x177d   :  { %3014 = vadd.xlane.f32.xlu1 %v3013_v56  ;;  %v3080_v33 = vrot.slane %v4920_v28, %v1559_v46  ;;  %v3070_v57 = vmul.f32 %v3068_v51, %v4954_v35 }
0x177e   :  { %v4963_v55 = vsub.f32 %v2988_v58, %v3004_v1  ;;  %v3011_v45 = vmul.f32 %v4958_v39, %v4958_v39  ;;  %v3016_v15 = vsel %vm74_vm0, %v3010_v27, 0.0  ;;  %v3071_v43 = vmul.f32 %v3068_v51, %v4958_v39 }
0x177f   :  { %3017 = vadd.xlane.f32.xlu0 %v3016_v15 }
0x1780   :  { %v3019_v62 = vsel %vm74_vm0, %v3011_v45, 0.0  ;;  %v3012_v59 = vmul.f32 %v4963_v55, %v4963_v55  ;;  %v3072_v13 = vmul.f32 %v3068_v51, %v4963_v55 }
0x1781   :  { %3020 = vadd.xlane.f32.xlu1 %v3019_v62 }
0x1782   :  { %v3022_v30 = vsel %vm74_vm0, %v3012_v59, 0.0 }
0x1783   :  { %3023 = vadd.xlane.f32.xlu0 %v3022_v30 }
0x180a   :  { %v3015_v44 = vpop.xlane.xlu1 %3014 }
0x180b   :  { %v3025_v42 = vmul.f32 0.032258064, %v3015_v44 }
0x180c   :  { %v3018_v31 = vpop.xlane.xlu0 %3017 }
0x180d   :  { %3927 = vrsqrt.f32 %v3025_v42  ;;  %v3026_v54 = vmul.f32 0.032258064, %v3018_v31  ;;  %vm3031_vm12 = vcmp.eq.f32.partialorder %v3025_v42, inf  ;;  %v3034_v21 = vand.u32 2147483648, %v3025_v42 }
0x180e   :  { %v3021_v6 = vpop.xlane.xlu1 %3020  ;;  %vm3033_vm15 = vcmp.eq.f32.partialorder %v3025_v42, 0.0 }
0x180f   :  { %v3027_v14 = vmul.f32 0.032258064, %v3021_v6  ;;  %3929 = vrsqrt.f32 %v3026_v54  ;;  %vm3038_vm4 = vcmp.eq.f32.partialorder %v3026_v54, inf  ;;  %v3041_v34 = vand.u32 2147483648, %v3026_v54 }
0x1810   :  { %v3024_v12 = vpop.xlane.xlu0 %3023  ;;  %vm3040_vm5 = vcmp.eq.f32.partialorder %v3026_v54, 0.0 }
0x1811   :  { %3931 = vrsqrt.f32 %v3027_v14  ;;  %v3028_v16 = vmul.f32 0.032258064, %v3024_v12  ;;  %vm3045_vm6 = vcmp.eq.f32.partialorder %v3027_v14, inf  ;;  %v3048_v50 = vand.u32 2147483648, %v3027_v14 }
0x1812   :  { %vm3047_vm7 = vcmp.eq.f32.partialorder %v3027_v14, 0.0 }
0x1813   :  { %3933 = vrsqrt.f32 %v3028_v16  ;;  %vm3052_vm8 = vcmp.eq.f32.partialorder %v3028_v16, inf  ;;  %v3055_v8 = vand.u32 2147483648, %v3028_v16  ;;  %vm3054_vm1 = vcmp.eq.f32.partialorder %v3028_v16, 0.0 }
0x1817   :  { %v3928_v11 = vpop.eup %3927 }
0x1818   :  { %v3030_v52 = vmul.f32 %v3928_v11, %v3025_v42 }
0x1819   :  { %v3930_v3 = vpop.eup %3929 }
0x181a   :  { %v3032_v22 = vsel %vm3031_vm12, %v3025_v42, %v3030_v52  ;;  %v3037_v61 = vmul.f32 %v3930_v3, %v3026_v54 }
0x181b   :  { %v3932_v25 = vpop.eup %3931  ;;  %v3035_v29 = vsel %vm3033_vm15, %v3034_v21, %v3032_v22 }
0x181c   :  { %v3057_v23 = vadd.f32 1e-06, %v3035_v29  ;;  %v3044_v24 = vmul.f32 %v3932_v25, %v3027_v14  ;;  %v3039_v17 = vsel %vm3038_vm4, %v3026_v54, %v3037_v61 }
0x181d   :  { %v3934_v36 = vpop.eup %3933  ;;  %v3042_v2 = vsel %vm3040_vm5, %v3041_v34, %v3039_v17 }
0x181e   :  { %3935 = vrcp.f32 %v3057_v23  ;;  %v3046_v60 = vsel %vm3045_vm6, %v3027_v14, %v3044_v24  ;;  %v3058_v10 = vadd.f32 1e-06, %v3042_v2  ;;  %v3051_v20 = vmul.f32 %v3934_v36, %v3028_v16 }
0x181f   :  { %v3049_v0 = vsel %vm3047_vm7, %v3048_v50, %v3046_v60 }
0x1820   :  { %v3059_v7 = vadd.f32 1e-06, %v3049_v0  ;;  %3937 = vrcp.f32 %v3058_v10  ;;  %v3053_v53 = vsel %vm3052_vm8, %v3028_v16, %v3051_v20 }
0x1821   :  { %v3056_v47 = vsel %vm3054_vm1, %v3055_v8, %v3053_v53 }
0x1822   :  { %3939 = vrcp.f32 %v3059_v7  ;;  %v3060_v5 = vadd.f32 1e-06, %v3056_v47 }
0x1824   :  { %3941 = vrcp.f32 %v3060_v5 }
0x1828   :  { %v3936_v32 = vpop.eup %3935 }
0x1829   :  { %v3073_v58 = vmul.f32 %v3936_v32, %v3069_v26 }
0x182a   :  { %v3938_v41 = vpop.eup %3937 }
0x182b   :  { %v3081_v63 = vadd.f32 %v3080_v33, %v3073_v58  ;;  %v3074_v37 = vmul.f32 %v3938_v41, %v3070_v57 }
0x182c   :  { %v3940_v49 = vpop.eup %3939 }
0x182d   :  { %v3075_v40 = vmul.f32 %v3940_v49, %v3071_v43  ;;  %3085 = vst.msk [vmem:[#allocation2] sm:$0xff] %vm74_vm0, %v3081_v63  ;;  %v3082_v19 = vadd.f32 %v3080_v33, %v3074_v37 }
0x182e   :  { %v3942_v9 = vpop.eup %3941 }
0x182f   :  { %v3083_v46 = vadd.f32 %v3080_v33, %v3075_v40  ;;  %v3076_v28 = vmul.f32 %v3942_v9, %v3072_v13  ;;  %3086 = vst.msk [vmem:[#allocation2 + $0x8] sm:$0xff] %vm74_vm0, %v3082_v19 }
0x1831   :  { %3087 = vst.msk [vmem:[#allocation2 + $0x10] sm:$0xff] %vm74_vm0, %v3083_v46  ;;  %v3084_v38 = vadd.f32 %v3080_v33, %v3076_v28 }
0x1833   :  { %3088 = vst.msk [vmem:[#allocation2 + $0x18] sm:$0xff] %vm74_vm0, %v3084_v38 }
0x1834   :  { %3962 = shalt.err (!%p3959_p4)
}
0x1835   :  { %s3963_s15 = scalar_lea.hbm %s5010_s11, 512 }
0x1836   :  { %p3964_p5 = scmp.ne.s32.totalorder %s5010_s11, %s3963_s15  ;;  %p3967_p6 = scmp.lt.u32.totalorder %s3963_s15, %s5010_s11 }
0x1838   :  { %p3969_p7 = pnand %p3967_p6, %p3964_p5 }
0x183a   :  { %3972 = shalt.err (!%p3969_p7)
}
0x183b   :  { %s3987_s22 = smov 128  }
0x183c   :  { %3100 = dma.vmem_to_hbm [thread:$0]  %s3095_s3, 512, %s5010_s11, [#allocation3], %s3987_s22, %s3987_s22, %s3983_s30  }
0x183d   :  { %3973 = dma.done.wait [#allocation3], 512  }
0x183e   :  { %3974 = vsyncadd [#allocation3], 4294966784 }
0x183f   :  { %3104 = vsyncpa [#allocation3], 1 }

</bundles_post_ra>
